<compile_context>
chip_gen: v5e
topology: v5e:2x2
jax: 0.10.0
libtpu: 0.0.40
codegen_flags: <defaults>
</compile_context>

<pallas_src>
import functools

import jax
import jax.numpy as jnp
from jax.experimental import pallas as pl
from jax.experimental.pallas import tpu as pltpu


# ---------------------------------------------------------------------------
# small helpers
# ---------------------------------------------------------------------------
def _round_up(a, m):
    return -(-a // m) * m


def _pick_rows(m, target=1024):
    """Choose (row_tile, padded_rows).  target is a multiple of 16."""
    mp = _round_up(m, 16)
    if mp <= target:
        return mp, mp
    return target, _round_up(m, target)


def _fold_layer(p):
    """Fold eval-mode BN scale into the conv weight; bf16 weight + f32 bias row."""
    w = (p["w"] * p["scale"][None, :]).astype(jnp.bfloat16)
    b = p["shift"].reshape(1, -1).astype(jnp.float32)
    return w, b


def _mish(y):
    # Mish(y) = y * tanh(softplus(y)); single-transcendental rewrite:
    #   t = exp(y);  tanh(softplus(y)) = t*(t+2) / (t*(t+2) + 2)
    t = jnp.exp(jnp.minimum(y, 20.0))          # clamp avoids f32 overflow
    u = t * (t + 2.0)
    return y * u * pl.reciprocal(u + 2.0, approx=True)


# ---------------------------------------------------------------------------
# Pallas kernels
# ---------------------------------------------------------------------------
def _chain_kernel(*refs, n_layers, last_activate):
    """Fused (matmul + bias + Mish) x n_layers on a (tm, Cin) row tile."""
    x_ref, o_ref = refs[0], refs[-1]
    h = x_ref[...]                                            # bf16 (tm, Cin)
    for l in range(n_layers):
        w_ref = refs[1 + 2 * l]
        b_ref = refs[2 + 2 * l]
        y = jnp.dot(h, w_ref[...], preferred_element_type=jnp.float32)
        y = y + b_ref[...]
        if last_activate or (l + 1 < n_layers):
            y = _mish(y)
        h = y.astype(jnp.bfloat16) if (l + 1 < n_layers) else y
    o_ref[...] = h                                            # f32


def _edge_chain_max_kernel(*refs, n_layers):
    """Fused conv chain on the neighbor slab j, plus running max over k.

    Grid = (row_tiles, k); the output BlockSpec revisits the same row tile
    across the k axis, so the max accumulates in VMEM (init at j == 0).
    """
    x_ref, o_ref = refs[0], refs[-1]
    h = x_ref[0]                                              # (tm, Cin) bf16
    for l in range(n_layers):
        w_ref = refs[1 + 2 * l]
        b_ref = refs[2 + 2 * l]
        y = jnp.dot(h, w_ref[...], preferred_element_type=jnp.float32)
        y = _mish(y + b_ref[...])
        h = y.astype(jnp.bfloat16) if (l + 1 < n_layers) else y
    j = pl.program_id(1)

    @pl.when(j == 0)
    def _():
        o_ref[...] = h

    @pl.when(j > 0)
    def _():
        o_ref[...] = jnp.maximum(o_ref[...], h)


# ---------------------------------------------------------------------------
# pallas_call wrappers
# ---------------------------------------------------------------------------
def apply_edge_block(feat, layers, *, tm_target=1024):
    """feat: (B, N, k, Cin) f32.  Fused conv chain + max over k -> (B*N, Cout)."""
    B, N, K, Cin = feat.shape
    M = B * N
    tm, Mp = _pick_rows(M, tm_target)

    x = jnp.transpose(feat.reshape(M, K, Cin), (1, 0, 2))     # (k, M, Cin)
    if Mp != M:
        x = jnp.pad(x, ((0, 0), (0, Mp - M), (0, 0)))
    x = x.astype(jnp.bfloat16)

    args = [x]
    in_specs = [pl.BlockSpec((1, tm, Cin), lambda i, j: (j, i, 0))]
    for p in layers:
        w, b = _fold_layer(p)
        cin_l, cout_l = w.shape
        args += [w, b]
        in_specs += [
            pl.BlockSpec((cin_l, cout_l), lambda i, j: (0, 0)),
            pl.BlockSpec((1, cout_l), lambda i, j: (0, 0)),
        ]
    cout = layers[-1]["w"].shape[1]

    out = pl.pallas_call(
        functools.partial(_edge_chain_max_kernel, n_layers=len(layers)),
        out_shape=jax.ShapeDtypeStruct((Mp, cout), jnp.float32),
        grid_spec=pltpu.PrefetchScalarGridSpec(
            num_scalar_prefetch=0,
            grid=(Mp // tm, K),
            in_specs=in_specs,
            out_specs=pl.BlockSpec((tm, cout), lambda i, j: (i, 0)),
        ),
        compiler_params=pltpu.CompilerParams(
            dimension_semantics=("parallel", "arbitrary")),
    )(*args)
    return out[:M]


def apply_mlp_chain(x2d, layers, *, last_activate=True, pad_out_to=None,
                    tm_target=1024):
    """x2d: (M, Cin) f32.  Fused chain of 1x1 convs -> (M, Cout_true) f32."""
    M, Cin = x2d.shape
    tm, Mp = _pick_rows(M, tm_target)
    xp = x2d if Mp == M else jnp.pad(x2d, ((0, Mp - M), (0, 0)))
    xp = xp.astype(jnp.bfloat16)

    cout_true = layers[-1]["w"].shape[1]
    cout_pad = cout_true if pad_out_to is None else max(pad_out_to, cout_true)

    args = [xp]
    in_specs = [pl.BlockSpec((tm, Cin), lambda i: (i, 0))]
    for li, p in enumerate(layers):
        w, b = _fold_layer(p)
        if li == len(layers) - 1 and cout_pad != w.shape[1]:
            # lane-dense output store: pad last-layer Cout with zero columns
            w = jnp.pad(w, ((0, 0), (0, cout_pad - w.shape[1])))
            b = jnp.pad(b, ((0, 0), (0, cout_pad - b.shape[1])))
        cin_l, cout_l = w.shape
        args += [w, b]
        in_specs += [
            pl.BlockSpec((cin_l, cout_l), lambda i: (0, 0)),
            pl.BlockSpec((1, cout_l), lambda i: (0, 0)),
        ]

    out = pl.pallas_call(
        functools.partial(_chain_kernel, n_layers=len(layers),
                          last_activate=last_activate),
        out_shape=jax.ShapeDtypeStruct((Mp, cout_pad), jnp.float32),
        grid_spec=pltpu.PrefetchScalarGridSpec(
            num_scalar_prefetch=0,
            grid=(Mp // tm,),
            in_specs=in_specs,
            out_specs=pl.BlockSpec((tm, cout_pad), lambda i: (i, 0)),
        ),
        compiler_params=pltpu.CompilerParams(
            dimension_semantics=("parallel",)),
    )(*args)
    return out[:M, :cout_true]


# ---------------------------------------------------------------------------
# JAX glue: knn + graph feature construction (gather / top-k, not hot path)
# ---------------------------------------------------------------------------
def knn(x, k):
    # x: (B, C, N)
    xt = jnp.swapaxes(x, 1, 2)                      # (B, N, C)
    ab = 2.0 * jnp.einsum("bnc,bcm->bnm", xt, x)    # (B, N, N)
    aa = jnp.sum(x * x, axis=1, keepdims=True)      # (B, 1, N)
    neg = ab - aa - jnp.swapaxes(aa, 1, 2)          # negative pairwise dist
    # TODO(synk): top-k has no Pallas TPU equivalent; done with lax.top_k.
    idx = jax.lax.top_k(neg, k)[1]                  # (B, N, k)
    return idx


def get_graph_feature(x, k):
    # x: (B, C, N)  ->  channels-last edge features (B, N, k, 2C)
    B, C, N = x.shape
    idx = knn(x, k)                                 # (B, N, k)
    xt = jnp.swapaxes(x, 1, 2)                      # (B, N, C)
    # TODO(synk): data-dependent gather kept in plain JAX (vmap indexing).
    feature = jax.vmap(lambda pts, ind: pts[ind])(xt, idx)   # (B, N, k, C)
    center = jnp.broadcast_to(xt[:, :, None, :], (B, N, k, C))
    return jnp.concatenate([feature - center, center], axis=3)


# ---------------------------------------------------------------------------
# Parameter construction (deterministic, synthetic; eval-mode BN folded)
# ---------------------------------------------------------------------------
def make_layer_params(key, cin, cout, with_bn=True, eps=1e-5):
    kw, kg, kb, km, kv = jax.random.split(key, 5)
    bound = 1.0 / jnp.sqrt(cin)
    w = jax.random.uniform(kw, (cin, cout), jnp.float32, -bound, bound)
    if with_bn:
        gamma = 1.0 + 0.1 * jax.random.normal(kg, (cout,), jnp.float32)
        beta = 0.1 * jax.random.normal(kb, (cout,), jnp.float32)
        mean = 0.1 * jax.random.normal(km, (cout,), jnp.float32)
        var = jnp.abs(1.0 + 0.1 * jax.random.normal(kv, (cout,), jnp.float32))
        scale = gamma / jnp.sqrt(var + eps)
        shift = beta - mean * scale
    else:
        scale = jnp.ones((cout,), jnp.float32)
        shift = jnp.zeros((cout,), jnp.float32)
    return {"w": w, "scale": scale, "shift": shift}


def make_model_params(key, d=3, emb_dims=128, neighbors=6):
    keys = jax.random.split(key, 9)
    return {
        "conv1": make_layer_params(keys[0], 2 * d, 64),
        "conv2": make_layer_params(keys[1], 64, 64),
        "conv3": make_layer_params(keys[2], 2 * 64, 64),
        "conv4": make_layer_params(keys[3], 64, 64),
        "conv5": make_layer_params(keys[4], 2 * 64, 64),
        "conv6": make_layer_params(keys[5], 64 * 3, emb_dims),
        "conv7": make_layer_params(keys[6], emb_dims + 64 * 3, 512),
        "conv8": make_layer_params(keys[7], 512, 256),
        "conv9": make_layer_params(keys[8], 256, d * neighbors, with_bn=False),
    }


# ---------------------------------------------------------------------------
# Full forward pass (matches Model.forward semantics)
# ---------------------------------------------------------------------------
def model_forward(params, x, *, k=10, emb_dims=128, d=3, neighbors=6):
    # x: (B, d, N)  -- same NCW layout as the PyTorch module input.
    B, _, N = x.shape

    # edge-conv block 1: conv1 -> conv2 -> max over k   (one pallas_call)
    f = get_graph_feature(x, k)                               # (B, N, k, 2d)
    x1 = apply_edge_block(f, [params["conv1"], params["conv2"]])
    x1 = x1.reshape(B, N, 64)

    # edge-conv block 2: conv3 -> conv4 -> max over k
    f = get_graph_feature(jnp.swapaxes(x1, 1, 2), k)          # (B, N, k, 128)
    x2 = apply_edge_block(f, [params["conv3"], params["conv4"]])
    x2 = x2.reshape(B, N, 64)

    # edge-conv block 3: conv5 -> max over k
    f = get_graph_feature(jnp.swapaxes(x2, 1, 2), k)          # (B, N, k, 128)
    x3 = apply_edge_block(f, [params["conv5"]])
    x3 = x3.reshape(B, N, 64)

    # conv6 + global max pool over points
    cat123 = jnp.concatenate([x1, x2, x3], axis=2)            # (B, N, 192)
    h6 = apply_mlp_chain(cat123.reshape(-1, 192), [params["conv6"]])
    h6 = h6.reshape(B, N, emb_dims)
    g = jnp.max(h6, axis=1, keepdims=True)                    # (B, 1, emb)
    g = jnp.broadcast_to(g, (B, N, emb_dims))

    # conv7 -> conv8 -> conv9 (no BN / no Mish on conv9), one pallas_call
    h = jnp.concatenate([g, x1, x2, x3], axis=2)              # (B, N, emb+192)
    out = apply_mlp_chain(
        h.reshape(-1, emb_dims + 192),
        [params["conv7"], params["conv8"], params["conv9"]],
        last_activate=False,
        pad_out_to=128,                                       # lane-dense store
    )                                                         # (B*N, d*nbrs)

    out = out.reshape(B, N, d * neighbors)
    return jnp.swapaxes(out, 1, 2)                            # (B, d*nbrs, N)


# ---------------------------------------------------------------------------
if __name__ == "__main__":
    B, D, N = 2, 3, 16
    K_KNN = 10
    EMB = 128
    NEIGHBORS = 6

    key = jax.random.PRNGKey(0)
    kx, kp = jax.random.split(key)
    x = jax.random.normal(kx, (B, D, N), jnp.float32)
    params = make_model_params(kp, d=D, emb_dims=EMB, neighbors=NEIGHBORS)

    fwd = jax.jit(
        functools.partial(
            model_forward, k=K_KNN, emb_dims=EMB, d=D, neighbors=NEIGHBORS
        )
    )
    out = fwd(params, x)
    jax.block_until_ready(out)

    assert out.shape == (B, D * NEIGHBORS, N), out.shape
    assert jnp.all(jnp.isfinite(out))
    print("KERNEL_OK")
</pallas_src>

<mosaic_0001>
module attributes {stable_mosaic.version = 11 : i64} {
  func.func @_edge_chain_max_kernel(%arg0: i32, %arg1: i32, %arg2: memref<1x32x6xbf16, #tpu.memory_space<vmem>>, %arg3: memref<6x64xbf16, #tpu.memory_space<vmem>>, %arg4: memref<1x64xf32, #tpu.memory_space<vmem>>, %arg5: memref<64x64xbf16, #tpu.memory_space<vmem>>, %arg6: memref<1x64xf32, #tpu.memory_space<vmem>>, %arg7: memref<32x64xf32, #tpu.memory_space<vmem>>) attributes {dimension_semantics = [#tpu.dimension_semantics<parallel>, #tpu.dimension_semantics<arbitrary>], iteration_bounds = array<i64: 1, 10>, scalar_prefetch = 0 : i64, scratch_operands = 0 : i64, tpu.core_type = #tpu.core_type<tc>, window_params = [{transform_indices = @transform_0, window_bounds = array<i64: 1, 32, 6>}, {pipeline_mode = #tpu.pipeline_mode<synchronous>, transform_indices = @transform_1, window_bounds = array<i64: 6, 64>}, {pipeline_mode = #tpu.pipeline_mode<synchronous>, transform_indices = @transform_2, window_bounds = array<i64: 1, 64>}, {pipeline_mode = #tpu.pipeline_mode<synchronous>, transform_indices = @transform_3, window_bounds = array<i64: 64, 64>}, {pipeline_mode = #tpu.pipeline_mode<synchronous>, transform_indices = @transform_4, window_bounds = array<i64: 1, 64>}, {transform_indices = @transform_5, window_bounds = array<i64: 32, 64>}]} {
    %c0 = arith.constant 0 : index
    %c0_0 = arith.constant 0 : index
    %c0_1 = arith.constant 0 : index
    %0 = vector.load %arg2[%c0, %c0_0, %c0_1] : memref<1x32x6xbf16, #tpu.memory_space<vmem>>, vector<1x32x6xbf16>
    %1 = vector.shape_cast %0 : vector<1x32x6xbf16> to vector<32x6xbf16>
    %c0_2 = arith.constant 0 : index
    %c0_3 = arith.constant 0 : index
    %2 = vector.load %arg3[%c0_2, %c0_3] : memref<6x64xbf16, #tpu.memory_space<vmem>>, vector<6x64xbf16>
    %cst = arith.constant dense<0.000000e+00> : vector<32x64xf32>
    %3 = tpu.matmul %1, %2, %cst {dimension_numbers = #tpu.dot_dimension_numbers<[1], [0], [0], [1], [0, 0, 1, 1], [], []>} : vector<32x6xbf16>, vector<6x64xbf16>, vector<32x64xf32> -> vector<32x64xf32>
    %c0_4 = arith.constant 0 : index
    %c0_5 = arith.constant 0 : index
    %4 = vector.load %arg4[%c0_4, %c0_5] : memref<1x64xf32, #tpu.memory_space<vmem>>, vector<1x64xf32>
    %5 = vector.broadcast %4 : vector<1x64xf32> to vector<32x64xf32>
    %6 = arith.addf %3, %5 : vector<32x64xf32>
    %cst_6 = arith.constant 2.000000e+01 : f32
    %7 = vector.broadcast %cst_6 : f32 to vector<32x64xf32>
    %8 = arith.minimumf %6, %7 : vector<32x64xf32>
    %9 = math.exp %8 : vector<32x64xf32>
    %cst_7 = arith.constant 2.000000e+00 : f32
    %10 = vector.broadcast %cst_7 : f32 to vector<32x64xf32>
    %11 = arith.addf %9, %10 : vector<32x64xf32>
    %12 = arith.mulf %9, %11 : vector<32x64xf32>
    %13 = arith.mulf %6, %12 : vector<32x64xf32>
    %cst_8 = arith.constant 2.000000e+00 : f32
    %14 = vector.broadcast %cst_8 : f32 to vector<32x64xf32>
    %15 = arith.addf %12, %14 : vector<32x64xf32>
    %16 = tpu.reciprocal %15 {approx = true} : vector<32x64xf32> -> vector<32x64xf32>
    %17 = arith.mulf %13, %16 : vector<32x64xf32>
    %18 = arith.truncf %17 : vector<32x64xf32> to vector<32x64xbf16>
    %c0_9 = arith.constant 0 : index
    %c0_10 = arith.constant 0 : index
    %19 = vector.load %arg5[%c0_9, %c0_10] : memref<64x64xbf16, #tpu.memory_space<vmem>>, vector<64x64xbf16>
    %cst_11 = arith.constant dense<0.000000e+00> : vector<32x64xf32>
    %20 = tpu.matmul %18, %19, %cst_11 {dimension_numbers = #tpu.dot_dimension_numbers<[1], [0], [0], [1], [0, 0, 1, 1], [], []>} : vector<32x64xbf16>, vector<64x64xbf16>, vector<32x64xf32> -> vector<32x64xf32>
    %c0_12 = arith.constant 0 : index
    %c0_13 = arith.constant 0 : index
    %21 = vector.load %arg6[%c0_12, %c0_13] : memref<1x64xf32, #tpu.memory_space<vmem>>, vector<1x64xf32>
    %22 = vector.broadcast %21 : vector<1x64xf32> to vector<32x64xf32>
    %23 = arith.addf %20, %22 : vector<32x64xf32>
    %cst_14 = arith.constant 2.000000e+01 : f32
    %24 = vector.broadcast %cst_14 : f32 to vector<32x64xf32>
    %25 = arith.minimumf %23, %24 : vector<32x64xf32>
    %26 = math.exp %25 : vector<32x64xf32>
    %cst_15 = arith.constant 2.000000e+00 : f32
    %27 = vector.broadcast %cst_15 : f32 to vector<32x64xf32>
    %28 = arith.addf %26, %27 : vector<32x64xf32>
    %29 = arith.mulf %26, %28 : vector<32x64xf32>
    %30 = arith.mulf %23, %29 : vector<32x64xf32>
    %cst_16 = arith.constant 2.000000e+00 : f32
    %31 = vector.broadcast %cst_16 : f32 to vector<32x64xf32>
    %32 = arith.addf %29, %31 : vector<32x64xf32>
    %33 = tpu.reciprocal %32 {approx = true} : vector<32x64xf32> -> vector<32x64xf32>
    %34 = arith.mulf %30, %33 : vector<32x64xf32>
    %c0_i32 = arith.constant 0 : i32
    %35 = arith.cmpi eq, %arg1, %c0_i32 : i32
    %36 = arith.extui %35 : i1 to i32
    %c0_i32_17 = arith.constant 0 : i32
    %37 = arith.cmpi ne, %36, %c0_i32_17 : i32
    scf.if %37 {
      %c0_20 = arith.constant 0 : index
      %c0_21 = arith.constant 0 : index
      %41 = vector.load %arg7[%c0_20, %c0_21] : memref<32x64xf32, #tpu.memory_space<vmem>>, vector<32x64xf32>
      tpu.vector_store %arg7[%c0_20, %c0_21], %34 {strides = array<i32>} : memref<32x64xf32, #tpu.memory_space<vmem>>, vector<32x64xf32>,
    } else {
    }
    %c0_i32_18 = arith.constant 0 : i32
    %38 = arith.cmpi sgt, %arg1, %c0_i32_18 : i32
    %39 = arith.extui %38 : i1 to i32
    %c0_i32_19 = arith.constant 0 : i32
    %40 = arith.cmpi ne, %39, %c0_i32_19 : i32
    scf.if %40 {
      %c0_20 = arith.constant 0 : index
      %c0_21 = arith.constant 0 : index
      %41 = vector.load %arg7[%c0_20, %c0_21] : memref<32x64xf32, #tpu.memory_space<vmem>>, vector<32x64xf32>
      %42 = arith.maximumf %41, %34 : vector<32x64xf32>
      %c0_22 = arith.constant 0 : index
      %c0_23 = arith.constant 0 : index
      %43 = vector.load %arg7[%c0_22, %c0_23] : memref<32x64xf32, #tpu.memory_space<vmem>>, vector<32x64xf32>
      tpu.vector_store %arg7[%c0_22, %c0_23], %42 {strides = array<i32>} : memref<32x64xf32, #tpu.memory_space<vmem>>, vector<32x64xf32>,
    } else {
    }
    return
  }
  func.func @transform_0(%arg0: i32, %arg1: i32) -> (i32, i32, i32) {
    %c0_i32 = arith.constant 0 : i32
    %c0_i32_0 = arith.constant 0 : i32
    return %arg1, %arg0, %c0_i32 : i32, i32, i32
  }
  func.func @transform_1(%arg0: i32, %arg1: i32) -> (i32, i32) {
    %c0_i32 = arith.constant 0 : i32
    %c0_i32_0 = arith.constant 0 : i32
    %c0_i32_1 = arith.constant 0 : i32
    return %c0_i32, %c0_i32_0 : i32, i32
  }
  func.func @transform_2(%arg0: i32, %arg1: i32) -> (i32, i32) {
    %c0_i32 = arith.constant 0 : i32
    %c0_i32_0 = arith.constant 0 : i32
    %c0_i32_1 = arith.constant 0 : i32
    return %c0_i32, %c0_i32_0 : i32, i32
  }
  func.func @transform_3(%arg0: i32, %arg1: i32) -> (i32, i32) {
    %c0_i32 = arith.constant 0 : i32
    %c0_i32_0 = arith.constant 0 : i32
    %c0_i32_1 = arith.constant 0 : i32
    return %c0_i32, %c0_i32_0 : i32, i32
  }
  func.func @transform_4(%arg0: i32, %arg1: i32) -> (i32, i32) {
    %c0_i32 = arith.constant 0 : i32
    %c0_i32_0 = arith.constant 0 : i32
    %c0_i32_1 = arith.constant 0 : i32
    return %c0_i32, %c0_i32_0 : i32, i32
  }
  func.func @transform_5(%arg0: i32, %arg1: i32) -> (i32, i32) {
    %c0_i32 = arith.constant 0 : i32
    %c0_i32_0 = arith.constant 0 : i32
    return %arg0, %c0_i32 : i32, i32
  }
}

module attributes {stable_mosaic.version = 11 : i64} {
  func.func @_edge_chain_max_kernel(%arg0: i32, %arg1: i32, %arg2: memref<1x32x128xbf16, #tpu.memory_space<vmem>>, %arg3: memref<128x64xbf16, #tpu.memory_space<vmem>>, %arg4: memref<1x64xf32, #tpu.memory_space<vmem>>, %arg5: memref<64x64xbf16, #tpu.memory_space<vmem>>, %arg6: memref<1x64xf32, #tpu.memory_space<vmem>>, %arg7: memref<32x64xf32, #tpu.memory_space<vmem>>) attributes {dimension_semantics = [#tpu.dimension_semantics<parallel>, #tpu.dimension_semantics<arbitrary>], iteration_bounds = array<i64: 1, 10>, scalar_prefetch = 0 : i64, scratch_operands = 0 : i64, tpu.core_type = #tpu.core_type<tc>, window_params = [{transform_indices = @transform_0, window_bounds = array<i64: 1, 32, 128>}, {pipeline_mode = #tpu.pipeline_mode<synchronous>, transform_indices = @transform_1, window_bounds = array<i64: 128, 64>}, {pipeline_mode = #tpu.pipeline_mode<synchronous>, transform_indices = @transform_2, window_bounds = array<i64: 1, 64>}, {pipeline_mode = #tpu.pipeline_mode<synchronous>, transform_indices = @transform_3, window_bounds = array<i64: 64, 64>}, {pipeline_mode = #tpu.pipeline_mode<synchronous>, transform_indices = @transform_4, window_bounds = array<i64: 1, 64>}, {transform_indices = @transform_5, window_bounds = array<i64: 32, 64>}]} {
    %c0 = arith.constant 0 : index
    %c0_0 = arith.constant 0 : index
    %c0_1 = arith.constant 0 : index
    %0 = vector.load %arg2[%c0, %c0_0, %c0_1] : memref<1x32x128xbf16, #tpu.memory_space<vmem>>, vector<1x32x128xbf16>
    %1 = vector.shape_cast %0 : vector<1x32x128xbf16> to vector<32x128xbf16>
    %c0_2 = arith.constant 0 : index
    %c0_3 = arith.constant 0 : index
    %2 = vector.load %arg3[%c0_2, %c0_3] : memref<128x64xbf16, #tpu.memory_space<vmem>>, vector<128x64xbf16>
    %cst = arith.constant dense<0.000000e+00> : vector<32x64xf32>
    %3 = tpu.matmul %1, %2, %cst {dimension_numbers = #tpu.dot_dimension_numbers<[1], [0], [0], [1], [0, 0, 1, 1], [], []>} : vector<32x128xbf16>, vector<128x64xbf16>, vector<32x64xf32> -> vector<32x64xf32>
    %c0_4 = arith.constant 0 : index
    %c0_5 = arith.constant 0 : index
    %4 = vector.load %arg4[%c0_4, %c0_5] : memref<1x64xf32, #tpu.memory_space<vmem>>, vector<1x64xf32>
    %5 = vector.broadcast %4 : vector<1x64xf32> to vector<32x64xf32>
    %6 = arith.addf %3, %5 : vector<32x64xf32>
    %cst_6 = arith.constant 2.000000e+01 : f32
    %7 = vector.broadcast %cst_6 : f32 to vector<32x64xf32>
    %8 = arith.minimumf %6, %7 : vector<32x64xf32>
    %9 = math.exp %8 : vector<32x64xf32>
    %cst_7 = arith.constant 2.000000e+00 : f32
    %10 = vector.broadcast %cst_7 : f32 to vector<32x64xf32>
    %11 = arith.addf %9, %10 : vector<32x64xf32>
    %12 = arith.mulf %9, %11 : vector<32x64xf32>
    %13 = arith.mulf %6, %12 : vector<32x64xf32>
    %cst_8 = arith.constant 2.000000e+00 : f32
    %14 = vector.broadcast %cst_8 : f32 to vector<32x64xf32>
    %15 = arith.addf %12, %14 : vector<32x64xf32>
    %16 = tpu.reciprocal %15 {approx = true} : vector<32x64xf32> -> vector<32x64xf32>
    %17 = arith.mulf %13, %16 : vector<32x64xf32>
    %18 = arith.truncf %17 : vector<32x64xf32> to vector<32x64xbf16>
    %c0_9 = arith.constant 0 : index
    %c0_10 = arith.constant 0 : index
    %19 = vector.load %arg5[%c0_9, %c0_10] : memref<64x64xbf16, #tpu.memory_space<vmem>>, vector<64x64xbf16>
    %cst_11 = arith.constant dense<0.000000e+00> : vector<32x64xf32>
    %20 = tpu.matmul %18, %19, %cst_11 {dimension_numbers = #tpu.dot_dimension_numbers<[1], [0], [0], [1], [0, 0, 1, 1], [], []>} : vector<32x64xbf16>, vector<64x64xbf16>, vector<32x64xf32> -> vector<32x64xf32>
    %c0_12 = arith.constant 0 : index
    %c0_13 = arith.constant 0 : index
    %21 = vector.load %arg6[%c0_12, %c0_13] : memref<1x64xf32, #tpu.memory_space<vmem>>, vector<1x64xf32>
    %22 = vector.broadcast %21 : vector<1x64xf32> to vector<32x64xf32>
    %23 = arith.addf %20, %22 : vector<32x64xf32>
    %cst_14 = arith.constant 2.000000e+01 : f32
    %24 = vector.broadcast %cst_14 : f32 to vector<32x64xf32>
    %25 = arith.minimumf %23, %24 : vector<32x64xf32>
    %26 = math.exp %25 : vector<32x64xf32>
    %cst_15 = arith.constant 2.000000e+00 : f32
    %27 = vector.broadcast %cst_15 : f32 to vector<32x64xf32>
    %28 = arith.addf %26, %27 : vector<32x64xf32>
    %29 = arith.mulf %26, %28 : vector<32x64xf32>
    %30 = arith.mulf %23, %29 : vector<32x64xf32>
    %cst_16 = arith.constant 2.000000e+00 : f32
    %31 = vector.broadcast %cst_16 : f32 to vector<32x64xf32>
    %32 = arith.addf %29, %31 : vector<32x64xf32>
    %33 = tpu.reciprocal %32 {approx = true} : vector<32x64xf32> -> vector<32x64xf32>
    %34 = arith.mulf %30, %33 : vector<32x64xf32>
    %c0_i32 = arith.constant 0 : i32
    %35 = arith.cmpi eq, %arg1, %c0_i32 : i32
    %36 = arith.extui %35 : i1 to i32
    %c0_i32_17 = arith.constant 0 : i32
    %37 = arith.cmpi ne, %36, %c0_i32_17 : i32
    scf.if %37 {
      %c0_20 = arith.constant 0 : index
      %c0_21 = arith.constant 0 : index
      %41 = vector.load %arg7[%c0_20, %c0_21] : memref<32x64xf32, #tpu.memory_space<vmem>>, vector<32x64xf32>
      tpu.vector_store %arg7[%c0_20, %c0_21], %34 {strides = array<i32>} : memref<32x64xf32, #tpu.memory_space<vmem>>, vector<32x64xf32>,
    } else {
    }
    %c0_i32_18 = arith.constant 0 : i32
    %38 = arith.cmpi sgt, %arg1, %c0_i32_18 : i32
    %39 = arith.extui %38 : i1 to i32
    %c0_i32_19 = arith.constant 0 : i32
    %40 = arith.cmpi ne, %39, %c0_i32_19 : i32
    scf.if %40 {
      %c0_20 = arith.constant 0 : index
      %c0_21 = arith.constant 0 : index
      %41 = vector.load %arg7[%c0_20, %c0_21] : memref<32x64xf32, #tpu.memory_space<vmem>>, vector<32x64xf32>
      %42 = arith.maximumf %41, %34 : vector<32x64xf32>
      %c0_22 = arith.constant 0 : index
      %c0_23 = arith.constant 0 : index
      %43 = vector.load %arg7[%c0_22, %c0_23] : memref<32x64xf32, #tpu.memory_space<vmem>>, vector<32x64xf32>
      tpu.vector_store %arg7[%c0_22, %c0_23], %42 {strides = array<i32>} : memref<32x64xf32, #tpu.memory_space<vmem>>, vector<32x64xf32>,
    } else {
    }
    return
  }
  func.func @transform_0(%arg0: i32, %arg1: i32) -> (i32, i32, i32) {
    %c0_i32 = arith.constant 0 : i32
    %c0_i32_0 = arith.constant 0 : i32
    return %arg1, %arg0, %c0_i32 : i32, i32, i32
  }
  func.func @transform_1(%arg0: i32, %arg1: i32) -> (i32, i32) {
    %c0_i32 = arith.constant 0 : i32
    %c0_i32_0 = arith.constant 0 : i32
    %c0_i32_1 = arith.constant 0 : i32
    return %c0_i32, %c0_i32_0 : i32, i32
  }
  func.func @transform_2(%arg0: i32, %arg1: i32) -> (i32, i32) {
    %c0_i32 = arith.constant 0 : i32
    %c0_i32_0 = arith.constant 0 : i32
    %c0_i32_1 = arith.constant 0 : i32
    return %c0_i32, %c0_i32_0 : i32, i32
  }
  func.func @transform_3(%arg0: i32, %arg1: i32) -> (i32, i32) {
    %c0_i32 = arith.constant 0 : i32
    %c0_i32_0 = arith.constant 0 : i32
    %c0_i32_1 = arith.constant 0 : i32
    return %c0_i32, %c0_i32_0 : i32, i32
  }
  func.func @transform_4(%arg0: i32, %arg1: i32) -> (i32, i32) {
    %c0_i32 = arith.constant 0 : i32
    %c0_i32_0 = arith.constant 0 : i32
    %c0_i32_1 = arith.constant 0 : i32
    return %c0_i32, %c0_i32_0 : i32, i32
  }
  func.func @transform_5(%arg0: i32, %arg1: i32) -> (i32, i32) {
    %c0_i32 = arith.constant 0 : i32
    %c0_i32_0 = arith.constant 0 : i32
    return %arg0, %c0_i32 : i32, i32
  }
}

module attributes {stable_mosaic.version = 11 : i64} {
  func.func @_edge_chain_max_kernel(%arg0: i32, %arg1: i32, %arg2: memref<1x32x128xbf16, #tpu.memory_space<vmem>>, %arg3: memref<128x64xbf16, #tpu.memory_space<vmem>>, %arg4: memref<1x64xf32, #tpu.memory_space<vmem>>, %arg5: memref<32x64xf32, #tpu.memory_space<vmem>>) attributes {dimension_semantics = [#tpu.dimension_semantics<parallel>, #tpu.dimension_semantics<arbitrary>], iteration_bounds = array<i64: 1, 10>, scalar_prefetch = 0 : i64, scratch_operands = 0 : i64, tpu.core_type = #tpu.core_type<tc>, window_params = [{transform_indices = @transform_0, window_bounds = array<i64: 1, 32, 128>}, {pipeline_mode = #tpu.pipeline_mode<synchronous>, transform_indices = @transform_1, window_bounds = array<i64: 128, 64>}, {pipeline_mode = #tpu.pipeline_mode<synchronous>, transform_indices = @transform_2, window_bounds = array<i64: 1, 64>}, {transform_indices = @transform_3, window_bounds = array<i64: 32, 64>}]} {
    %c0 = arith.constant 0 : index
    %c0_0 = arith.constant 0 : index
    %c0_1 = arith.constant 0 : index
    %0 = vector.load %arg2[%c0, %c0_0, %c0_1] : memref<1x32x128xbf16, #tpu.memory_space<vmem>>, vector<1x32x128xbf16>
    %1 = vector.shape_cast %0 : vector<1x32x128xbf16> to vector<32x128xbf16>
    %c0_2 = arith.constant 0 : index
    %c0_3 = arith.constant 0 : index
    %2 = vector.load %arg3[%c0_2, %c0_3] : memref<128x64xbf16, #tpu.memory_space<vmem>>, vector<128x64xbf16>
    %cst = arith.constant dense<0.000000e+00> : vector<32x64xf32>
    %3 = tpu.matmul %1, %2, %cst {dimension_numbers = #tpu.dot_dimension_numbers<[1], [0], [0], [1], [0, 0, 1, 1], [], []>} : vector<32x128xbf16>, vector<128x64xbf16>, vector<32x64xf32> -> vector<32x64xf32>
    %c0_4 = arith.constant 0 : index
    %c0_5 = arith.constant 0 : index
    %4 = vector.load %arg4[%c0_4, %c0_5] : memref<1x64xf32, #tpu.memory_space<vmem>>, vector<1x64xf32>
    %5 = vector.broadcast %4 : vector<1x64xf32> to vector<32x64xf32>
    %6 = arith.addf %3, %5 : vector<32x64xf32>
    %cst_6 = arith.constant 2.000000e+01 : f32
    %7 = vector.broadcast %cst_6 : f32 to vector<32x64xf32>
    %8 = arith.minimumf %6, %7 : vector<32x64xf32>
    %9 = math.exp %8 : vector<32x64xf32>
    %cst_7 = arith.constant 2.000000e+00 : f32
    %10 = vector.broadcast %cst_7 : f32 to vector<32x64xf32>
    %11 = arith.addf %9, %10 : vector<32x64xf32>
    %12 = arith.mulf %9, %11 : vector<32x64xf32>
    %13 = arith.mulf %6, %12 : vector<32x64xf32>
    %cst_8 = arith.constant 2.000000e+00 : f32
    %14 = vector.broadcast %cst_8 : f32 to vector<32x64xf32>
    %15 = arith.addf %12, %14 : vector<32x64xf32>
    %16 = tpu.reciprocal %15 {approx = true} : vector<32x64xf32> -> vector<32x64xf32>
    %17 = arith.mulf %13, %16 : vector<32x64xf32>
    %c0_i32 = arith.constant 0 : i32
    %18 = arith.cmpi eq, %arg1, %c0_i32 : i32
    %19 = arith.extui %18 : i1 to i32
    %c0_i32_9 = arith.constant 0 : i32
    %20 = arith.cmpi ne, %19, %c0_i32_9 : i32
    scf.if %20 {
      %c0_12 = arith.constant 0 : index
      %c0_13 = arith.constant 0 : index
      %24 = vector.load %arg5[%c0_12, %c0_13] : memref<32x64xf32, #tpu.memory_space<vmem>>, vector<32x64xf32>
      tpu.vector_store %arg5[%c0_12, %c0_13], %17 {strides = array<i32>} : memref<32x64xf32, #tpu.memory_space<vmem>>, vector<32x64xf32>,
    } else {
    }
    %c0_i32_10 = arith.constant 0 : i32
    %21 = arith.cmpi sgt, %arg1, %c0_i32_10 : i32
    %22 = arith.extui %21 : i1 to i32
    %c0_i32_11 = arith.constant 0 : i32
    %23 = arith.cmpi ne, %22, %c0_i32_11 : i32
    scf.if %23 {
      %c0_12 = arith.constant 0 : index
      %c0_13 = arith.constant 0 : index
      %24 = vector.load %arg5[%c0_12, %c0_13] : memref<32x64xf32, #tpu.memory_space<vmem>>, vector<32x64xf32>
      %25 = arith.maximumf %24, %17 : vector<32x64xf32>
      %c0_14 = arith.constant 0 : index
      %c0_15 = arith.constant 0 : index
      %26 = vector.load %arg5[%c0_14, %c0_15] : memref<32x64xf32, #tpu.memory_space<vmem>>, vector<32x64xf32>
      tpu.vector_store %arg5[%c0_14, %c0_15], %25 {strides = array<i32>} : memref<32x64xf32, #tpu.memory_space<vmem>>, vector<32x64xf32>,
    } else {
    }
    return
  }
  func.func @transform_0(%arg0: i32, %arg1: i32) -> (i32, i32, i32) {
    %c0_i32 = arith.constant 0 : i32
    %c0_i32_0 = arith.constant 0 : i32
    return %arg1, %arg0, %c0_i32 : i32, i32, i32
  }
  func.func @transform_1(%arg0: i32, %arg1: i32) -> (i32, i32) {
    %c0_i32 = arith.constant 0 : i32
    %c0_i32_0 = arith.constant 0 : i32
    %c0_i32_1 = arith.constant 0 : i32
    return %c0_i32, %c0_i32_0 : i32, i32
  }
  func.func @transform_2(%arg0: i32, %arg1: i32) -> (i32, i32) {
    %c0_i32 = arith.constant 0 : i32
    %c0_i32_0 = arith.constant 0 : i32
    %c0_i32_1 = arith.constant 0 : i32
    return %c0_i32, %c0_i32_0 : i32, i32
  }
  func.func @transform_3(%arg0: i32, %arg1: i32) -> (i32, i32) {
    %c0_i32 = arith.constant 0 : i32
    %c0_i32_0 = arith.constant 0 : i32
    return %arg0, %c0_i32 : i32, i32
  }
}

module attributes {stable_mosaic.version = 11 : i64} {
  func.func @_chain_kernel(%arg0: i32, %arg1: memref<32x192xbf16, #tpu.memory_space<vmem>>, %arg2: memref<192x128xbf16, #tpu.memory_space<vmem>>, %arg3: memref<1x128xf32, #tpu.memory_space<vmem>>, %arg4: memref<32x128xf32, #tpu.memory_space<vmem>>) attributes {dimension_semantics = [#tpu.dimension_semantics<parallel>], iteration_bounds = array<i64: 1>, scalar_prefetch = 0 : i64, scratch_operands = 0 : i64, tpu.core_type = #tpu.core_type<tc>, window_params = [{transform_indices = @transform_0, window_bounds = array<i64: 32, 192>}, {pipeline_mode = #tpu.pipeline_mode<synchronous>, transform_indices = @transform_1, window_bounds = array<i64: 192, 128>}, {pipeline_mode = #tpu.pipeline_mode<synchronous>, transform_indices = @transform_2, window_bounds = array<i64: 1, 128>}, {transform_indices = @transform_3, window_bounds = array<i64: 32, 128>}]} {
    %c0 = arith.constant 0 : index
    %c0_0 = arith.constant 0 : index
    %0 = vector.load %arg1[%c0, %c0_0] : memref<32x192xbf16, #tpu.memory_space<vmem>>, vector<32x192xbf16>
    %c0_1 = arith.constant 0 : index
    %c0_2 = arith.constant 0 : index
    %1 = vector.load %arg2[%c0_1, %c0_2] : memref<192x128xbf16, #tpu.memory_space<vmem>>, vector<192x128xbf16>
    %cst = arith.constant dense<0.000000e+00> : vector<32x128xf32>
    %2 = tpu.matmul %0, %1, %cst {dimension_numbers = #tpu.dot_dimension_numbers<[1], [0], [0], [1], [0, 0, 1, 1], [], []>} : vector<32x192xbf16>, vector<192x128xbf16>, vector<32x128xf32> -> vector<32x128xf32>
    %c0_3 = arith.constant 0 : index
    %c0_4 = arith.constant 0 : index
    %3 = vector.load %arg3[%c0_3, %c0_4] : memref<1x128xf32, #tpu.memory_space<vmem>>, vector<1x128xf32>
    %4 = vector.broadcast %3 : vector<1x128xf32> to vector<32x128xf32>
    %5 = arith.addf %2, %4 : vector<32x128xf32>
    %cst_5 = arith.constant 2.000000e+01 : f32
    %6 = vector.broadcast %cst_5 : f32 to vector<32x128xf32>
    %7 = arith.minimumf %5, %6 : vector<32x128xf32>
    %8 = math.exp %7 : vector<32x128xf32>
    %cst_6 = arith.constant 2.000000e+00 : f32
    %9 = vector.broadcast %cst_6 : f32 to vector<32x128xf32>
    %10 = arith.addf %8, %9 : vector<32x128xf32>
    %11 = arith.mulf %8, %10 : vector<32x128xf32>
    %12 = arith.mulf %5, %11 : vector<32x128xf32>
    %cst_7 = arith.constant 2.000000e+00 : f32
    %13 = vector.broadcast %cst_7 : f32 to vector<32x128xf32>
    %14 = arith.addf %11, %13 : vector<32x128xf32>
    %15 = tpu.reciprocal %14 {approx = true} : vector<32x128xf32> -> vector<32x128xf32>
    %16 = arith.mulf %12, %15 : vector<32x128xf32>
    %c0_8 = arith.constant 0 : index
    %c0_9 = arith.constant 0 : index
    %17 = vector.load %arg4[%c0_8, %c0_9] : memref<32x128xf32, #tpu.memory_space<vmem>>, vector<32x128xf32>
    tpu.vector_store %arg4[%c0_8, %c0_9], %16 {strides = array<i32>} : memref<32x128xf32, #tpu.memory_space<vmem>>, vector<32x128xf32>,
    return
  }
  func.func @transform_0(%arg0: i32) -> (i32, i32) {
    %c0_i32 = arith.constant 0 : i32
    %c0_i32_0 = arith.constant 0 : i32
    return %arg0, %c0_i32 : i32, i32
  }
  func.func @transform_1(%arg0: i32) -> (i32, i32) {
    %c0_i32 = arith.constant 0 : i32
    %c0_i32_0 = arith.constant 0 : i32
    %c0_i32_1 = arith.constant 0 : i32
    return %c0_i32, %c0_i32_0 : i32, i32
  }
  func.func @transform_2(%arg0: i32) -> (i32, i32) {
    %c0_i32 = arith.constant 0 : i32
    %c0_i32_0 = arith.constant 0 : i32
    %c0_i32_1 = arith.constant 0 : i32
    return %c0_i32, %c0_i32_0 : i32, i32
  }
  func.func @transform_3(%arg0: i32) -> (i32, i32) {
    %c0_i32 = arith.constant 0 : i32
    %c0_i32_0 = arith.constant 0 : i32
    return %arg0, %c0_i32 : i32, i32
  }
}

module attributes {stable_mosaic.version = 11 : i64} {
  func.func @_chain_kernel(%arg0: i32, %arg1: memref<32x320xbf16, #tpu.memory_space<vmem>>, %arg2: memref<320x512xbf16, #tpu.memory_space<vmem>>, %arg3: memref<1x512xf32, #tpu.memory_space<vmem>>, %arg4: memref<512x256xbf16, #tpu.memory_space<vmem>>, %arg5: memref<1x256xf32, #tpu.memory_space<vmem>>, %arg6: memref<256x128xbf16, #tpu.memory_space<vmem>>, %arg7: memref<1x128xf32, #tpu.memory_space<vmem>>, %arg8: memref<32x128xf32, #tpu.memory_space<vmem>>) attributes {dimension_semantics = [#tpu.dimension_semantics<parallel>], iteration_bounds = array<i64: 1>, scalar_prefetch = 0 : i64, scratch_operands = 0 : i64, tpu.core_type = #tpu.core_type<tc>, window_params = [{transform_indices = @transform_0, window_bounds = array<i64: 32, 320>}, {pipeline_mode = #tpu.pipeline_mode<synchronous>, transform_indices = @transform_1, window_bounds = array<i64: 320, 512>}, {pipeline_mode = #tpu.pipeline_mode<synchronous>, transform_indices = @transform_2, window_bounds = array<i64: 1, 512>}, {pipeline_mode = #tpu.pipeline_mode<synchronous>, transform_indices = @transform_3, window_bounds = array<i64: 512, 256>}, {pipeline_mode = #tpu.pipeline_mode<synchronous>, transform_indices = @transform_4, window_bounds = array<i64: 1, 256>}, {pipeline_mode = #tpu.pipeline_mode<synchronous>, transform_indices = @transform_5, window_bounds = array<i64: 256, 128>}, {pipeline_mode = #tpu.pipeline_mode<synchronous>, transform_indices = @transform_6, window_bounds = array<i64: 1, 128>}, {transform_indices = @transform_7, window_bounds = array<i64: 32, 128>}]} {
    %c0 = arith.constant 0 : index
    %c0_0 = arith.constant 0 : index
    %0 = vector.load %arg1[%c0, %c0_0] : memref<32x320xbf16, #tpu.memory_space<vmem>>, vector<32x320xbf16>
    %c0_1 = arith.constant 0 : index
    %c0_2 = arith.constant 0 : index
    %1 = vector.load %arg2[%c0_1, %c0_2] : memref<320x512xbf16, #tpu.memory_space<vmem>>, vector<320x512xbf16>
    %cst = arith.constant dense<0.000000e+00> : vector<32x512xf32>
    %2 = tpu.matmul %0, %1, %cst {dimension_numbers = #tpu.dot_dimension_numbers<[1], [0], [0], [1], [0, 0, 1, 1], [], []>} : vector<32x320xbf16>, vector<320x512xbf16>, vector<32x512xf32> -> vector<32x512xf32>
    %c0_3 = arith.constant 0 : index
    %c0_4 = arith.constant 0 : index
    %3 = vector.load %arg3[%c0_3, %c0_4] : memref<1x512xf32, #tpu.memory_space<vmem>>, vector<1x512xf32>
    %4 = vector.broadcast %3 : vector<1x512xf32> to vector<32x512xf32>
    %5 = arith.addf %2, %4 : vector<32x512xf32>
    %cst_5 = arith.constant 2.000000e+01 : f32
    %6 = vector.broadcast %cst_5 : f32 to vector<32x512xf32>
    %7 = arith.minimumf %5, %6 : vector<32x512xf32>
    %8 = math.exp %7 : vector<32x512xf32>
    %cst_6 = arith.constant 2.000000e+00 : f32
    %9 = vector.broadcast %cst_6 : f32 to vector<32x512xf32>
    %10 = arith.addf %8, %9 : vector<32x512xf32>
    %11 = arith.mulf %8, %10 : vector<32x512xf32>
    %12 = arith.mulf %5, %11 : vector<32x512xf32>
    %cst_7 = arith.constant 2.000000e+00 : f32
    %13 = vector.broadcast %cst_7 : f32 to vector<32x512xf32>
    %14 = arith.addf %11, %13 : vector<32x512xf32>
    %15 = tpu.reciprocal %14 {approx = true} : vector<32x512xf32> -> vector<32x512xf32>
    %16 = arith.mulf %12, %15 : vector<32x512xf32>
    %17 = arith.truncf %16 : vector<32x512xf32> to vector<32x512xbf16>
    %c0_8 = arith.constant 0 : index
    %c0_9 = arith.constant 0 : index
    %18 = vector.load %arg4[%c0_8, %c0_9] : memref<512x256xbf16, #tpu.memory_space<vmem>>, vector<512x256xbf16>
    %cst_10 = arith.constant dense<0.000000e+00> : vector<32x256xf32>
    %19 = tpu.matmul %17, %18, %cst_10 {dimension_numbers = #tpu.dot_dimension_numbers<[1], [0], [0], [1], [0, 0, 1, 1], [], []>} : vector<32x512xbf16>, vector<512x256xbf16>, vector<32x256xf32> -> vector<32x256xf32>
    %c0_11 = arith.constant 0 : index
    %c0_12 = arith.constant 0 : index
    %20 = vector.load %arg5[%c0_11, %c0_12] : memref<1x256xf32, #tpu.memory_space<vmem>>, vector<1x256xf32>
    %21 = vector.broadcast %20 : vector<1x256xf32> to vector<32x256xf32>
    %22 = arith.addf %19, %21 : vector<32x256xf32>
    %cst_13 = arith.constant 2.000000e+01 : f32
    %23 = vector.broadcast %cst_13 : f32 to vector<32x256xf32>
    %24 = arith.minimumf %22, %23 : vector<32x256xf32>
    %25 = math.exp %24 : vector<32x256xf32>
    %cst_14 = arith.constant 2.000000e+00 : f32
    %26 = vector.broadcast %cst_14 : f32 to vector<32x256xf32>
    %27 = arith.addf %25, %26 : vector<32x256xf32>
    %28 = arith.mulf %25, %27 : vector<32x256xf32>
    %29 = arith.mulf %22, %28 : vector<32x256xf32>
    %cst_15 = arith.constant 2.000000e+00 : f32
    %30 = vector.broadcast %cst_15 : f32 to vector<32x256xf32>
    %31 = arith.addf %28, %30 : vector<32x256xf32>
    %32 = tpu.reciprocal %31 {approx = true} : vector<32x256xf32> -> vector<32x256xf32>
    %33 = arith.mulf %29, %32 : vector<32x256xf32>
    %34 = arith.truncf %33 : vector<32x256xf32> to vector<32x256xbf16>
    %c0_16 = arith.constant 0 : index
    %c0_17 = arith.constant 0 : index
    %35 = vector.load %arg6[%c0_16, %c0_17] : memref<256x128xbf16, #tpu.memory_space<vmem>>, vector<256x128xbf16>
    %cst_18 = arith.constant dense<0.000000e+00> : vector<32x128xf32>
    %36 = tpu.matmul %34, %35, %cst_18 {dimension_numbers = #tpu.dot_dimension_numbers<[1], [0], [0], [1], [0, 0, 1, 1], [], []>} : vector<32x256xbf16>, vector<256x128xbf16>, vector<32x128xf32> -> vector<32x128xf32>
    %c0_19 = arith.constant 0 : index
    %c0_20 = arith.constant 0 : index
    %37 = vector.load %arg7[%c0_19, %c0_20] : memref<1x128xf32, #tpu.memory_space<vmem>>, vector<1x128xf32>
    %38 = vector.broadcast %37 : vector<1x128xf32> to vector<32x128xf32>
    %39 = arith.addf %36, %38 : vector<32x128xf32>
    %c0_21 = arith.constant 0 : index
    %c0_22 = arith.constant 0 : index
    %40 = vector.load %arg8[%c0_21, %c0_22] : memref<32x128xf32, #tpu.memory_space<vmem>>, vector<32x128xf32>
    tpu.vector_store %arg8[%c0_21, %c0_22], %39 {strides = array<i32>} : memref<32x128xf32, #tpu.memory_space<vmem>>, vector<32x128xf32>,
    return
  }
  func.func @transform_0(%arg0: i32) -> (i32, i32) {
    %c0_i32 = arith.constant 0 : i32
    %c0_i32_0 = arith.constant 0 : i32
    return %arg0, %c0_i32 : i32, i32
  }
  func.func @transform_1(%arg0: i32) -> (i32, i32) {
    %c0_i32 = arith.constant 0 : i32
    %c0_i32_0 = arith.constant 0 : i32
    %c0_i32_1 = arith.constant 0 : i32
    return %c0_i32, %c0_i32_0 : i32, i32
  }
  func.func @transform_2(%arg0: i32) -> (i32, i32) {
    %c0_i32 = arith.constant 0 : i32
    %c0_i32_0 = arith.constant 0 : i32
    %c0_i32_1 = arith.constant 0 : i32
    return %c0_i32, %c0_i32_0 : i32, i32
  }
  func.func @transform_3(%arg0: i32) -> (i32, i32) {
    %c0_i32 = arith.constant 0 : i32
    %c0_i32_0 = arith.constant 0 : i32
    %c0_i32_1 = arith.constant 0 : i32
    return %c0_i32, %c0_i32_0 : i32, i32
  }
  func.func @transform_4(%arg0: i32) -> (i32, i32) {
    %c0_i32 = arith.constant 0 : i32
    %c0_i32_0 = arith.constant 0 : i32
    %c0_i32_1 = arith.constant 0 : i32
    return %c0_i32, %c0_i32_0 : i32, i32
  }
  func.func @transform_5(%arg0: i32) -> (i32, i32) {
    %c0_i32 = arith.constant 0 : i32
    %c0_i32_0 = arith.constant 0 : i32
    %c0_i32_1 = arith.constant 0 : i32
    return %c0_i32, %c0_i32_0 : i32, i32
  }
  func.func @transform_6(%arg0: i32) -> (i32, i32) {
    %c0_i32 = arith.constant 0 : i32
    %c0_i32_0 = arith.constant 0 : i32
    %c0_i32_1 = arith.constant 0 : i32
    return %c0_i32, %c0_i32_0 : i32, i32
  }
  func.func @transform_7(%arg0: i32) -> (i32, i32) {
    %c0_i32 = arith.constant 0 : i32
    %c0_i32_0 = arith.constant 0 : i32
    return %arg0, %c0_i32 : i32, i32
  }
}

</mosaic_0001>

<bundles_post_ra>
// kernel: model_forward.5
= control target key start
LH: loop header
LB: loop body
LE: loop exit
PB: predicated region body
PF: predicated region fallthrough
CT: control target
= control target key end

     0   :  { %s696_s18 = smov 0   ;;  %s698_s19 = smov 0   ;;  %s799_s0 = inlined_call_operand.vmem [shape: bf16[10,32,6], index: 0, kind: input, shape index: {}]   ;;  %s800_s1 = inlined_call_operand.vmem [shape: bf16[6,64], index: 1, kind: input, shape index: {}]   ;;  %s801_s2 = inlined_call_operand.vmem [shape: f32[1,64], index: 2, kind: input, shape index: {}]   ;;  %s802_s3 = inlined_call_operand.vmem [shape: bf16[64,64], index: 3, kind: input, shape index: {}]   ;;  %s803_s4 = inlined_call_operand.vmem [shape: f32[1,64], index: 4, kind: input, shape index: {}]   ;;  %s804_s5 = inlined_call_operand.vmem [shape: f32[32,64], index: 5, kind: output, shape index: {}]  }
   0x1   :  { %s700_s20 = smov 0  }
   0x2 LB: > { %s24_s21 = sadd.s32 1, %s660_s19  ;;  %p535_p0 = scmp.ge.s32.totalorder %s664_s20, 1  ;;  %s664_s20 = sphi %s700_s20, %s15_s20   ;;  %s660_s19 = sphi %s698_s19, %s806_s19   ;;  %s656_s18 = sphi %s696_s18, %s805_s18  }
   0x3   : > { %p25_p1 = scmp.ge.s32.totalorder %s24_s21, 10  ;;  %p206_p2 = scmp.lt.s32.totalorder %s664_s20, 11 }
   0x5   : > { %s808_s21 = smov (%p25_p1, %s24_s21), 0  ;;  %p207_p3 = pnand %p535_p0, %p206_p2 }
   0x6   : > { %p239_p4 = scmp.lt.s32.totalorder (!%p207_p3), %s656_s18, 9  ;;  %p566_p5 = scmp.ne.s32.totalorder (!%p207_p3), %s656_s18, 0 }
   0x7   : > { %210 = sbr.rel (%p207_p3) target bundleno = 372 (0x174), region = 40 }
   0xc   : > { %v259_v0 = vld [vmem:[%s800_s1] sm:$0x7]  ;;  %vm281_vm0 = vcmask 1042432   ;;  %s240_s24 = scalar_select %p239_p4, %s656_s18, 9  ;;  %vm274_vm1 = vcmask 48128   ;;  %v578_v4 = vld [vmem:[%s802_s3 + $0x18] sm:$0xff] }
   0xd   : > { %v283_v1 = vsel %vm281_vm0, %v259_v0, 0  ;;  %389 = vmatpush.bf16.msra.mxu1 %v578_v4  ;;  %580 = vmatpush.bf16.msra.mxu2 %v578_v4  ;;  %v577_v5 = vld [vmem:[%s802_s3 + $0x10] sm:$0xff]  ;;  %v608_v6 = vld [vmem:[%s801_s2] ss:$0 sm:$0xff]  ;;  %v576_v7 = vld [vmem:[%s802_s3 + $0x8] sm:$0xff]  ;;  %vm378_vm2 = vcmask 523264  }
   0xe   : > { %292 = vmatpush.bf16.msra.mxu0 %v283_v1  ;;  %579 = vmatpush.bf16.msra.mxu3 %v283_v1  ;;  %s572_s25 = sshll.u32 %s240_s24, 4  ;;  %v575_v10 = vld [vmem:[%s802_s3] sm:$0xff] }
   0xf   : > { %s246_s28 = scalar_lea.vmem %s799_s0, %s572_s25  ;;  %v609_v55 = vld [vmem:[%s803_s4] ss:$0 sm:$0xff] }
  0x10   : > { %v573_v2 = vld [vmem:[%s246_s28] sm:$0xff]  ;;  %v574_v3 = vld [vmem:[%s246_s28 + $0x8] sm:$0xff] }
  0x11   : > { %546 = vmatmul.msk.bf16.vlgmr.msra.gmra.mxu0 %vm274_vm1, %v573_v2  ;;  %547 = vmatmul.msk.bf16.vlgmr.msra.gmra.mxu3 %vm274_vm1, %v574_v3 }
  0x12   : > { %390 = vmatpush.bf16.msra.mxu1 %v577_v5  ;;  %581 = vmatpush.bf16.msra.mxu2 %v577_v5 }
  0x16   : > { %391 = vmatpush.bf16.msra.mxu1 %v576_v7  ;;  %582 = vmatpush.bf16.msra.mxu2 %v576_v7 }
  0x1a   : > { %392 = vmatpush.bf16.msra.mxu1 %v575_v10  ;;  %583 = vmatpush.bf16.msra.mxu2 %v575_v10 }
  0x8e   : > { %v294_v8 = vpop.f32.mrf.mxu0 }
  0x8f   : > { %v295_v9 = vadd.f32 %v608_v6, %v294_v8 }
  0x91   : > { %v304_v11 = vmin.f32 %v295_v9, 20.0 }
  0x93   : > { %v308_v12 = vmul.f32 1.442695, %v304_v11 }
  0x94   : > { %v299_v13 = vpop.f32.mrf.mxu3 }
  0x95   : > { %610 = vpow2.f32 %v308_v12  ;;  %v300_v14 = vadd.f32 %v608_v6, %v299_v13 }
  0x96   : > { %v296_v15 = vpop.f32.mrf.mxu0 }
  0x97   : > { %v306_v16 = vmin.f32 %v300_v14, 20.0  ;;  %v297_v17 = vadd.f32 %v608_v6, %v296_v15 }
  0x99   : > { %v312_v18 = vmul.f32 1.442695, %v306_v16  ;;  %v305_v19 = vmin.f32 %v297_v17, 20.0 }
  0x9b   : > { %v611_v20 = vpop.eup %610  ;;  %612 = vpow2.f32 %v312_v18  ;;  %v310_v21 = vmul.f32 1.442695, %v305_v19 }
  0x9c   : > { %v316_v22 = vadd.f32 2.0, %v611_v20  ;;  %v301_v23 = vpop.f32.mrf.mxu3 }
  0x9d   : > { %614 = vpow2.f32 %v310_v21  ;;  %v302_v24 = vadd.f32 %v608_v6, %v301_v23 }
  0x9e   : > { %v320_v26 = vmul.f32 %v611_v20, %v316_v22 }
  0x9f   : > { %v307_v25 = vmin.f32 %v302_v24, 20.0 }
  0xa0   : > { %v328_v31 = vadd.f32 2.0, %v320_v26  ;;  %v324_v42 = vmul.f32 %v320_v26, %v295_v9 }
  0xa1   : > { %v613_v27 = vpop.eup %612  ;;  %v314_v28 = vmul.f32 1.442695, %v307_v25 }
  0xa2   : > { %v318_v29 = vadd.f32 2.0, %v613_v27 }
  0xa3   : > { %v615_v30 = vpop.eup %614  ;;  %616 = vpow2.f32 %v314_v28 }
  0xa4   : > { %v317_v32 = vadd.f32 2.0, %v615_v30  ;;  %v322_v33 = vmul.f32 %v613_v27, %v318_v29  ;;  %618 = vrcp.f32 %v328_v31 }
  0xa6   : > { %v321_v34 = vmul.f32 %v615_v30, %v317_v32  ;;  %v330_v37 = vadd.f32 2.0, %v322_v33  ;;  %v326_v49 = vmul.f32 %v322_v33, %v300_v14 }
  0xa8   : > { %v329_v35 = vadd.f32 2.0, %v321_v34  ;;  %v325_v43 = vmul.f32 %v321_v34, %v297_v17 }
  0xa9   : > { %v617_v36 = vpop.eup %616 }
  0xaa   : > { %620 = vrcp.f32 %v329_v35  ;;  %v319_v38 = vadd.f32 2.0, %v617_v36  ;;  %v619_v40 = vpop.eup %618 }
  0xab   : > { %622 = vrcp.f32 %v330_v37  ;;  %v336_v45 = vmul.f32 %v619_v40, %v324_v42 }
  0xac   : > { %v323_v39 = vmul.f32 %v617_v36, %v319_v38 }
  0xae   : > { %v331_v41 = vadd.f32 2.0, %v323_v39  ;;  %v327_v50 = vmul.f32 %v323_v39, %v302_v24 }
  0xb0   : > { %v621_v44 = vpop.eup %620  ;;  %624 = vrcp.f32 %v331_v41 }
  0xb1   : > { %v337_v46 = vmul.f32 %v621_v44, %v325_v43  ;;  %v623_v48 = vpop.eup %622 }
  0xb2   : > { %v338_v52 = vmul.f32 %v623_v48, %v326_v49 }
  0xb3   : > { %v340_v47 = vpack.c.bf16 %v337_v46, %v336_v45 }
  0xb5   : > { %564 = vmatmul.msk.bf16.vlgmr.msra.gmra.mxu1 %vm378_vm2, %v340_v47 }
  0xb6   : > { %v625_v51 = vpop.eup %624 }
  0xb7   : > { %v339_v53 = vmul.f32 %v625_v51, %v327_v50 }
  0xb9   : > { %v341_v54 = vpack.c.bf16 %v339_v53, %v338_v52 }
  0xbb   : > { %565 = vmatmul.msk.bf16.vlgmr.msra.gmra.mxu2 %vm378_vm2, %v341_v54 }
 0x132   : > { %v394_v56 = vpop.f32.mrf.mxu1 }
 0x133   : > { %v395_v57 = vadd.f32 %v609_v55, %v394_v56 }
 0x135   : > { %v404_v58 = vmin.f32 %v395_v57, 20.0 }
 0x137   : > { %v408_v59 = vmul.f32 1.442695, %v404_v58 }
 0x139   : > { %626 = vpow2.f32 %v408_v59 }
 0x13a   : > { %v396_v60 = vpop.f32.mrf.mxu1 }
 0x13b   : > { %v397_v61 = vadd.f32 %v609_v55, %v396_v60 }
 0x13d   : > { %v405_v62 = vmin.f32 %v397_v61, 20.0 }
 0x13e   : > { %v399_v63 = vpop.f32.mrf.mxu2 }
 0x13f   : > { %v627_v0 = vpop.eup %626  ;;  %v410_v1 = vmul.f32 1.442695, %v405_v62  ;;  %v400_v2 = vadd.f32 %v609_v55, %v399_v63 }
 0x140   : > { %v416_v3 = vadd.f32 2.0, %v627_v0 }
 0x141   : > { %628 = vpow2.f32 %v410_v1  ;;  %v406_v4 = vmin.f32 %v400_v2, 20.0 }
 0x142   : > { %v420_v5 = vmul.f32 %v627_v0, %v416_v3 }
 0x143   : > { %v412_v6 = vmul.f32 1.442695, %v406_v4 }
 0x144   : > { %v428_v7 = vadd.f32 2.0, %v420_v5  ;;  %v424_v15 = vmul.f32 %v420_v5, %v395_v57 }
 0x145   : > { %630 = vpow2.f32 %v412_v6 }
 0x146   : > { %632 = vrcp.f32 %v428_v7  ;;  %v401_v8 = vpop.f32.mrf.mxu2 }
 0x147   : > { %v629_v9 = vpop.eup %628  ;;  %v402_v10 = vadd.f32 %v609_v55, %v401_v8 }
 0x148   : > { %v417_v11 = vadd.f32 2.0, %v629_v9 }
 0x149   : > { %v407_v12 = vmin.f32 %v402_v10, 20.0 }
 0x14a   : > { %v421_v13 = vmul.f32 %v629_v9, %v417_v11 }
 0x14b   : > { %v631_v14 = vpop.eup %630  ;;  %v414_v16 = vmul.f32 1.442695, %v407_v12 }
 0x14c   : > { %v633_v17 = vpop.eup %632  ;;  %v429_v18 = vadd.f32 2.0, %v421_v13  ;;  %v418_v19 = vadd.f32 2.0, %v631_v14  ;;  %v425_v24 = vmul.f32 %v421_v13, %v397_v61 }
 0x14d   : > { %v436_v20 = vmul.f32 %v633_v17, %v424_v15  ;;  %634 = vpow2.f32 %v414_v16 }
 0x14e   : > { %636 = vrcp.f32 %v429_v18  ;;  %v422_v21 = vmul.f32 %v631_v14, %v418_v19 }
 0x150   : > { %v430_v22 = vadd.f32 2.0, %v422_v21  ;;  %v426_v29 = vmul.f32 %v422_v21, %v400_v2 }
 0x152   : > { %638 = vrcp.f32 %v430_v22 }
 0x153   : > { %v635_v23 = vpop.eup %634 }
 0x154   : > { %v637_v25 = vpop.eup %636  ;;  %v419_v26 = vadd.f32 2.0, %v635_v23 }
 0x155   : > { %v437_v27 = vmul.f32 %v637_v25, %v425_v24 }
 0x156   : > { %v423_v28 = vmul.f32 %v635_v23, %v419_v26 }
 0x158   : > { %v639_v30 = vpop.eup %638  ;;  %v431_v31 = vadd.f32 2.0, %v423_v28  ;;  %v427_v33 = vmul.f32 %v423_v28, %v402_v10 }
 0x159   : > { %v438_v32 = vmul.f32 %v639_v30, %v426_v29 }
 0x15a   : > { %640 = vrcp.f32 %v431_v31 }
 0x15d   : > { %443 = sbr.rel (%p566_p5) target bundleno = 358 (0x166), region = 44 }
 0x160   : > { %v641_v34 = vpop.eup %640 }
 0x161   : > { %v439_v35 = vmul.f32 %v641_v34, %v427_v33 }
 0x162   : > { %444 = vst.msk [vmem:[%s804_s5] sm:$0xff] %vm378_vm2, %v436_v20 }
 0x163   : > { %445 = vst.msk [vmem:[%s804_s5 + $0x8] sm:$0xff] %vm378_vm2, %v437_v27 }
 0x164   : > { %446 = vst.msk [vmem:[%s804_s5 + $0x10] sm:$0xff] %vm378_vm2, %v438_v32 }
 0x165   : > { %447 = vst.msk [vmem:[%s804_s5 + $0x18] sm:$0xff] %vm378_vm2, %v439_v35 }
 0x166 PF: > { %p567_p6 = scmp.le.s32.totalorder %s656_s18, 0 }
 0x168   : > { %451 = sbr.rel (%p567_p6) target bundleno = 372 (0x174), region = 48 }
 0x16d   : > { %v452_v36 = vld [vmem:[%s804_s5] sm:$0xff]  ;;  %v453_v37 = vld [vmem:[%s804_s5 + $0x8] sm:$0xff]  ;;  %v454_v38 = vld [vmem:[%s804_s5 + $0x10] sm:$0xff] }
 0x16e   : > { %v456_v39 = vmax.f32 %v452_v36, %v436_v20  ;;  %v457_v40 = vmax.f32 %v453_v37, %v437_v27  ;;  %v458_v41 = vmax.f32 %v454_v38, %v438_v32  ;;  %v455_v42 = vld [vmem:[%s804_s5 + $0x18] sm:$0xff] }
 0x16f   : > { %v459_v43 = vmax.f32 %v455_v42, %v439_v35 }
 0x170   : > { %460 = vst.msk [vmem:[%s804_s5] sm:$0xff] %vm378_vm2, %v456_v39 }
 0x171   : > { %461 = vst.msk [vmem:[%s804_s5 + $0x8] sm:$0xff] %vm378_vm2, %v457_v40 }
 0x172   : > { %462 = vst.msk [vmem:[%s804_s5 + $0x10] sm:$0xff] %vm378_vm2, %v458_v41 }
 0x173   : > { %463 = vst.msk [vmem:[%s804_s5 + $0x18] sm:$0xff] %vm378_vm2, %v459_v43 }
 0x174 PF: > { %s15_s20 = sadd.s32 1, %s664_s20   ;;  %s805_s18 = smov %s660_s19 }
 0x175   : > { %p12_p7 = scmp.ge.s32.totalorder %s15_s20, 12   ;;  %s806_s19 = smov %s808_s21 }
 0x177   :  { %14 = sbr.rel (!%p12_p7) target bundleno = 2 (0x2), region = 78 }

// kernel: model_forward.6
= control target key start
LH: loop header
LB: loop body
LE: loop exit
PB: predicated region body
PF: predicated region fallthrough
CT: control target
= control target key end

     0   :  { %s791_s18 = smov 0   ;;  %s793_s19 = smov 0   ;;  %s915_s0 = inlined_call_operand.vmem [shape: bf16[10,32,128], index: 0, kind: input, shape index: {}]   ;;  %s916_s1 = inlined_call_operand.vmem [shape: bf16[128,64], index: 1, kind: input, shape index: {}]   ;;  %s917_s2 = inlined_call_operand.vmem [shape: f32[1,64], index: 2, kind: input, shape index: {}]   ;;  %s918_s3 = inlined_call_operand.vmem [shape: bf16[64,64], index: 3, kind: input, shape index: {}]   ;;  %s919_s4 = inlined_call_operand.vmem [shape: f32[1,64], index: 4, kind: input, shape index: {}]   ;;  %s920_s5 = inlined_call_operand.vmem [shape: f32[32,64], index: 5, kind: output, shape index: {}]  }
   0x1   :  { %s795_s20 = smov 0  }
   0x2 LB: > { %s24_s21 = sadd.s32 1, %s755_s19  ;;  %p589_p0 = scmp.ge.s32.totalorder %s759_s20, 1  ;;  %s759_s20 = sphi %s795_s20, %s15_s20   ;;  %s755_s19 = sphi %s793_s19, %s922_s19   ;;  %s751_s18 = sphi %s791_s18, %s921_s18  }
   0x3   : > { %p25_p1 = scmp.ge.s32.totalorder %s24_s21, 10  ;;  %p206_p2 = scmp.lt.s32.totalorder %s759_s20, 11 }
   0x5   : > { %s924_s21 = smov (%p25_p1, %s24_s21), 0  ;;  %p207_p3 = pnand %p589_p0, %p206_p2 }
   0x6   : > { %p239_p4 = scmp.lt.s32.totalorder (!%p207_p3), %s751_s18, 9  ;;  %p650_p5 = scmp.ne.s32.totalorder (!%p207_p3), %s751_s18, 0 }
   0x7   : > { %210 = sbr.rel (%p207_p3) target bundleno = 403 (0x193), region = 40 }
   0xc   : > { %v666_v0 = vld [vmem:[%s916_s1 + $0x38] sm:$0xff]  ;;  %v665_v1 = vld [vmem:[%s916_s1 + $0x30] sm:$0xff]  ;;  %v664_v2 = vld [vmem:[%s916_s1 + $0x28] sm:$0xff]  ;;  %s240_s9 = scalar_select %p239_p4, %s751_s18, 9  ;;  %vm432_vm0 = vcmask 523264  }
   0xd   : > { %339 = vmatpush.bf16.msra.mxu0 %v666_v0  ;;  %671 = vmatpush.bf16.msra.mxu2 %v666_v0  ;;  %v663_v3 = vld [vmem:[%s916_s1 + $0x20] sm:$0xff]  ;;  %v662_v4 = vld [vmem:[%s916_s1 + $0x18] sm:$0xff]  ;;  %v661_v5 = vld [vmem:[%s916_s1 + $0x10] sm:$0xff] }
   0xe   : > { %v660_v6 = vld [vmem:[%s916_s1 + $0x8] sm:$0xff]  ;;  %s656_s12 = sshll.u32 %s240_s9, 4  ;;  %v659_v7 = vld [vmem:[%s916_s1] sm:$0xff]  ;;  %v670_v10 = vld [vmem:[%s918_s3 + $0x18] sm:$0xff] }
   0xf   : > { %s246_s17 = scalar_lea.vmem %s915_s0, %s656_s12  ;;  %443 = vmatpush.bf16.msra.mxu1 %v670_v10  ;;  %v669_v11 = vld [vmem:[%s918_s3 + $0x10] sm:$0xff]  ;;  %v703_v12 = vld [vmem:[%s917_s2] ss:$0 sm:$0xff]  ;;  %v668_v13 = vld [vmem:[%s918_s3 + $0x8] sm:$0xff] }
  0x10   : > { %v657_v8 = vld [vmem:[%s246_s17] sm:$0xff]  ;;  %v658_v9 = vld [vmem:[%s246_s17 + $0x8] sm:$0xff] }
  0x11   : > { %340 = vmatpush.bf16.msra.mxu0 %v665_v1  ;;  %672 = vmatpush.bf16.msra.mxu2 %v665_v1  ;;  %v667_v16 = vld [vmem:[%s918_s3] sm:$0xff] }
  0x12   : > { %v704_v61 = vld [vmem:[%s919_s4] ss:$0 sm:$0xff] }
  0x13   : > { %444 = vmatpush.bf16.msra.mxu1 %v669_v11 }
  0x15   : > { %341 = vmatpush.bf16.msra.mxu0 %v664_v2  ;;  %673 = vmatpush.bf16.msra.mxu2 %v664_v2 }
  0x17   : > { %445 = vmatpush.bf16.msra.mxu1 %v668_v13 }
  0x19   : > { %342 = vmatpush.bf16.msra.mxu0 %v663_v3  ;;  %674 = vmatpush.bf16.msra.mxu2 %v663_v3 }
  0x1b   : > { %446 = vmatpush.bf16.msra.mxu1 %v667_v16 }
  0x1d   : > { %343 = vmatpush.bf16.msra.mxu0 %v662_v4  ;;  %675 = vmatpush.bf16.msra.mxu2 %v662_v4 }
  0x21   : > { %344 = vmatpush.bf16.msra.mxu0 %v661_v5  ;;  %676 = vmatpush.bf16.msra.mxu2 %v661_v5 }
  0x25   : > { %345 = vmatpush.bf16.msra.mxu0 %v660_v6  ;;  %677 = vmatpush.bf16.msra.mxu2 %v660_v6 }
  0x29   : > { %346 = vmatpush.bf16.msra.mxu0 %v659_v7  ;;  %678 = vmatpush.bf16.msra.mxu2 %v659_v7 }
  0x2c   : > { %347 = vmatmul.bf16.vlgmr.msra.gmra.mxu0 %v657_v8  ;;  %352 = vmatmul.bf16.vlgmr.msra.gmra.mxu2 %v658_v9 }
  0xa9   : > { %v348_v14 = vpop.f32.mrf.mxu0 }
  0xaa   : > { %v349_v15 = vadd.f32 %v703_v12, %v348_v14 }
  0xac   : > { %v358_v17 = vmin.f32 %v349_v15, 20.0 }
  0xae   : > { %v362_v18 = vmul.f32 1.442695, %v358_v17 }
  0xaf   : > { %v353_v19 = vpop.f32.mrf.mxu2 }
  0xb0   : > { %705 = vpow2.f32 %v362_v18  ;;  %v354_v20 = vadd.f32 %v703_v12, %v353_v19 }
  0xb1   : > { %v350_v21 = vpop.f32.mrf.mxu0 }
  0xb2   : > { %v351_v22 = vadd.f32 %v703_v12, %v350_v21  ;;  %v360_v24 = vmin.f32 %v354_v20, 20.0 }
  0xb4   : > { %v359_v23 = vmin.f32 %v351_v22, 20.0  ;;  %v366_v30 = vmul.f32 1.442695, %v360_v24 }
  0xb6   : > { %v706_v25 = vpop.eup %705  ;;  %v364_v26 = vmul.f32 1.442695, %v359_v23 }
  0xb7   : > { %v370_v27 = vadd.f32 2.0, %v706_v25  ;;  %v355_v28 = vpop.f32.mrf.mxu2 }
  0xb8   : > { %707 = vpow2.f32 %v364_v26  ;;  %v356_v29 = vadd.f32 %v703_v12, %v355_v28 }
  0xb9   : > { %v374_v32 = vmul.f32 %v706_v25, %v370_v27  ;;  %709 = vpow2.f32 %v366_v30 }
  0xba   : > { %v361_v31 = vmin.f32 %v356_v29, 20.0 }
  0xbb   : > { %v382_v35 = vadd.f32 2.0, %v374_v32  ;;  %v378_v45 = vmul.f32 %v374_v32, %v349_v15 }
  0xbc   : > { %v368_v33 = vmul.f32 1.442695, %v361_v31 }
  0xbe   : > { %v708_v34 = vpop.eup %707  ;;  %711 = vpow2.f32 %v368_v33 }
  0xbf   : > { %v371_v36 = vadd.f32 2.0, %v708_v34  ;;  %v710_v38 = vpop.eup %709  ;;  %713 = vrcp.f32 %v382_v35 }
  0xc0   : > { %v372_v42 = vadd.f32 2.0, %v710_v38 }
  0xc1   : > { %v375_v37 = vmul.f32 %v708_v34, %v371_v36 }
  0xc2   : > { %v376_v48 = vmul.f32 %v710_v38, %v372_v42 }
  0xc3   : > { %v383_v39 = vadd.f32 2.0, %v375_v37  ;;  %v379_v46 = vmul.f32 %v375_v37, %v351_v22 }
  0xc4   : > { %v712_v40 = vpop.eup %711  ;;  %v384_v53 = vadd.f32 2.0, %v376_v48  ;;  %v380_v57 = vmul.f32 %v376_v48, %v354_v20 }
  0xc5   : > { %715 = vrcp.f32 %v383_v39  ;;  %v373_v41 = vadd.f32 2.0, %v712_v40  ;;  %v714_v43 = vpop.eup %713 }
  0xc6   : > { %v390_v49 = vmul.f32 %v714_v43, %v378_v45 }
  0xc7   : > { %v377_v44 = vmul.f32 %v712_v40, %v373_v41 }
  0xc9   : > { %v385_v51 = vadd.f32 2.0, %v377_v44  ;;  %v381_v55 = vmul.f32 %v377_v44, %v356_v29 }
  0xcb   : > { %v716_v47 = vpop.eup %715  ;;  %717 = vrcp.f32 %v385_v51 }
  0xcc   : > { %v391_v50 = vmul.f32 %v716_v47, %v379_v46  ;;  %719 = vrcp.f32 %v384_v53 }
  0xce   : > { %v394_v52 = vpack.c.bf16 %v391_v50, %v390_v49 }
  0xd0   : > { %648 = vmatmul.msk.bf16.vlgmr.msra.gmra.mxu1 %vm432_vm0, %v394_v52 }
  0xd1   : > { %v718_v54 = vpop.eup %717 }
  0xd2   : > { %v720_v56 = vpop.eup %719  ;;  %v393_v58 = vmul.f32 %v718_v54, %v381_v55 }
  0xd3   : > { %v392_v59 = vmul.f32 %v720_v56, %v380_v57 }
  0xd5   : > { %v395_v60 = vpack.c.bf16 %v393_v58, %v392_v59 }
  0xe0   : > { %649 = vmatmul.msk.bf16.gmra.mxu1 %vm432_vm0, %v395_v60 }
 0x14d   : > { %v448_v62 = vpop.f32.mrf.mxu1 }
 0x14e   : > { %v449_v63 = vadd.f32 %v704_v61, %v448_v62 }
 0x150   : > { %v458_v0 = vmin.f32 %v449_v63, 20.0 }
 0x152   : > { %v462_v1 = vmul.f32 1.442695, %v458_v0 }
 0x154   : > { %721 = vpow2.f32 %v462_v1 }
 0x155   : > { %v450_v2 = vpop.f32.mrf.mxu1 }
 0x156   : > { %v451_v3 = vadd.f32 %v704_v61, %v450_v2 }
 0x158   : > { %v459_v4 = vmin.f32 %v451_v3, 20.0 }
 0x15a   : > { %v722_v5 = vpop.eup %721  ;;  %v464_v6 = vmul.f32 1.442695, %v459_v4 }
 0x15b   : > { %v470_v7 = vadd.f32 2.0, %v722_v5 }
 0x15c   : > { %723 = vpow2.f32 %v464_v6 }
 0x15d   : > { %v474_v8 = vmul.f32 %v722_v5, %v470_v7  ;;  %v453_v9 = vpop.f32.mrf.mxu1 }
 0x15e   : > { %v454_v10 = vadd.f32 %v704_v61, %v453_v9 }
 0x15f   : > { %v482_v11 = vadd.f32 2.0, %v474_v8  ;;  %v478_v18 = vmul.f32 %v474_v8, %v449_v63 }
 0x160   : > { %v460_v12 = vmin.f32 %v454_v10, 20.0 }
 0x161   : > { %725 = vrcp.f32 %v482_v11 }
 0x162   : > { %v724_v13 = vpop.eup %723  ;;  %v466_v14 = vmul.f32 1.442695, %v460_v12 }
 0x163   : > { %v471_v15 = vadd.f32 2.0, %v724_v13 }
 0x164   : > { %727 = vpow2.f32 %v466_v14 }
 0x165   : > { %v475_v16 = vmul.f32 %v724_v13, %v471_v15  ;;  %v455_v17 = vpop.f32.mrf.mxu1 }
 0x166   : > { %v456_v19 = vadd.f32 %v704_v61, %v455_v17 }
 0x167   : > { %v726_v20 = vpop.eup %725  ;;  %v483_v21 = vadd.f32 2.0, %v475_v16  ;;  %v479_v28 = vmul.f32 %v475_v16, %v451_v3 }
 0x168   : > { %v490_v22 = vmul.f32 %v726_v20, %v478_v18  ;;  %v461_v23 = vmin.f32 %v456_v19, 20.0 }
 0x169   : > { %729 = vrcp.f32 %v483_v21 }
 0x16a   : > { %v728_v24 = vpop.eup %727  ;;  %v468_v25 = vmul.f32 1.442695, %v461_v23 }
 0x16b   : > { %v472_v26 = vadd.f32 2.0, %v728_v24 }
 0x16c   : > { %731 = vpow2.f32 %v468_v25 }
 0x16d   : > { %v476_v27 = vmul.f32 %v728_v24, %v472_v26 }
 0x16f   : > { %v730_v29 = vpop.eup %729  ;;  %v484_v30 = vadd.f32 2.0, %v476_v27  ;;  %v480_v35 = vmul.f32 %v476_v27, %v454_v10 }
 0x170   : > { %v491_v31 = vmul.f32 %v730_v29, %v479_v28 }
 0x171   : > { %733 = vrcp.f32 %v484_v30 }
 0x172   : > { %v732_v32 = vpop.eup %731 }
 0x173   : > { %v473_v33 = vadd.f32 2.0, %v732_v32 }
 0x175   : > { %v477_v34 = vmul.f32 %v732_v32, %v473_v33 }
 0x177   : > { %v734_v36 = vpop.eup %733  ;;  %v485_v37 = vadd.f32 2.0, %v477_v34  ;;  %v481_v39 = vmul.f32 %v477_v34, %v456_v19 }
 0x178   : > { %v492_v38 = vmul.f32 %v734_v36, %v480_v35 }
 0x179   : > { %735 = vrcp.f32 %v485_v37 }
 0x17c   : > { %497 = sbr.rel (%p650_p5) target bundleno = 389 (0x185), region = 44 }
 0x17f   : > { %v736_v40 = vpop.eup %735 }
 0x180   : > { %v493_v41 = vmul.f32 %v736_v40, %v481_v39 }
 0x181   : > { %498 = vst.msk [vmem:[%s920_s5] sm:$0xff] %vm432_vm0, %v490_v22 }
 0x182   : > { %499 = vst.msk [vmem:[%s920_s5 + $0x8] sm:$0xff] %vm432_vm0, %v491_v31 }
 0x183   : > { %500 = vst.msk [vmem:[%s920_s5 + $0x10] sm:$0xff] %vm432_vm0, %v492_v38 }
 0x184   : > { %501 = vst.msk [vmem:[%s920_s5 + $0x18] sm:$0xff] %vm432_vm0, %v493_v41 }
 0x185 PF: > { %p651_p6 = scmp.le.s32.totalorder %s751_s18, 0 }
 0x187   : > { %505 = sbr.rel (%p651_p6) target bundleno = 403 (0x193), region = 48 }
 0x18c   : > { %v506_v42 = vld [vmem:[%s920_s5] sm:$0xff]  ;;  %v507_v43 = vld [vmem:[%s920_s5 + $0x8] sm:$0xff]  ;;  %v508_v44 = vld [vmem:[%s920_s5 + $0x10] sm:$0xff] }
 0x18d   : > { %v510_v45 = vmax.f32 %v506_v42, %v490_v22  ;;  %v511_v46 = vmax.f32 %v507_v43, %v491_v31  ;;  %v512_v47 = vmax.f32 %v508_v44, %v492_v38  ;;  %v509_v48 = vld [vmem:[%s920_s5 + $0x18] sm:$0xff] }
 0x18e   : > { %v513_v49 = vmax.f32 %v509_v48, %v493_v41 }
 0x18f   : > { %514 = vst.msk [vmem:[%s920_s5] sm:$0xff] %vm432_vm0, %v510_v45 }
 0x190   : > { %515 = vst.msk [vmem:[%s920_s5 + $0x8] sm:$0xff] %vm432_vm0, %v511_v46 }
 0x191   : > { %516 = vst.msk [vmem:[%s920_s5 + $0x10] sm:$0xff] %vm432_vm0, %v512_v47 }
 0x192   : > { %517 = vst.msk [vmem:[%s920_s5 + $0x18] sm:$0xff] %vm432_vm0, %v513_v49 }
 0x193 PF: > { %s15_s20 = sadd.s32 1, %s759_s20   ;;  %s921_s18 = smov %s755_s19 }
 0x194   : > { %p12_p7 = scmp.ge.s32.totalorder %s15_s20, 12   ;;  %s922_s19 = smov %s924_s21 }
 0x196   :  { %14 = sbr.rel (!%p12_p7) target bundleno = 2 (0x2), region = 78 }

// kernel: model_forward.7
= control target key start
LH: loop header
LB: loop body
LE: loop exit
PB: predicated region body
PF: predicated region fallthrough
CT: control target
= control target key end

     0   :  { %s589_s12 = smov 0   ;;  %s591_s13 = smov 0   ;;  %s688_s0 = inlined_call_operand.vmem [shape: bf16[10,32,128], index: 0, kind: input, shape index: {}]   ;;  %s689_s1 = inlined_call_operand.vmem [shape: bf16[128,64], index: 1, kind: input, shape index: {}]   ;;  %s690_s2 = inlined_call_operand.vmem [shape: f32[1,64], index: 2, kind: input, shape index: {}]   ;;  %s691_s3 = inlined_call_operand.vmem [shape: f32[32,64], index: 3, kind: output, shape index: {}]  }
   0x1   :  { %s593_s14 = smov 0  }
   0x2 LB: > { %s22_s15 = sadd.s32 1, %s563_s13  ;;  %p436_p0 = scmp.ge.s32.totalorder %s567_s14, 1  ;;  %s567_s14 = sphi %s593_s14, %s13_s14   ;;  %s563_s13 = sphi %s591_s13, %s693_s13   ;;  %s559_s12 = sphi %s589_s12, %s692_s12  }
   0x3   : > { %p23_p1 = scmp.ge.s32.totalorder %s22_s15, 10  ;;  %p156_p2 = scmp.lt.s32.totalorder %s567_s14, 11 }
   0x5   : > { %s695_s15 = smov (%p23_p1, %s22_s15), 0  ;;  %p157_p3 = pnand %p436_p0, %p156_p2 }
   0x6   : > { %p185_p4 = scmp.lt.s32.totalorder (!%p157_p3), %s559_s12, 9  ;;  %p479_p5 = scmp.ne.s32.totalorder (!%p157_p3), %s559_s12, 0 }
   0x7   : > { %160 = sbr.rel (%p157_p3) target bundleno = 225 (0xe1), region = 32 }
   0xc   : > { %v495_v0 = vld [vmem:[%s689_s1 + $0x38] sm:$0xff]  ;;  %v494_v1 = vld [vmem:[%s689_s1 + $0x30] sm:$0xff]  ;;  %v493_v2 = vld [vmem:[%s689_s1 + $0x28] sm:$0xff]  ;;  %s186_s28 = scalar_select %p185_p4, %s559_s12, 9 }
   0xd   : > { %284 = vmatpush.bf16.msra.mxu0 %v495_v0  ;;  %496 = vmatpush.bf16.msra.mxu1 %v495_v0  ;;  %v492_v3 = vld [vmem:[%s689_s1 + $0x20] sm:$0xff]  ;;  %v491_v4 = vld [vmem:[%s689_s1 + $0x18] sm:$0xff]  ;;  %v490_v5 = vld [vmem:[%s689_s1 + $0x10] sm:$0xff] }
   0xe   : > { %v489_v6 = vld [vmem:[%s689_s1 + $0x8] sm:$0xff]  ;;  %s485_s4 = sshll.u32 %s186_s28, 4  ;;  %v488_v7 = vld [vmem:[%s689_s1] sm:$0xff] }
   0xf   : > { %s192_s9 = scalar_lea.vmem %s688_s0, %s485_s4  ;;  %v528_v10 = vld [vmem:[%s690_s2] ss:$0 sm:$0xff] }
  0x10   : > { %v486_v8 = vld [vmem:[%s192_s9] sm:$0xff]  ;;  %v487_v9 = vld [vmem:[%s192_s9 + $0x8] sm:$0xff] }
  0x11   : > { %285 = vmatpush.bf16.msra.mxu0 %v494_v1  ;;  %497 = vmatpush.bf16.msra.mxu1 %v494_v1 }
  0x15   : > { %286 = vmatpush.bf16.msra.mxu0 %v493_v2  ;;  %498 = vmatpush.bf16.msra.mxu1 %v493_v2 }
  0x19   : > { %287 = vmatpush.bf16.msra.mxu0 %v492_v3  ;;  %499 = vmatpush.bf16.msra.mxu1 %v492_v3 }
  0x1d   : > { %288 = vmatpush.bf16.msra.mxu0 %v491_v4  ;;  %500 = vmatpush.bf16.msra.mxu1 %v491_v4 }
  0x21   : > { %289 = vmatpush.bf16.msra.mxu0 %v490_v5  ;;  %501 = vmatpush.bf16.msra.mxu1 %v490_v5 }
  0x25   : > { %290 = vmatpush.bf16.msra.mxu0 %v489_v6  ;;  %502 = vmatpush.bf16.msra.mxu1 %v489_v6 }
  0x29   : > { %291 = vmatpush.bf16.msra.mxu0 %v488_v7  ;;  %503 = vmatpush.bf16.msra.mxu1 %v488_v7 }
  0x2c   : > { %292 = vmatmul.bf16.vlgmr.msra.gmra.mxu0 %v486_v8  ;;  %297 = vmatmul.bf16.vlgmr.msra.gmra.mxu1 %v487_v9 }
  0xa9   : > { %v293_v11 = vpop.f32.mrf.mxu0  ;;  %v298_v12 = vpop.f32.mrf.mxu1 }
  0xaa   : > { %v294_v13 = vadd.f32 %v528_v10, %v293_v11  ;;  %v299_v14 = vadd.f32 %v528_v10, %v298_v12 }
  0xac   : > { %v303_v15 = vmin.f32 %v294_v13, 20.0  ;;  %v305_v16 = vmin.f32 %v299_v14, 20.0 }
  0xae   : > { %v307_v17 = vmul.f32 1.442695, %v303_v15  ;;  %v311_v18 = vmul.f32 1.442695, %v305_v16 }
  0xb0   : > { %529 = vpow2.f32 %v307_v17 }
  0xb1   : > { %531 = vpow2.f32 %v311_v18  ;;  %v295_v19 = vpop.f32.mrf.mxu0  ;;  %v300_v20 = vpop.f32.mrf.mxu1 }
  0xb2   : > { %v296_v21 = vadd.f32 %v528_v10, %v295_v19  ;;  %v301_v22 = vadd.f32 %v528_v10, %v300_v20 }
  0xb4   : > { %v304_v23 = vmin.f32 %v296_v21, 20.0  ;;  %v306_v24 = vmin.f32 %v301_v22, 20.0 }
  0xb6   : > { %v530_v25 = vpop.eup %529  ;;  %v309_v26 = vmul.f32 1.442695, %v304_v23  ;;  %v313_v27 = vmul.f32 1.442695, %v306_v24 }
  0xb7   : > { %v532_v28 = vpop.eup %531  ;;  %v315_v29 = vadd.f32 2.0, %v530_v25 }
  0xb8   : > { %v317_v30 = vadd.f32 2.0, %v532_v28  ;;  %533 = vpow2.f32 %v309_v26 }
  0xb9   : > { %v319_v31 = vmul.f32 %v530_v25, %v315_v29  ;;  %535 = vpow2.f32 %v313_v27 }
  0xba   : > { %v321_v32 = vmul.f32 %v532_v28, %v317_v30 }
  0xbb   : > { %v327_v33 = vadd.f32 2.0, %v319_v31  ;;  %v323_v40 = vmul.f32 %v319_v31, %v294_v13 }
  0xbc   : > { %v329_v34 = vadd.f32 2.0, %v321_v32  ;;  %v325_v43 = vmul.f32 %v321_v32, %v299_v14 }
  0xbd   : > { %537 = vrcp.f32 %v327_v33 }
  0xbe   : > { %v534_v35 = vpop.eup %533  ;;  %539 = vrcp.f32 %v329_v34 }
  0xbf   : > { %v536_v36 = vpop.eup %535  ;;  %v316_v37 = vadd.f32 2.0, %v534_v35 }
  0xc0   : > { %v318_v38 = vadd.f32 2.0, %v536_v36 }
  0xc1   : > { %v320_v39 = vmul.f32 %v534_v35, %v316_v37 }
  0xc2   : > { %v322_v41 = vmul.f32 %v536_v36, %v318_v38 }
  0xc3   : > { %v538_v42 = vpop.eup %537  ;;  %v328_v44 = vadd.f32 2.0, %v320_v39  ;;  %v324_v49 = vmul.f32 %v320_v39, %v296_v21 }
  0xc4   : > { %v540_v45 = vpop.eup %539  ;;  %v335_v46 = vmul.f32 %v538_v42, %v323_v40  ;;  %v330_v47 = vadd.f32 2.0, %v322_v41  ;;  %v326_v51 = vmul.f32 %v322_v41, %v301_v22 }
  0xc5   : > { %v337_v48 = vmul.f32 %v540_v45, %v325_v43  ;;  %541 = vrcp.f32 %v328_v44 }
  0xc6   : > { %543 = vrcp.f32 %v330_v47 }
  0xc9   : > { %342 = sbr.rel (%p479_p5) target bundleno = 211 (0xd3), region = 36 }
  0xcb   : > { %v542_v50 = vpop.eup %541 }
  0xcc   : > { %v544_v52 = vpop.eup %543  ;;  %v336_v53 = vmul.f32 %v542_v50, %v324_v49 }
  0xcd   : > { %v338_v54 = vmul.f32 %v544_v52, %v326_v51 }
  0xce   : > { %vm343_vm0 = vcmask 523264  }
  0xcf   : > { %344 = vst.msk [vmem:[%s691_s3] sm:$0xff] %vm343_vm0, %v335_v46 }
  0xd0   : > { %345 = vst.msk [vmem:[%s691_s3 + $0x8] sm:$0xff] %vm343_vm0, %v336_v53 }
  0xd1   : > { %346 = vst.msk [vmem:[%s691_s3 + $0x10] sm:$0xff] %vm343_vm0, %v337_v48 }
  0xd2   : > { %347 = vst.msk [vmem:[%s691_s3 + $0x18] sm:$0xff] %vm343_vm0, %v338_v54 }
  0xd3 PF: > { %p480_p6 = scmp.le.s32.totalorder %s559_s12, 0 }
  0xd5   : > { %351 = sbr.rel (%p480_p6) target bundleno = 225 (0xe1), region = 40 }
  0xda   : > { %v352_v55 = vld [vmem:[%s691_s3] sm:$0xff]  ;;  %vm360_vm1 = vcmask 523264   ;;  %v353_v56 = vld [vmem:[%s691_s3 + $0x8] sm:$0xff]  ;;  %v354_v57 = vld [vmem:[%s691_s3 + $0x10] sm:$0xff] }
  0xdb   : > { %v356_v58 = vmax.f32 %v352_v55, %v335_v46  ;;  %v357_v59 = vmax.f32 %v353_v56, %v336_v53  ;;  %v358_v60 = vmax.f32 %v354_v57, %v337_v48  ;;  %v355_v61 = vld [vmem:[%s691_s3 + $0x18] sm:$0xff] }
  0xdc   : > { %v359_v62 = vmax.f32 %v355_v61, %v338_v54 }
  0xdd   : > { %361 = vst.msk [vmem:[%s691_s3] sm:$0xff] %vm360_vm1, %v356_v58 }
  0xde   : > { %362 = vst.msk [vmem:[%s691_s3 + $0x8] sm:$0xff] %vm360_vm1, %v357_v59 }
  0xdf   : > { %363 = vst.msk [vmem:[%s691_s3 + $0x10] sm:$0xff] %vm360_vm1, %v358_v60 }
  0xe0   : > { %364 = vst.msk [vmem:[%s691_s3 + $0x18] sm:$0xff] %vm360_vm1, %v359_v62 }
  0xe1 PF: > { %s13_s14 = sadd.s32 1, %s567_s14   ;;  %s692_s12 = smov %s563_s13 }
  0xe2   : > { %p10_p7 = scmp.ge.s32.totalorder %s13_s14, 12   ;;  %s693_s13 = smov %s695_s15 }
  0xe4   :  { %12 = sbr.rel (!%p10_p7) target bundleno = 2 (0x2), region = 70 }

// kernel: model_forward.8
= control target key start
LH: loop header
LB: loop body
LE: loop exit
PB: predicated region body
PF: predicated region fallthrough
CT: control target
= control target key end

     0   :  { %vm137_vm0 = vcmask 523264   ;;  %s430_s1 = inlined_call_operand.vmem [shape: bf16[192,128], index: 1, kind: input, shape index: {}]   ;;  %s431_s0 = inlined_call_operand.vmem [shape: bf16[32,192], index: 0, kind: input, shape index: {}]   ;;  %s432_s2 = inlined_call_operand.vmem [shape: f32[1,128], index: 2, kind: input, shape index: {}]   ;;  %s433_s3 = inlined_call_operand.vmem [shape: f32[32,128], index: 3, kind: output, shape index: {}]  }
   0x1   :  { %v303_v0 = vld [vmem:[%s430_s1 + $0x38] sm:$0xff]  ;;  %v302_v2 = vld [vmem:[%s430_s1 + $0x30] sm:$0xff]  ;;  %v301_v4 = vld [vmem:[%s430_s1 + $0x28] sm:$0xff] }
   0x2   :  { %v307_v1 = vld [vmem:[%s430_s1 + $0x58] sm:$0xff]  ;;  %144 = vmatpush.bf16.msra.mxu0 %v303_v0  ;;  %308 = vmatpush.bf16.msra.mxu2 %v303_v0  ;;  %v306_v3 = vld [vmem:[%s430_s1 + $0x50] sm:$0xff]  ;;  %v305_v5 = vld [vmem:[%s430_s1 + $0x48] sm:$0xff] }
   0x3   :  { %167 = vmatpush.bf16.msra.mxu1 %v307_v1  ;;  %v300_v6 = vld [vmem:[%s430_s1 + $0x20] sm:$0xff]  ;;  %v230_v9 = vld [vmem:[%s431_s0 + $0x8] sm:$0xf0]  ;;  %v299_v11 = vld [vmem:[%s430_s1 + $0x18] sm:$0xff] }
   0x4   :  { %v304_v7 = vld [vmem:[%s430_s1 + $0x40] sm:$0xff]  ;;  %v298_v12 = vld [vmem:[%s430_s1 + $0x10] sm:$0xff]  ;;  %v297_v13 = vld [vmem:[%s430_s1 + $0x8] sm:$0xff] }
   0x5   :  { %v292_v8 = vld [vmem:[%s431_s0 + $0x4] sm:$0xf]  ;;  %v228_v15 = vld [vmem:[%s431_s0] sm:$0xf]  ;;  %v293_v16 = vld [vmem:[%s431_s0 + $0x4] sm:$0xf0] }
   0x6   :  { %145 = vmatpush.bf16.msra.mxu0 %v302_v2  ;;  %309 = vmatpush.bf16.msra.mxu2 %v302_v2  ;;  %v233_v10 = vor.u32 %v292_v8, %v230_v9  ;;  %v296_v14 = vld [vmem:[%s430_s1] sm:$0xff]  ;;  %v236_v17 = vld [vmem:[%s431_s0 + $0x10] sm:$0xf]  ;;  %v295_v18 = vld [vmem:[%s431_s0 + $0x14] sm:$0xf0]  ;;  %v229_v21 = vor.u32 %v293_v16, %v228_v15 }
   0x7   :  { %168 = vmatpush.bf16.msra.mxu1 %v306_v3  ;;  %v294_v19 = vld [vmem:[%s431_s0 + $0x14] sm:$0xf]  ;;  %v238_v20 = vld [vmem:[%s431_s0 + $0x18] sm:$0xf0]  ;;  %v237_v22 = vor.u32 %v295_v18, %v236_v17  ;;  %v316_v26 = vld [vmem:[%s432_s2] ss:$0 sm:$0xff] }
   0x8   :  { %v241_v23 = vor.u32 %v294_v19, %v238_v20 }
   0xa   :  { %146 = vmatpush.bf16.msra.mxu0 %v301_v4  ;;  %310 = vmatpush.bf16.msra.mxu2 %v301_v4 }
   0xb   :  { %169 = vmatpush.bf16.msra.mxu1 %v305_v5 }
   0xe   :  { %147 = vmatpush.bf16.msra.mxu0 %v300_v6  ;;  %311 = vmatpush.bf16.msra.mxu2 %v300_v6 }
   0xf   :  { %170 = vmatpush.bf16.msra.mxu1 %v304_v7 }
  0x12   :  { %290 = vmatmul.msk.bf16.vlgmr.msra.gmra.mxu1 %vm137_vm0, %v233_v10  ;;  %148 = vmatpush.bf16.msra.mxu0 %v299_v11 }
  0x13   :  { %312 = vmatpush.bf16.msra.mxu2 %v299_v11 }
  0x16   :  { %149 = vmatpush.bf16.msra.mxu0 %v298_v12 }
  0x17   :  { %313 = vmatpush.bf16.msra.mxu2 %v298_v12 }
  0x1a   :  { %150 = vmatpush.bf16.msra.mxu0 %v297_v13 }
  0x1b   :  { %314 = vmatpush.bf16.msra.mxu2 %v297_v13 }
  0x1e   :  { %151 = vmatpush.bf16.msra.mxu0 %v296_v14 }
  0x1f   :  { %315 = vmatpush.bf16.msra.mxu2 %v296_v14 }
  0x21   :  { %152 = vmatmul.bf16.vlgmr.msra.gmra.mxu0 %v229_v21 }
  0x22   :  { %157 = vmatmul.bf16.vlgmr.msra.gmra.mxu2 %v237_v22  ;;  %291 = vmatmul.msk.bf16.gmra.mxu1 %vm137_vm0, %v241_v23 }
  0x8f   :  { %v172_v24 = vpop.f32.mrf.mxu1 }
  0x97   :  { %v174_v25 = vpop.f32.mrf.mxu1 }
  0x9e   :  { %v153_v27 = vpop.f32.mrf.mxu0 }
  0x9f   :  { %v154_v28 = vadd.f32 %v316_v26, %v153_v27  ;;  %v177_v32 = vpop.f32.mrf.mxu1 }
  0xa1   :  { %v173_v29 = vadd.f32 %v172_v24, %v154_v28 }
  0xa3   :  { %v182_v30 = vmin.f32 %v173_v29, 20.0 }
  0xa5   :  { %v186_v31 = vmul.f32 1.442695, %v182_v30  ;;  %v158_v33 = vpop.f32.mrf.mxu2 }
  0xa6   :  { %v159_v34 = vadd.f32 %v316_v26, %v158_v33  ;;  %v155_v35 = vpop.f32.mrf.mxu0 }
  0xa7   :  { %317 = vpow2.f32 %v186_v31  ;;  %v156_v36 = vadd.f32 %v316_v26, %v155_v35  ;;  %v179_v47 = vpop.f32.mrf.mxu1 }
  0xa8   :  { %v178_v37 = vadd.f32 %v177_v32, %v159_v34 }
  0xa9   :  { %v175_v38 = vadd.f32 %v174_v25, %v156_v36 }
  0xaa   :  { %v184_v39 = vmin.f32 %v178_v37, 20.0 }
  0xab   :  { %v183_v40 = vmin.f32 %v175_v38, 20.0 }
  0xac   :  { %v190_v41 = vmul.f32 1.442695, %v184_v39 }
  0xad   :  { %v318_v42 = vpop.eup %317  ;;  %v188_v43 = vmul.f32 1.442695, %v183_v40  ;;  %v160_v44 = vpop.f32.mrf.mxu2 }
  0xae   :  { %v194_v45 = vadd.f32 2.0, %v318_v42  ;;  %319 = vpow2.f32 %v190_v41  ;;  %v161_v46 = vadd.f32 %v316_v26, %v160_v44 }
  0xaf   :  { %321 = vpow2.f32 %v188_v43 }
  0xb0   :  { %v198_v48 = vmul.f32 %v318_v42, %v194_v45  ;;  %v180_v49 = vadd.f32 %v179_v47, %v161_v46 }
  0xb2   :  { %v206_v50 = vadd.f32 2.0, %v198_v48  ;;  %v185_v51 = vmin.f32 %v180_v49, 20.0  ;;  %v202_v59 = vmul.f32 %v198_v48, %v173_v29 }
  0xb4   :  { %v320_v52 = vpop.eup %319  ;;  %323 = vrcp.f32 %v206_v50  ;;  %v192_v53 = vmul.f32 1.442695, %v185_v51 }
  0xb5   :  { %v322_v54 = vpop.eup %321  ;;  %v196_v55 = vadd.f32 2.0, %v320_v52 }
  0xb6   :  { %v195_v56 = vadd.f32 2.0, %v322_v54  ;;  %325 = vpow2.f32 %v192_v53 }
  0xb7   :  { %v200_v57 = vmul.f32 %v320_v52, %v196_v55 }
  0xb8   :  { %v199_v58 = vmul.f32 %v322_v54, %v195_v56 }
  0xb9   :  { %v208_v60 = vadd.f32 2.0, %v200_v57  ;;  %v204_v3 = vmul.f32 %v200_v57, %v178_v37 }
  0xba   :  { %v324_v61 = vpop.eup %323  ;;  %v207_v62 = vadd.f32 2.0, %v199_v58  ;;  %v203_v5 = vmul.f32 %v199_v58, %v175_v38 }
  0xbb   :  { %v214_v63 = vmul.f32 %v324_v61, %v202_v59  ;;  %327 = vrcp.f32 %v208_v60 }
  0xbc   :  { %v326_v0 = vpop.eup %325  ;;  %329 = vrcp.f32 %v207_v62 }
  0xbd   :  { %218 = vst [vmem:[%s433_s3] sm:$0xff] %v214_v63  ;;  %v197_v1 = vadd.f32 2.0, %v326_v0 }
  0xbf   :  { %v201_v2 = vmul.f32 %v326_v0, %v197_v1 }
  0xc1   :  { %v328_v4 = vpop.eup %327  ;;  %v209_v6 = vadd.f32 2.0, %v201_v2  ;;  %v205_v10 = vmul.f32 %v201_v2, %v180_v49 }
  0xc2   :  { %v330_v7 = vpop.eup %329  ;;  %v216_v8 = vmul.f32 %v328_v4, %v204_v3 }
  0xc3   :  { %v215_v9 = vmul.f32 %v330_v7, %v203_v5  ;;  %331 = vrcp.f32 %v209_v6 }
  0xc4   :  { %220 = vst [vmem:[%s433_s3 + $0x10] sm:$0xff] %v216_v8 }
  0xc5   :  { %219 = vst [vmem:[%s433_s3 + $0x8] sm:$0xff] %v215_v9 }
  0xc9   :  { %v332_v11 = vpop.eup %331 }
  0xca   :  { %v217_v12 = vmul.f32 %v332_v11, %v205_v10 }
  0xcc   :  { %221 = vst [vmem:[%s433_s3 + $0x18] sm:$0xff] %v217_v12 }

// kernel: model_forward.9
= control target key start
LH: loop header
LB: loop body
LE: loop exit
PB: predicated region body
PF: predicated region fallthrough
CT: control target
= control target key end

     0   :  { %vm556_vm0 = vcmask 523264   ;;  %s3968_s0 = inlined_call_operand.vmem [shape: bf16[32,320], index: 0, kind: input, shape index: {}]   ;;  %s3969_s1 = inlined_call_operand.vmem [shape: bf16[320,512], index: 1, kind: input, shape index: {}]   ;;  %s3970_s2 = inlined_call_operand.vmem [shape: f32[1,512], index: 2, kind: input, shape index: {}]   ;;  %s3971_s3 = inlined_call_operand.vmem [shape: bf16[512,256], index: 3, kind: input, shape index: {}]   ;;  %s3972_s4 = inlined_call_operand.vmem [shape: f32[1,256], index: 4, kind: input, shape index: {}]   ;;  %s3973_s5 = inlined_call_operand.vmem [shape: bf16[256,128], index: 5, kind: input, shape index: {}]   ;;  %s3974_s6 = inlined_call_operand.vmem [shape: f32[1,128], index: 6, kind: input, shape index: {}]   ;;  %s3975_s7 = inlined_call_operand.hbm [shape: f32[32,128], index: 7, kind: output, shape index: {}]  }
   0x1   :  { %v1891_v0 = vld [vmem:[%s3969_s1 + $0xe0] sm:$0xf]  ;;  %v2461_v1 = vld [vmem:[%s3969_s1 + $0xec] sm:$0xf0]  ;;  %v2459_v9 = vld [vmem:[%s3969_s1 + $0xe4] sm:$0xf] }
   0x2   :  { %v2019_v2 = vld [vmem:[%s3969_s1 + $0x1e0] sm:$0xf]  ;;  %v1892_v3 = vor.u32 %v2461_v1, %v1891_v0  ;;  %v2493_v4 = vld [vmem:[%s3969_s1 + $0x1ec] sm:$0xf0]  ;;  %v1893_v10 = vld [vmem:[%s3969_s1 + $0xf0] sm:$0xf0] }
   0x3   :  { %v2083_v5 = vld [vmem:[%s3969_s1 + $0x260] sm:$0xf]  ;;  %v2509_v6 = vld [vmem:[%s3969_s1 + $0x26c] sm:$0xf0]  ;;  %v2020_v7 = vor.u32 %v2493_v4, %v2019_v2  ;;  %v1896_v12 = vor.u32 %v2459_v9, %v1893_v10  ;;  %v2455_v20 = vld [vmem:[%s3969_s1 + $0xc4] sm:$0xf] }
   0x4   :  { %v2084_v8 = vor.u32 %v2509_v6, %v2083_v5  ;;  %v1875_v11 = vld [vmem:[%s3969_s1 + $0xc0] sm:$0xf]  ;;  %563 = vmatpush.bf16.msra.mxu0 %v1892_v3  ;;  %v2457_v13 = vld [vmem:[%s3969_s1 + $0xcc] sm:$0xf0]  ;;  %v1877_v22 = vld [vmem:[%s3969_s1 + $0xd0] sm:$0xf0] }
   0x5   :  { %v2003_v14 = vld [vmem:[%s3969_s1 + $0x1c0] sm:$0xf]  ;;  %v2489_v15 = vld [vmem:[%s3969_s1 + $0x1cc] sm:$0xf0]  ;;  %582 = vmatpush.bf16.msra.mxu1 %v2020_v7  ;;  %v1876_v16 = vor.u32 %v2457_v13, %v1875_v11  ;;  %620 = vmatpush.bf16.msra.mxu3 %v1896_v12  ;;  %v1880_v25 = vor.u32 %v2455_v20, %v1877_v22  ;;  %v2451_v31 = vld [vmem:[%s3969_s1 + $0xa4] sm:$0xf] }
   0x6   :  { %605 = vmatpush.bf16.msra.mxu2 %v2084_v8  ;;  %v2004_v17 = vor.u32 %v2489_v15, %v2003_v14  ;;  %v2067_v18 = vld [vmem:[%s3969_s1 + $0x240] sm:$0xf]  ;;  %v2505_v19 = vld [vmem:[%s3969_s1 + $0x24c] sm:$0xf0]  ;;  %v1861_v32 = vld [vmem:[%s3969_s1 + $0xb0] sm:$0xf0] }
   0x7   :  { %v2068_v21 = vor.u32 %v2505_v19, %v2067_v18  ;;  %v1859_v23 = vld [vmem:[%s3969_s1 + $0xa0] sm:$0xf]  ;;  %v2453_v24 = vld [vmem:[%s3969_s1 + $0xac] sm:$0xf0]  ;;  %v1864_v38 = vor.u32 %v2451_v31, %v1861_v32  ;;  %v2447_v42 = vld [vmem:[%s3969_s1 + $0x84] sm:$0xf] }
   0x8   :  { %v1987_v26 = vld [vmem:[%s3969_s1 + $0x1a0] sm:$0xf]  ;;  %v2485_v27 = vld [vmem:[%s3969_s1 + $0x1ac] sm:$0xf0]  ;;  %564 = vmatpush.bf16.msra.mxu0 %v1876_v16  ;;  %v1860_v29 = vor.u32 %v2453_v24, %v1859_v23  ;;  %v1845_v43 = vld [vmem:[%s3969_s1 + $0x90] sm:$0xf0] }
   0x9   :  { %v2051_v28 = vld [vmem:[%s3969_s1 + $0x220] sm:$0xf]  ;;  %v2501_v30 = vld [vmem:[%s3969_s1 + $0x22c] sm:$0xf0]  ;;  %583 = vmatpush.bf16.msra.mxu1 %v2004_v17  ;;  %v1988_v33 = vor.u32 %v2485_v27, %v1987_v26  ;;  %621 = vmatpush.bf16.msra.mxu3 %v1880_v25  ;;  %v1763_v45 = vld [vmem:[%s3968_s0 + $0x8] sm:$0xf]  ;;  %v1848_v51 = vor.u32 %v2447_v42, %v1845_v43 }
   0xa   :  { %606 = vmatpush.bf16.msra.mxu2 %v2068_v21  ;;  %v2052_v34 = vor.u32 %v2501_v30, %v2051_v28  ;;  %v1843_v35 = vld [vmem:[%s3969_s1 + $0x80] sm:$0xf]  ;;  %v2449_v36 = vld [vmem:[%s3969_s1 + $0x8c] sm:$0xf0]  ;;  %v2427_v48 = vld [vmem:[%s3968_s0 + $0x10] sm:$0xf0] }
   0xb   :  { %v1971_v37 = vld [vmem:[%s3969_s1 + $0x180] sm:$0xf]  ;;  %v2481_v39 = vld [vmem:[%s3969_s1 + $0x18c] sm:$0xf0]  ;;  %v1844_v44 = vor.u32 %v2449_v36, %v1843_v35  ;;  %v2491_v54 = vld [vmem:[%s3969_s1 + $0x1e4] sm:$0xf]  ;;  %v2894_v58 = vor.u32 %v2427_v48, %v1763_v45 }
   0xc   :  { %v2035_v40 = vld [vmem:[%s3969_s1 + $0x200] sm:$0xf]  ;;  %v2497_v41 = vld [vmem:[%s3969_s1 + $0x20c] sm:$0xf0]  ;;  %565 = vmatpush.bf16.msra.mxu0 %v1860_v29  ;;  %v1972_v46 = vor.u32 %v2481_v39, %v1971_v37  ;;  %v2443_v55 = vld [vmem:[%s3969_s1 + $0x64] sm:$0xf] }
   0xd   :  { %584 = vmatpush.bf16.msra.mxu1 %v1988_v33  ;;  %v2036_v47 = vor.u32 %v2497_v41, %v2035_v40  ;;  %v1827_v49 = vld [vmem:[%s3969_s1 + $0x60] sm:$0xf]  ;;  %v2445_v50 = vld [vmem:[%s3969_s1 + $0x6c] sm:$0xf0]  ;;  %622 = vmatpush.bf16.msra.mxu3 %v1864_v38  ;;  %v1829_v56 = vld [vmem:[%s3969_s1 + $0x70] sm:$0xf0] }
   0xe   :  { %607 = vmatpush.bf16.msra.mxu2 %v2052_v34  ;;  %v1955_v52 = vld [vmem:[%s3969_s1 + $0x160] sm:$0xf]  ;;  %v2477_v53 = vld [vmem:[%s3969_s1 + $0x16c] sm:$0xf0]  ;;  %v2021_v57 = vld [vmem:[%s3969_s1 + $0x1f0] sm:$0xf0]  ;;  %v1828_v59 = vor.u32 %v2445_v50, %v1827_v49  ;;  %v1832_v2 = vor.u32 %v2443_v55, %v1829_v56 }
   0xf   :  { %v2024_v60 = vor.u32 %v2491_v54, %v2021_v57  ;;  %v1811_v61 = vld [vmem:[%s3969_s1 + $0x40] sm:$0xf]  ;;  %v1956_v62 = vor.u32 %v2477_v53, %v1955_v52  ;;  %v2441_v63 = vld [vmem:[%s3969_s1 + $0x4c] sm:$0xf0]  ;;  %v2487_v0 = vld [vmem:[%s3969_s1 + $0x1c4] sm:$0xf] }
  0x10   :  { %566 = vmatpush.bf16.msra.mxu0 %v1844_v44  ;;  %v2005_v1 = vld [vmem:[%s3969_s1 + $0x1d0] sm:$0xf0]  ;;  %v1939_v3 = vld [vmem:[%s3969_s1 + $0x140] sm:$0xf]  ;;  %v2473_v4 = vld [vmem:[%s3969_s1 + $0x14c] sm:$0xf0]  ;;  %v1812_v8 = vor.u32 %v2441_v63, %v1811_v61 }
  0x11   :  { %585 = vmatpush.bf16.msra.mxu1 %v1972_v46  ;;  %623 = vmatpush.bf16.msra.mxu3 %v1848_v51  ;;  %v2008_v5 = vor.u32 %v2487_v0, %v2005_v1  ;;  %v2439_v6 = vld [vmem:[%s3969_s1 + $0x44] sm:$0xf]  ;;  %v1813_v7 = vld [vmem:[%s3969_s1 + $0x50] sm:$0xf0]  ;;  %v1940_v11 = vor.u32 %v2473_v4, %v1939_v3  ;;  %v1795_v12 = vld [vmem:[%s3969_s1 + $0x20] sm:$0xf] }
  0x12   :  { %608 = vmatpush.bf16.msra.mxu2 %v2036_v47  ;;  %v2483_v9 = vld [vmem:[%s3969_s1 + $0x1a4] sm:$0xf]  ;;  %v1989_v10 = vld [vmem:[%s3969_s1 + $0x1b0] sm:$0xf0]  ;;  %v2437_v13 = vld [vmem:[%s3969_s1 + $0x2c] sm:$0xf0]  ;;  %v1816_v14 = vor.u32 %v2439_v6, %v1813_v7 }
  0x13   :  { %v1923_v15 = vld [vmem:[%s3969_s1 + $0x120] sm:$0xf]  ;;  %v2469_v16 = vld [vmem:[%s3969_s1 + $0x12c] sm:$0xf0]  ;;  %v2435_v17 = vld [vmem:[%s3969_s1 + $0x24] sm:$0xf]  ;;  %v1992_v18 = vor.u32 %v2483_v9, %v1989_v10  ;;  %v1796_v22 = vor.u32 %v2437_v13, %v1795_v12 }
  0x14   :  { %567 = vmatpush.bf16.msra.mxu0 %v1828_v59  ;;  %v1797_v19 = vld [vmem:[%s3969_s1 + $0x30] sm:$0xf0]  ;;  %v2479_v20 = vld [vmem:[%s3969_s1 + $0x184] sm:$0xf]  ;;  %v1779_v23 = vld [vmem:[%s3969_s1] sm:$0xf]  ;;  %v1924_v26 = vor.u32 %v2469_v16, %v1923_v15 }
  0x15   :  { %2097 = vmatmul.msk.bf16.vlgmr.msra.gmra.mxu2 %vm556_vm0, %v2894_v58  ;;  %586 = vmatpush.bf16.msra.mxu1 %v1956_v62  ;;  %v1973_v21 = vld [vmem:[%s3969_s1 + $0x190] sm:$0xf0]  ;;  %v2433_v24 = vld [vmem:[%s3969_s1 + $0xc] sm:$0xf0]  ;;  %v1907_v25 = vld [vmem:[%s3969_s1 + $0x100] sm:$0xf]  ;;  %v1800_v30 = vor.u32 %v2435_v17, %v1797_v19 }
  0x16   :  { %639 = vmatpush.bf16.msrb.mxu2 %v2024_v60  ;;  %624 = vmatpush.bf16.msra.mxu3 %v1832_v2  ;;  %v2465_v27 = vld [vmem:[%s3969_s1 + $0x10c] sm:$0xf0]  ;;  %v2431_v28 = vld [vmem:[%s3969_s1 + $0x4] sm:$0xf]  ;;  %v1781_v29 = vld [vmem:[%s3969_s1 + $0x10] sm:$0xf0]  ;;  %v1976_v31 = vor.u32 %v2479_v20, %v1973_v21  ;;  %v1780_v38 = vor.u32 %v2433_v24, %v1779_v23 }
  0x17   :  { %v1755_v32 = vld [vmem:[%s3968_s0] sm:$0xf]  ;;  %v2426_v33 = vld [vmem:[%s3968_s0 + $0x8] sm:$0xf0]  ;;  %v2475_v34 = vld [vmem:[%s3969_s1 + $0x164] sm:$0xf]  ;;  %v1908_v42 = vor.u32 %v2465_v27, %v1907_v25  ;;  %v1784_v47 = vor.u32 %v2431_v28, %v1781_v29 }
  0x18   :  { %568 = vmatpush.bf16.msra.mxu0 %v1812_v8  ;;  %v1957_v35 = vld [vmem:[%s3969_s1 + $0x170] sm:$0xf0]  ;;  %v2507_v36 = vld [vmem:[%s3969_s1 + $0x264] sm:$0xf]  ;;  %v2027_v40 = vld [vmem:[%s3969_s1 + $0x1e8] sm:$0xf]  ;;  %v3012_v51 = vor.u32 %v2426_v33, %v1755_v32 }
  0x19   :  { %587 = vmatpush.bf16.msra.mxu1 %v1940_v11  ;;  %v2085_v37 = vld [vmem:[%s3969_s1 + $0x270] sm:$0xf0]  ;;  %v2425_v39 = vld [vmem:[%s3968_s0 + $0x4] sm:$0xf]  ;;  %v2494_v41 = vld [vmem:[%s3969_s1 + $0x1f4] sm:$0xf0]  ;;  %v1960_v48 = vor.u32 %v2475_v34, %v1957_v35 }
  0x1a   :  { %640 = vmatpush.bf16.msrb.mxu2 %v2008_v5  ;;  %625 = vmatpush.bf16.msra.mxu3 %v1816_v14  ;;  %v1757_v43 = vld [vmem:[%s3968_s0 + $0xc] sm:$0xf0]  ;;  %v1775_v44 = vld [vmem:[%s3968_s0 + $0x20] sm:$0xf]  ;;  %v2430_v45 = vld [vmem:[%s3968_s0 + $0x28] sm:$0xf0]  ;;  %v2088_v46 = vor.u32 %v2507_v36, %v2085_v37  ;;  %v2028_v52 = vor.u32 %v2494_v41, %v2027_v40 }
  0x1b   :  { %v1899_v49 = vld [vmem:[%s3969_s1 + $0xe8] sm:$0xf]  ;;  %v2462_v50 = vld [vmem:[%s3969_s1 + $0xf4] sm:$0xf0]  ;;  %v2471_v54 = vld [vmem:[%s3969_s1 + $0x144] sm:$0xf]  ;;  %v3023_v56 = vor.u32 %v2425_v39, %v1757_v43  ;;  %v3025_v57 = vor.u32 %v2430_v45, %v1775_v44 }
  0x1c   :  { %569 = vmatpush.bf16.msra.mxu0 %v1796_v22  ;;  %v2011_v53 = vld [vmem:[%s3969_s1 + $0x1c8] sm:$0xf]  ;;  %v1941_v55 = vld [vmem:[%s3969_s1 + $0x150] sm:$0xf0]  ;;  %v2490_v59 = vld [vmem:[%s3969_s1 + $0x1d4] sm:$0xf0]  ;;  %v1900_v62 = vor.u32 %v2462_v50, %v1899_v49 }
  0x1d   :  { %588 = vmatpush.bf16.msra.mxu1 %v1924_v26  ;;  %v2503_v60 = vld [vmem:[%s3969_s1 + $0x244] sm:$0xf]  ;;  %v2069_v61 = vld [vmem:[%s3969_s1 + $0x250] sm:$0xf0]  ;;  %v1944_v63 = vor.u32 %v2471_v54, %v1941_v55  ;;  %v1883_v0 = vld [vmem:[%s3969_s1 + $0xc8] sm:$0xf]  ;;  %v2012_v3 = vor.u32 %v2490_v59, %v2011_v53 }
  0x1e   :  { %641 = vmatpush.bf16.msrb.mxu2 %v1992_v18  ;;  %626 = vmatpush.bf16.msra.mxu3 %v1800_v30  ;;  %v2458_v1 = vld [vmem:[%s3969_s1 + $0xd4] sm:$0xf0]  ;;  %v2072_v2 = vor.u32 %v2503_v60, %v2069_v61  ;;  %v2467_v4 = vld [vmem:[%s3969_s1 + $0x124] sm:$0xf]  ;;  %v1925_v5 = vld [vmem:[%s3969_s1 + $0x130] sm:$0xf0] }
  0x1f   :  { %v1995_v6 = vld [vmem:[%s3969_s1 + $0x1a8] sm:$0xf]  ;;  %v2486_v7 = vld [vmem:[%s3969_s1 + $0x1b4] sm:$0xf0]  ;;  %v1884_v8 = vor.u32 %v2458_v1, %v1883_v0  ;;  %v2499_v9 = vld [vmem:[%s3969_s1 + $0x224] sm:$0xf]  ;;  %v1928_v11 = vor.u32 %v2467_v4, %v1925_v5 }
  0x20   :  { %570 = vmatpush.bf16.msra.mxu0 %v1780_v38  ;;  %v2053_v10 = vld [vmem:[%s3969_s1 + $0x230] sm:$0xf0]  ;;  %v1867_v12 = vld [vmem:[%s3969_s1 + $0xa8] sm:$0xf]  ;;  %v2454_v13 = vld [vmem:[%s3969_s1 + $0xb4] sm:$0xf0]  ;;  %v1996_v15 = vor.u32 %v2486_v7, %v1995_v6 }
  0x21   :  { %589 = vmatpush.bf16.msra.mxu1 %v1908_v42  ;;  %v2056_v14 = vor.u32 %v2499_v9, %v2053_v10  ;;  %v2463_v16 = vld [vmem:[%s3969_s1 + $0x104] sm:$0xf]  ;;  %v1909_v17 = vld [vmem:[%s3969_s1 + $0x110] sm:$0xf0]  ;;  %v1979_v18 = vld [vmem:[%s3969_s1 + $0x188] sm:$0xf]  ;;  %v1868_v21 = vor.u32 %v2454_v13, %v1867_v12 }
  0x22   :  { %642 = vmatpush.bf16.msrb.mxu2 %v1976_v31  ;;  %627 = vmatpush.bf16.msra.mxu3 %v1784_v47  ;;  %v2482_v19 = vld [vmem:[%s3969_s1 + $0x194] sm:$0xf0]  ;;  %v2495_v20 = vld [vmem:[%s3969_s1 + $0x204] sm:$0xf]  ;;  %v1851_v22 = vld [vmem:[%s3969_s1 + $0x88] sm:$0xf]  ;;  %v1912_v24 = vor.u32 %v2463_v16, %v1909_v17 }
  0x23   :  { %571 = vmatmul.bf16.vlgmr.msra.gmra.mxu0 %v3012_v51  ;;  %v2037_v23 = vld [vmem:[%s3969_s1 + $0x210] sm:$0xf0]  ;;  %v2450_v25 = vld [vmem:[%s3969_s1 + $0x94] sm:$0xf0]  ;;  %v2429_v27 = vld [vmem:[%s3968_s0 + $0x20] sm:$0xf0]  ;;  %v1980_v29 = vor.u32 %v2482_v19, %v1979_v18 }
  0x24   :  { %662 = vmatpush.bf16.msrb.mxu0 %v2088_v46  ;;  %590 = vmatmul.bf16.vlgmr.msra.gmra.mxu1 %v3023_v56  ;;  %v1767_v26 = vld [vmem:[%s3968_s0 + $0x18] sm:$0xf]  ;;  %v2040_v28 = vor.u32 %v2495_v20, %v2037_v23  ;;  %v1963_v30 = vld [vmem:[%s3969_s1 + $0x168] sm:$0xf]  ;;  %v2460_v35 = vld [vmem:[%s3969_s1 + $0xec] sm:$0xf]  ;;  %v1852_v37 = vor.u32 %v2450_v25, %v1851_v22 }
  0x25   :  { %2098 = vmatmul.msk.bf16.gmra.mxu2 %vm556_vm0, %v3025_v57  ;;  %628 = vmatmul.bf16.vlgmr.msra.gmra.mxu3 %v3012_v51  ;;  %v2091_v31 = vld [vmem:[%s3969_s1 + $0x268] sm:$0xf]  ;;  %v2510_v32 = vld [vmem:[%s3969_s1 + $0x274] sm:$0xf0]  ;;  %v1901_v36 = vld [vmem:[%s3969_s1 + $0xf8] sm:$0xf0]  ;;  %v3134_v44 = vor.u32 %v2429_v27, %v1767_v26 }
  0x26   :  { %643 = vmatpush.bf16.msrb.mxu2 %v1960_v48  ;;  %696 = vmatpush.bf16.msrb.mxu3 %v2028_v52  ;;  %v2478_v33 = vld [vmem:[%s3969_s1 + $0x174] sm:$0xf0]  ;;  %v2092_v34 = vor.u32 %v2510_v32, %v2091_v31  ;;  %v2428_v38 = vld [vmem:[%s3968_s0 + $0x1c] sm:$0xf]  ;;  %v1769_v39 = vld [vmem:[%s3968_s0 + $0x24] sm:$0xf0]  ;;  %v1904_v40 = vor.u32 %v2460_v35, %v1901_v36 }
  0x27   :  { %677 = vmatpush.bf16.msrb.mxu1 %v1900_v62  ;;  %v1835_v41 = vld [vmem:[%s3969_s1 + $0x68] sm:$0xf]  ;;  %v2446_v42 = vld [vmem:[%s3969_s1 + $0x74] sm:$0xf0]  ;;  %v1964_v45 = vor.u32 %v2478_v33, %v1963_v30  ;;  %v2456_v47 = vld [vmem:[%s3969_s1 + $0xcc] sm:$0xf]  ;;  %v3145_v49 = vor.u32 %v2428_v38, %v1769_v39 }
  0x28   :  { %663 = vmatpush.bf16.msrb.mxu0 %v2072_v2  ;;  %v2075_v43 = vld [vmem:[%s3969_s1 + $0x248] sm:$0xf]  ;;  %v2506_v46 = vld [vmem:[%s3969_s1 + $0x254] sm:$0xf0]  ;;  %v1885_v48 = vld [vmem:[%s3969_s1 + $0xd8] sm:$0xf0]  ;;  %v1836_v53 = vor.u32 %v2446_v42, %v1835_v41 }
  0x29   :  { %v1947_v50 = vld [vmem:[%s3969_s1 + $0x148] sm:$0xf]  ;;  %v2474_v52 = vld [vmem:[%s3969_s1 + $0x154] sm:$0xf0]  ;;  %v2076_v59 = vor.u32 %v2506_v46, %v2075_v43  ;;  %v1888_v60 = vor.u32 %v2456_v47, %v1885_v48  ;;  %v2452_v0 = vld [vmem:[%s3969_s1 + $0xac] sm:$0xf] }
  0x2a   :  { %644 = vmatpush.bf16.msrb.mxu2 %v1944_v63  ;;  %697 = vmatpush.bf16.msrb.mxu3 %v2012_v3  ;;  %v1819_v54 = vld [vmem:[%s3969_s1 + $0x48] sm:$0xf]  ;;  %v2442_v55 = vld [vmem:[%s3969_s1 + $0x54] sm:$0xf0]  ;;  %v1948_v62 = vor.u32 %v2474_v52, %v1947_v50  ;;  %v1869_v1 = vld [vmem:[%s3969_s1 + $0xb8] sm:$0xf0] }
  0x2b   :  { %678 = vmatpush.bf16.msrb.mxu1 %v1884_v8  ;;  %v2059_v61 = vld [vmem:[%s3969_s1 + $0x228] sm:$0xf]  ;;  %v2502_v63 = vld [vmem:[%s3969_s1 + $0x234] sm:$0xf0]  ;;  %v1820_v4 = vor.u32 %v2442_v55, %v1819_v54  ;;  %v1872_v8 = vor.u32 %v2452_v0, %v1869_v1  ;;  %v2448_v12 = vld [vmem:[%s3969_s1 + $0x8c] sm:$0xf] }
  0x2c   :  { %664 = vmatpush.bf16.msrb.mxu0 %v2056_v14  ;;  %v1931_v2 = vld [vmem:[%s3969_s1 + $0x128] sm:$0xf]  ;;  %v2470_v3 = vld [vmem:[%s3969_s1 + $0x134] sm:$0xf0]  ;;  %v2060_v7 = vor.u32 %v2502_v63, %v2059_v61  ;;  %v1853_v13 = vld [vmem:[%s3969_s1 + $0x98] sm:$0xf0] }
  0x2d   :  { %v1803_v5 = vld [vmem:[%s3969_s1 + $0x28] sm:$0xf]  ;;  %v2438_v6 = vld [vmem:[%s3969_s1 + $0x34] sm:$0xf0]  ;;  %v1932_v10 = vor.u32 %v2470_v3, %v1931_v2  ;;  %v2508_v16 = vld [vmem:[%s3969_s1 + $0x26c] sm:$0xf] }
  0x2e   :  { %645 = vmatpush.bf16.msrb.mxu2 %v1928_v11  ;;  %698 = vmatpush.bf16.msrb.mxu3 %v1996_v15  ;;  %v2043_v9 = vld [vmem:[%s3969_s1 + $0x208] sm:$0xf]  ;;  %v2498_v11 = vld [vmem:[%s3969_s1 + $0x214] sm:$0xf0]  ;;  %v1804_v17 = vor.u32 %v2438_v6, %v1803_v5  ;;  %v2093_v18 = vld [vmem:[%s3969_s1 + $0x278] sm:$0xf0] }
  0x2f   :  { %679 = vmatpush.bf16.msrb.mxu1 %v1868_v21  ;;  %v1915_v14 = vld [vmem:[%s3969_s1 + $0x108] sm:$0xf]  ;;  %v2466_v15 = vld [vmem:[%s3969_s1 + $0x114] sm:$0xf0] }
  0x30   :  { %665 = vmatpush.bf16.msrb.mxu0 %v2040_v28 }
  0x32   :  { %646 = vmatpush.bf16.msrb.mxu2 %v1912_v24  ;;  %699 = vmatpush.bf16.msrb.mxu3 %v1980_v29 }
  0x33   :  { %680 = vmatpush.bf16.msrb.mxu1 %v1852_v37  ;;  %576 = vmatmul.bf16.gmra.mxu0 %v3134_v44 }
  0x34   :  { %734 = vmatpush.bf16.msra.mxu0 %v1904_v40  ;;  %595 = vmatmul.bf16.gmra.mxu1 %v3145_v49 }
  0x35   :  { %647 = vmatmul.bf16.vlgmr.msrb.gmra.mxu2 %v3023_v56  ;;  %633 = vmatmul.bf16.gmra.mxu3 %v3134_v44 }
  0x36   :  { %719 = vmatpush.bf16.msra.mxu2 %v2092_v34  ;;  %700 = vmatpush.bf16.msrb.mxu3 %v1964_v45 }
  0x37   :  { %681 = vmatpush.bf16.msrb.mxu1 %v1836_v53 }
  0x38   :  { %735 = vmatpush.bf16.msra.mxu0 %v1888_v60 }
  0x3a   :  { %720 = vmatpush.bf16.msra.mxu2 %v2076_v59  ;;  %701 = vmatpush.bf16.msrb.mxu3 %v1948_v62 }
  0x3b   :  { %682 = vmatpush.bf16.msrb.mxu1 %v1820_v4 }
  0x3c   :  { %12 = vsyncpa [#allocation3], 0  ;;  %v1787_v19 = vld [vmem:[%s3969_s1 + $0x8] sm:$0xf]  ;;  %v2434_v20 = vld [vmem:[%s3969_s1 + $0x14] sm:$0xf0]  ;;  %736 = vmatpush.bf16.msra.mxu0 %v1872_v8  ;;  %v2044_v22 = vor.u32 %v2498_v11, %v2043_v9  ;;  %v1856_v23 = vor.u32 %v2448_v12, %v1853_v13  ;;  %v1916_v24 = vor.u32 %v2466_v15, %v1915_v14  ;;  %v2096_v28 = vor.u32 %v2508_v16, %v2093_v18 }
  0x3d   :  { %v2492_v21 = vld [vmem:[%s3969_s1 + $0x1ec] sm:$0xf]  ;;  %v2029_v25 = vld [vmem:[%s3969_s1 + $0x1f8] sm:$0xf0]  ;;  %v1788_v29 = vor.u32 %v2434_v20, %v1787_v19  ;;  %v2163_v13 = vld [vmem:[%s3971_s3 + $0x70] sm:$0xf] }
  0x3e   :  { %721 = vmatpush.bf16.msra.mxu2 %v2060_v7  ;;  %702 = vmatpush.bf16.msrb.mxu3 %v1932_v10  ;;  %v2444_v26 = vld [vmem:[%s3969_s1 + $0x6c] sm:$0xf]  ;;  %v1837_v27 = vld [vmem:[%s3969_s1 + $0x78] sm:$0xf0]  ;;  %v2032_v30 = vor.u32 %v2492_v21, %v2029_v25  ;;  %v2520_v18 = vld [vmem:[%s3971_s3 + $0x44] sm:$0xf0] }
  0x3f   :  { %683 = vmatpush.bf16.msrb.mxu1 %v1804_v17  ;;  %v2488_v31 = vld [vmem:[%s3969_s1 + $0x1cc] sm:$0xf]  ;;  %v1840_v32 = vor.u32 %v2444_v26, %v1837_v27  ;;  %v2013_v33 = vld [vmem:[%s3969_s1 + $0x1d8] sm:$0xf0]  ;;  %v2139_v17 = vld [vmem:[%s3971_s3 + $0x40] sm:$0xf] }
  0x40   :  { %737 = vmatpush.bf16.msra.mxu0 %v1856_v23  ;;  %v2504_v34 = vld [vmem:[%s3969_s1 + $0x24c] sm:$0xf]  ;;  %v2077_v35 = vld [vmem:[%s3969_s1 + $0x258] sm:$0xf0]  ;;  %v2016_v38 = vor.u32 %v2488_v31, %v2013_v33  ;;  %v2140_v19 = vor.u32 %v2520_v18, %v2139_v17  ;;  %v3355_v20 = vld [vmem:[%s3970_s2] sm:$0xf] }
  0x41   :  { %v2440_v36 = vld [vmem:[%s3969_s1 + $0x4c] sm:$0xf]  ;;  %v1821_v37 = vld [vmem:[%s3969_s1 + $0x58] sm:$0xf0]  ;;  %v2080_v39 = vor.u32 %v2504_v34, %v2077_v35  ;;  %v2131_v21 = vld [vmem:[%s3971_s3 + $0x30] sm:$0xf] }
  0x42   :  { %722 = vmatpush.bf16.msra.mxu2 %v2044_v22  ;;  %703 = vmatpush.bf16.msrb.mxu3 %v1916_v24  ;;  %v2484_v40 = vld [vmem:[%s3969_s1 + $0x1ac] sm:$0xf]  ;;  %v1997_v41 = vld [vmem:[%s3969_s1 + $0x1b8] sm:$0xf0]  ;;  %v1824_v45 = vor.u32 %v2440_v36, %v1821_v37  ;;  %v2518_v22 = vld [vmem:[%s3971_s3 + $0x34] sm:$0xf0] }
  0x43   :  { %684 = vmatpush.bf16.msrb.mxu1 %v1788_v29  ;;  %2099 = vmatmul.msk.bf16.vlgmr.msrb.gmra.mxu0 %vm556_vm0, %v2894_v58  ;;  %v2500_v42 = vld [vmem:[%s3969_s1 + $0x22c] sm:$0xf]  ;;  %v2061_v43 = vld [vmem:[%s3969_s1 + $0x238] sm:$0xf0]  ;;  %v2000_v48 = vor.u32 %v2484_v40, %v1997_v41  ;;  %v2132_v23 = vor.u32 %v2518_v22, %v2131_v21  ;;  %v3364_v24 = vperm.slane %v3355_v20, 0  ;;  %s2725_s21 = smov [#allocation2]  }
  0x44   :  { %738 = vmatpush.bf16.msra.mxu0 %v1840_v32  ;;  %v2436_v46 = vld [vmem:[%s3969_s1 + $0x2c] sm:$0xf]  ;;  %v1805_v47 = vld [vmem:[%s3969_s1 + $0x38] sm:$0xf0]  ;;  %v2064_v52 = vor.u32 %v2500_v42, %v2061_v43  ;;  %v2123_v26 = vld [vmem:[%s3971_s3 + $0x20] sm:$0xf] }
  0x45   :  { %652 = vmatmul.bf16.gmra.mxu2 %v3145_v49  ;;  %704 = vmatmul.bf16.vlgmr.msrb.gmra.mxu3 %v3023_v56  ;;  %v2480_v50 = vld [vmem:[%s3969_s1 + $0x18c] sm:$0xf]  ;;  %v1981_v53 = vld [vmem:[%s3969_s1 + $0x198] sm:$0xf0]  ;;  %v1808_v59 = vor.u32 %v2436_v46, %v1805_v47  ;;  %v2516_v27 = vld [vmem:[%s3971_s3 + $0x24] sm:$0xf0] }
  0x46   :  { %776 = vmatpush.bf16.msra.mxu3 %v2096_v28  ;;  %685 = vmatmul.bf16.vlgmr.msrb.gmra.mxu1 %v3012_v51  ;;  %v2496_v54 = vld [vmem:[%s3969_s1 + $0x20c] sm:$0xf]  ;;  %v2045_v55 = vld [vmem:[%s3969_s1 + $0x218] sm:$0xf0]  ;;  %v1984_v62 = vor.u32 %v2480_v50, %v1981_v53  ;;  %v2124_v29 = vor.u32 %v2516_v27, %v2123_v26  ;;  %v2115_v33 = vld [vmem:[%s3971_s3 + $0x10] sm:$0xf] }
  0x47   :  { %753 = vmatpush.bf16.msra.mxu1 %v2032_v30  ;;  %v2432_v60 = vld [vmem:[%s3969_s1 + $0xc] sm:$0xf]  ;;  %v1789_v61 = vld [vmem:[%s3969_s1 + $0x18] sm:$0xf0]  ;;  %v2048_v63 = vor.u32 %v2496_v54, %v2045_v55  ;;  %v2514_v34 = vld [vmem:[%s3971_s3 + $0x14] sm:$0xf0] }
  0x48   :  { %739 = vmatpush.bf16.msra.mxu0 %v1824_v45  ;;  %v2476_v0 = vld [vmem:[%s3969_s1 + $0x16c] sm:$0xf]  ;;  %v1965_v1 = vld [vmem:[%s3969_s1 + $0x178] sm:$0xf0]  ;;  %v1792_v2 = vor.u32 %v2432_v60, %v1789_v61  ;;  %v2116_v35 = vor.u32 %v2514_v34, %v2115_v33  ;;  %v2512_v40 = vld [vmem:[%s3971_s3 + $0x4] sm:$0xf0] }
  0x49   :  { %v1968_v3 = vor.u32 %v2476_v0, %v1965_v1  ;;  %v2472_v4 = vld [vmem:[%s3969_s1 + $0x14c] sm:$0xf]  ;;  %v1949_v5 = vld [vmem:[%s3969_s1 + $0x158] sm:$0xf0]  ;;  %v2227_v45 = vld [vmem:[%s3971_s3 + $0xf0] sm:$0xf] }
  0x4a   :  { %777 = vmatpush.bf16.msra.mxu3 %v2080_v39  ;;  %v1952_v6 = vor.u32 %v2472_v4, %v1949_v5  ;;  %v2468_v7 = vld [vmem:[%s3969_s1 + $0x12c] sm:$0xf]  ;;  %v1933_v8 = vld [vmem:[%s3969_s1 + $0x138] sm:$0xf0]  ;;  %v2107_v39 = vld [vmem:[%s3971_s3] sm:$0xf] }
  0x4b   :  { %754 = vmatpush.bf16.msra.mxu1 %v2016_v38  ;;  %v1936_v9 = vor.u32 %v2468_v7, %v1933_v8  ;;  %v2464_v10 = vld [vmem:[%s3969_s1 + $0x10c] sm:$0xf]  ;;  %v1917_v11 = vld [vmem:[%s3969_s1 + $0x118] sm:$0xf0]  ;;  %v2108_v43 = vor.u32 %v2512_v40, %v2107_v39  ;;  %v2542_v46 = vld [vmem:[%s3971_s3 + $0xf4] sm:$0xf0] }
  0x4c   :  { %740 = vmatpush.bf16.msra.mxu0 %v1808_v59  ;;  %v1920_v12 = vor.u32 %v2464_v10, %v1917_v11  ;;  %v2219_v54 = vld [vmem:[%s3971_s3 + $0xe0] sm:$0xf]  ;;  %v2540_v55 = vld [vmem:[%s3971_s3 + $0xe4] sm:$0xf0]  ;;  %v2525_v59 = vld [vmem:[%s3971_s3 + $0x74] sm:$0xf] }
  0x4d   :  { %v2220_v60 = vor.u32 %v2540_v55, %v2219_v54  ;;  %v2165_v61 = vld [vmem:[%s3971_s3 + $0x78] sm:$0xf0]  ;;  %v2523_v7 = vld [vmem:[%s3971_s3 + $0x64] sm:$0xf]  ;;  %v2157_v8 = vld [vmem:[%s3971_s3 + $0x68] sm:$0xf0] }
  0x4e   :  { %778 = vmatpush.bf16.msra.mxu3 %v2064_v52  ;;  %v2228_v52 = vor.u32 %v2542_v46, %v2227_v45  ;;  %v2195_v21 = vld [vmem:[%s3971_s3 + $0xb0] sm:$0xf]  ;;  %v2534_v22 = vld [vmem:[%s3971_s3 + $0xb4] sm:$0xf0]  ;;  %v2519_v27 = vld [vmem:[%s3971_s3 + $0x44] sm:$0xf] }
  0x4f   :  { %755 = vmatpush.bf16.msra.mxu1 %v2000_v48  ;;  %v2196_v26 = vor.u32 %v2534_v22, %v2195_v21  ;;  %v2187_v39 = vld [vmem:[%s3971_s3 + $0xa0] sm:$0xf]  ;;  %v2532_v40 = vld [vmem:[%s3971_s3 + $0xa4] sm:$0xf0]  ;;  %v2133_v45 = vld [vmem:[%s3971_s3 + $0x38] sm:$0xf0] }
  0x50   :  { %741 = vmatpush.bf16.msra.mxu0 %v1792_v2  ;;  %v2211_v2 = vld [vmem:[%s3971_s3 + $0xd0] sm:$0xf]  ;;  %s1739_s22 = sshll.u32 %s2725_s21, 4  ;;  %s2726_s25 = smov 128   ;;  %s1740_s22 = int_to_ptr.vmem [resolvable:$true] %s1739_s22 }
  0x51   :  { %s2727_s26 = smov 8  }
  0x52   :  { %779 = vmatpush.bf16.msra.mxu3 %v2048_v63  ;;  %v2168_v63 = vor.u32 %v2525_v59, %v2165_v61  ;;  %v2530_v61 = vld [vmem:[%s3971_s3 + $0x94] sm:$0xf0] }
  0x53   :  { %756 = vmatpush.bf16.msra.mxu1 %v1984_v62  ;;  %2100 = vmatmul.msk.bf16.gmra.mxu0 %vm556_vm0, %v3025_v57 }
  0x54   :  { %1352 = vmatpush.bf16.msrb.mxu0 %v2228_v52  ;;  %v2558_v52 = vld [vmem:[%s3971_s3 + $0x174] sm:$0xf0] }
  0x55   :  { %2101 = vmatmul.msk.bf16.vlgmr.msra.gmra.mxu2 %vm556_vm0, %v2894_v58  ;;  %709 = vmatmul.bf16.gmra.mxu3 %v3145_v49 }
  0x56   :  { %690 = vmatmul.bf16.gmra.mxu1 %v3134_v44 }
  0x57   :  { %757 = vmatpush.bf16.msra.mxu1 %v1968_v3  ;;  %v2538_v3 = vld [vmem:[%s3971_s3 + $0xd4] sm:$0xf0] }
  0x58   :  { %1353 = vmatpush.bf16.msrb.mxu0 %v2220_v60 }
  0x5b   :  { %758 = vmatpush.bf16.msra.mxu1 %v1952_v6  ;;  %v2212_v6 = vor.u32 %v2538_v3, %v2211_v2  ;;  %v2515_v2 = vld [vmem:[%s3971_s3 + $0x24] sm:$0xf]  ;;  %v2125_v3 = vld [vmem:[%s3971_s3 + $0x28] sm:$0xf0] }
  0x5d   :  { %1354 = vmatpush.bf16.msrb.mxu0 %v2212_v6 }
  0x5f   :  { %759 = vmatpush.bf16.msra.mxu1 %v1936_v9 }
  0x63   :  { %760 = vmatpush.bf16.msra.mxu1 %v1920_v12  ;;  %742 = vmatmul.bf16.vlgmr.msra.gmra.mxu0 %v3012_v51  ;;  %v2526_v51 = vld [vmem:[%s3971_s3 + $0x74] sm:$0xf0] }
  0x64   :  { %v2164_v14 = vor.u32 %v2526_v51, %v2163_v13  ;;  %v2160_v13 = vor.u32 %v2523_v7, %v2157_v8 }
  0x65   :  { %2102 = vmatmul.msk.bf16.gmra.mxu2 %vm556_vm0, %v3025_v57  ;;  %2103 = vmatmul.msk.bf16.vlgmr.msra.gmra.mxu3 %vm556_vm0, %v2894_v58  ;;  %v2155_v58 = vld [vmem:[%s3971_s3 + $0x60] sm:$0xf] }
  0x66   :  { %761 = vmatmul.bf16.vlgmr.msra.gmra.mxu1 %v3023_v56  ;;  %1333 = vmatpush.bf16.msrb.mxu2 %v2164_v14  ;;  %v2524_v56 = vld [vmem:[%s3971_s3 + $0x64] sm:$0xf0] }
  0x73   :  { %747 = vmatmul.bf16.gmra.mxu0 %v3134_v44  ;;  %v2156_v44 = vor.u32 %v2524_v56, %v2155_v58  ;;  %v2203_v58 = vld [vmem:[%s3971_s3 + $0xc0] sm:$0xf]  ;;  %v2536_v56 = vld [vmem:[%s3971_s3 + $0xc4] sm:$0xf0] }
  0x75   :  { %2104 = vmatmul.msk.bf16.gmra.mxu3 %vm556_vm0, %v3025_v57  ;;  %1334 = vmatpush.bf16.msrb.mxu2 %v2156_v44  ;;  %v2147_v57 = vld [vmem:[%s3971_s3 + $0x50] sm:$0xf]  ;;  %v2521_v44 = vld [vmem:[%s3971_s3 + $0x54] sm:$0xf] }
  0x76   :  { %766 = vmatmul.bf16.gmra.mxu1 %v3145_v49  ;;  %v2522_v49 = vld [vmem:[%s3971_s3 + $0x54] sm:$0xf0] }
  0x77   :  { %v2148_v15 = vor.u32 %v2522_v49, %v2147_v57  ;;  %v2204_v57 = vor.u32 %v2536_v56, %v2203_v58  ;;  %v2149_v49 = vld [vmem:[%s3971_s3 + $0x58] sm:$0xf0]  ;;  %v2528_v58 = vld [vmem:[%s3971_s3 + $0x84] sm:$0xf0] }
  0x79   :  { %1335 = vmatpush.bf16.msrb.mxu2 %v2148_v15  ;;  %1355 = vmatpush.bf16.msrb.mxu0 %v2204_v57 }
  0x7d   :  { %1336 = vmatpush.bf16.msrb.mxu2 %v2140_v19  ;;  %1356 = vmatpush.bf16.msrb.mxu0 %v2196_v26 }
  0x81   :  { %1337 = vmatpush.bf16.msrb.mxu2 %v2132_v23 }
  0x85   :  { %1338 = vmatpush.bf16.msrb.mxu2 %v2124_v29 }
  0x89   :  { %1339 = vmatpush.bf16.msrb.mxu2 %v2116_v35 }
  0x8d   :  { %1340 = vmatpush.bf16.msrb.mxu2 %v2108_v43  ;;  %v2188_v43 = vor.u32 %v2532_v40, %v2187_v39 }
  0x8f   :  { %1357 = vmatpush.bf16.msrb.mxu0 %v2188_v43 }
  0x91   :  { %1409 = vmatpush.bf16.msra.mxu2 %v2168_v63 }
  0x95   :  { %1410 = vmatpush.bf16.msra.mxu2 %v2160_v13 }
  0x98   :  { %v610_v16 = vpop.f32.mrf.mxu2 }
  0xa0   :  { %v612_v25 = vpop.f32.mrf.mxu2  ;;  %v572_v28 = vpop.f32.mrf.mxu0 }
  0xa1   :  { %v573_v30 = vadd.f32 %v572_v28, %v3364_v24  ;;  %v591_v31 = vpop.f32.mrf.mxu1  ;;  %v2141_v28 = vld [vmem:[%s3971_s3 + $0x48] sm:$0xf0] }
  0xa2   :  { %v2144_v34 = vor.u32 %v2519_v27, %v2141_v28 }
  0xa3   :  { %v592_v32 = vadd.f32 %v591_v31, %v573_v30  ;;  %v3459_v30 = vperm.slane %v3355_v20, 1 }
  0xa5   :  { %v3379_v36 = vadd.f32 %v610_v16, %v592_v32  ;;  %v2152_v16 = vor.u32 %v2521_v44, %v2149_v49 }
  0xa7   :  { %v791_v37 = vmin.f32 %v3379_v36, 20.0  ;;  %1411 = vmatpush.bf16.msra.mxu2 %v2152_v16  ;;  %v2513_v16 = vld [vmem:[%s3971_s3 + $0x14] sm:$0xf] }
  0xa8   :  { %v615_v38 = vpop.f32.mrf.mxu2  ;;  %v3388_v41 = vpop.f32.mrf.mxu3 }
  0xa9   :  { %v574_v42 = vpop.f32.mrf.mxu0  ;;  %v807_v47 = vmul.f32 1.442695, %v791_v37  ;;  %v593_v50 = vpop.f32.mrf.mxu1  ;;  %v630_v46 = vadd.f32 %v3388_v41, %v3459_v30  ;;  %v2179_v41 = vld [vmem:[%s3971_s3 + $0x90] sm:$0xf] }
  0xaa   :  { %v575_v48 = vadd.f32 %v574_v42, %v3364_v24 }
  0xab   :  { %2603 = vpow2.f32 %v807_v47  ;;  %1412 = vmatpush.bf16.msra.mxu2 %v2144_v34 }
  0xac   :  { %v594_v53 = vadd.f32 %v593_v50, %v575_v48  ;;  %v2291_v50 = vld [vmem:[%s3971_s3 + $0x170] sm:$0xf] }
  0xad   :  { %v2292_v54 = vor.u32 %v2558_v52, %v2291_v50 }
  0xae   :  { %v3409_v62 = vadd.f32 %v612_v25, %v594_v53 }
  0xaf   :  { %1371 = vmatpush.bf16.msrb.mxu1 %v2292_v54  ;;  %v2539_v54 = vld [vmem:[%s3971_s3 + $0xe4] sm:$0xf] }
  0xb0   :  { %v795_v0 = vmin.f32 %v3409_v62, 20.0  ;;  %v617_v1 = vpop.f32.mrf.mxu2  ;;  %v3418_v4 = vpop.f32.mrf.mxu3 }
  0xb1   :  { %v577_v5 = vpop.f32.mrf.mxu0  ;;  %v2604_v9 = vpop.eup %2603  ;;  %v632_v57 = vadd.f32 %v3418_v4, %v3459_v30  ;;  %v2554_v4 = vld [vmem:[%s3971_s3 + $0x154] sm:$0xf0] }
  0xb2   :  { %v815_v10 = vmul.f32 1.442695, %v795_v0  ;;  %v578_v11 = vadd.f32 %v577_v5, %v3364_v24  ;;  %v596_v12 = vpop.f32.mrf.mxu1  ;;  %v839_v51 = vadd.f32 2.0, %v2604_v9 }
  0xb4   :  { %2605 = vpow2.f32 %v815_v10  ;;  %v597_v14 = vadd.f32 %v596_v12, %v578_v11  ;;  %v3441_v17 = vmul.f32 %v2604_v9, %v839_v51  ;;  %v2128_v9 = vor.u32 %v2515_v2, %v2125_v3  ;;  %v2283_v10 = vld [vmem:[%s3971_s3 + $0x160] sm:$0xf]  ;;  %v2556_v11 = vld [vmem:[%s3971_s3 + $0x164] sm:$0xf0]  ;;  %v2355_v2 = vld [vmem:[%s3971_s3 + $0x1f0] sm:$0xf] }
  0xb5   :  { %v2284_v13 = vor.u32 %v2556_v11, %v2283_v10  ;;  %v2574_v3 = vld [vmem:[%s3971_s3 + $0x1f4] sm:$0xf0]  ;;  %v2259_v10 = vld [vmem:[%s3971_s3 + $0x130] sm:$0xf] }
  0xb6   :  { %v3439_v15 = vadd.f32 %v615_v38, %v597_v14  ;;  %v887_v35 = vadd.f32 2.0, %v3441_v17  ;;  %v2171_v14 = vld [vmem:[%s3971_s3 + $0x80] sm:$0xf]  ;;  %v871_v44 = vmul.f32 %v3441_v17, %v3379_v36  ;;  %v2275_v36 = vld [vmem:[%s3971_s3 + $0x150] sm:$0xf] }
  0xb7   :  { %1372 = vmatpush.bf16.msrb.mxu1 %v2284_v13  ;;  %v2172_v49 = vor.u32 %v2528_v58, %v2171_v14  ;;  %v2276_v26 = vor.u32 %v2554_v4, %v2275_v36  ;;  %v2213_v14 = vld [vmem:[%s3971_s3 + $0xd8] sm:$0xf0]  ;;  %v2548_v36 = vld [vmem:[%s3971_s3 + $0x124] sm:$0xf0] }
  0xb8   :  { %v799_v18 = vmin.f32 %v3439_v15, 20.0  ;;  %v648_v19 = vpop.f32.mrf.mxu2  ;;  %v3450_v23 = vpop.f32.mrf.mxu3 }
  0xb9   :  { %v579_v25 = vpop.f32.mrf.mxu0  ;;  %v649_v55 = vadd.f32 %v648_v19, %v630_v46  ;;  %v2267_v46 = vld [vmem:[%s3971_s3 + $0x140] sm:$0xf] }
  0xba   :  { %v2606_v29 = vpop.eup %2605  ;;  %v823_v31 = vmul.f32 1.442695, %v799_v18  ;;  %v580_v32 = vadd.f32 %v579_v25, %v3364_v24  ;;  %v598_v33 = vpop.f32.mrf.mxu1  ;;  %v2517_v24 = vld [vmem:[%s3971_s3 + $0x34] sm:$0xf]  ;;  %v2117_v18 = vld [vmem:[%s3971_s3 + $0x18] sm:$0xf0] }
  0xbb   :  { %v843_v37 = vadd.f32 2.0, %v2606_v29  ;;  %v2136_v48 = vor.u32 %v2517_v24, %v2133_v45  ;;  %v2120_v25 = vor.u32 %v2513_v16, %v2117_v18  ;;  %1373 = vmatpush.bf16.msrb.mxu1 %v2276_v26  ;;  %v2347_v18 = vld [vmem:[%s3971_s3 + $0x1e0] sm:$0xf] }
  0xbc   :  { %2607 = vpow2.f32 %v823_v31  ;;  %v599_v38 = vadd.f32 %v598_v33, %v580_v32  ;;  %v2109_v32 = vld [vmem:[%s3971_s3 + $0x8] sm:$0xf0]  ;;  %v2541_v33 = vld [vmem:[%s3971_s3 + $0xf4] sm:$0xf] }
  0xbd   :  { %v859_v42 = vmul.f32 %v2606_v29, %v843_v37  ;;  %2609 = vrcp.f32 %v887_v35  ;;  %1413 = vmatpush.bf16.msra.mxu2 %v2136_v48  ;;  %v2552_v48 = vld [vmem:[%s3971_s3 + $0x144] sm:$0xf0] }
  0xbe   :  { %v3477_v47 = vadd.f32 %v617_v1, %v599_v38  ;;  %v2180_v1 = vor.u32 %v2530_v61, %v2179_v41  ;;  %v2229_v38 = vld [vmem:[%s3971_s3 + $0xf8] sm:$0xf0]  ;;  %v2268_v52 = vor.u32 %v2552_v48, %v2267_v46 }
  0xbf   :  { %v891_v53 = vadd.f32 2.0, %v859_v42  ;;  %v875_v19 = vmul.f32 %v859_v42, %v3409_v62  ;;  %v2511_v62 = vld [vmem:[%s3971_s3 + $0x4] sm:$0xf]  ;;  %v2232_v45 = vor.u32 %v2541_v33, %v2229_v38  ;;  %v2339_v38 = vld [vmem:[%s3971_s3 + $0x1d0] sm:$0xf] }
  0xc0   :  { %v803_v59 = vmin.f32 %v3477_v47, 20.0  ;;  %v650_v60 = vpop.f32.mrf.mxu2  ;;  %v3492_v63 = vpop.f32.mrf.mxu3  ;;  %1358 = vmatpush.bf16.msrb.mxu0 %v2180_v1  ;;  %v2112_v37 = vor.u32 %v2511_v62, %v2109_v32  ;;  %1374 = vmatpush.bf16.msrb.mxu1 %v2268_v52  ;;  %v2533_v52 = vld [vmem:[%s3971_s3 + $0xb4] sm:$0xf] }
  0xc1   :  { %2611 = vrcp.f32 %v891_v53  ;;  %v667_v0 = vpop.f32.mrf.mxu0  ;;  %1414 = vmatpush.bf16.msra.mxu2 %v2128_v9  ;;  %v651_v29 = vadd.f32 %v650_v60, %v632_v57  ;;  %v3572_v60 = vperm.slane %v3355_v20, 2  ;;  %v2356_v9 = vor.u32 %v2574_v3, %v2355_v2  ;;  %v2331_v3 = vld [vmem:[%s3971_s3 + $0x1c0] sm:$0xf] }
  0xc2   :  { %v2608_v5 = vpop.eup %2607  ;;  %v831_v6 = vmul.f32 1.442695, %v803_v59  ;;  %v3500_v7 = vadd.f32 %v667_v0, %v649_v55  ;;  %v2221_v55 = vld [vmem:[%s3971_s3 + $0xe8] sm:$0xf0]  ;;  %v635_v0 = vadd.f32 %v3450_v23, %v3459_v30  ;;  %v2550_v23 = vld [vmem:[%s3971_s3 + $0x134] sm:$0xf0]  ;;  %v637_v33 = vadd.f32 %v3492_v63, %v3459_v30 }
  0xc3   :  { %v3502_v8 = vpop.f32.mrf.mxu1  ;;  %v847_v12 = vadd.f32 2.0, %v2608_v5  ;;  %v2610_v56 = vpop.eup %2609  ;;  %v2224_v41 = vor.u32 %v2539_v54, %v2221_v55  ;;  %v2260_v13 = vor.u32 %v2550_v23, %v2259_v10  ;;  %1390 = vmatpush.bf16.msrb.mxu3 %v2356_v9  ;;  %v2243_v30 = vld [vmem:[%s3971_s3 + $0x110] sm:$0xf]  ;;  %v2546_v63 = vld [vmem:[%s3971_s3 + $0x114] sm:$0xf0] }
  0xc4   :  { %2613 = vpow2.f32 %v831_v6  ;;  %v792_v51 = vmin.f32 %v3500_v7, 20.0  ;;  %v919_v27 = vmul.f32 %v2610_v56, %v871_v44  ;;  %1359 = vmatpush.bf16.msrb.mxu0 %v2172_v49  ;;  %v687_v57 = vadd.f32 %v3502_v8, %v3572_v60  ;;  %v2544_v23 = vld [vmem:[%s3971_s3 + $0x104] sm:$0xf0] }
  0xc5   :  { %v3528_v21 = vmul.f32 %v2608_v5, %v847_v12  ;;  %1415 = vmatpush.bf16.msra.mxu2 %v2120_v25  ;;  %1375 = vmatpush.bf16.msrb.mxu1 %v2260_v13 }
  0xc6   :  { %v809_v22 = vmul.f32 1.442695, %v792_v51  ;;  %v2537_v51 = vld [vmem:[%s3971_s3 + $0xd4] sm:$0xf] }
  0xc7   :  { %v2612_v17 = vpop.eup %2611  ;;  %v895_v40 = vadd.f32 2.0, %v3528_v21  ;;  %v2216_v44 = vor.u32 %v2537_v51, %v2213_v14  ;;  %v2531_v14 = vld [vmem:[%s3971_s3 + $0xa4] sm:$0xf] }
  0xc8   :  { %v923_v28 = vmul.f32 %v2612_v17, %v875_v19  ;;  %2615 = vpow2.f32 %v809_v22  ;;  %v653_v31 = vpop.f32.mrf.mxu2  ;;  %v3545_v34 = vpop.f32.mrf.mxu3  ;;  %1428 = vmatpush.bf16.msra.mxu0 %v2232_v45  ;;  %v2572_v19 = vld [vmem:[%s3971_s3 + $0x1e4] sm:$0xf0]  ;;  %v2251_v22 = vld [vmem:[%s3971_s3 + $0x120] sm:$0xf] }
  0xc9   :  { %v669_v35 = vpop.f32.mrf.mxu0  ;;  %1416 = vmatpush.bf16.msra.mxu2 %v2112_v37  ;;  %2617 = vrcp.f32 %v895_v40  ;;  %v654_v11 = vadd.f32 %v653_v31, %v635_v0  ;;  %v2348_v8 = vor.u32 %v2572_v19, %v2347_v18  ;;  %v2252_v26 = vor.u32 %v2548_v36, %v2251_v22  ;;  %v2323_v22 = vld [vmem:[%s3971_s3 + $0x1b0] sm:$0xf] }
  0xca   :  { %v2614_v39 = vpop.eup %2613  ;;  %v3551_v24 = vadd.f32 %v669_v35, %v651_v29  ;;  %v3555_v43 = vpack.c.bf16 %v923_v28, %v919_v27  ;;  %v2535_v27 = vld [vmem:[%s3971_s3 + $0xc4] sm:$0xf]  ;;  %v2205_v28 = vld [vmem:[%s3971_s3 + $0xc8] sm:$0xf0]  ;;  %v879_v29 = vmul.f32 %v3528_v21, %v3439_v15  ;;  %v706_v35 = vadd.f32 %v3545_v34, %v687_v57  ;;  %v2570_v15 = vld [vmem:[%s3971_s3 + $0x1d4] sm:$0xf0] }
  0xcb   :  { %v3553_v42 = vpop.f32.mrf.mxu1  ;;  %v851_v50 = vadd.f32 2.0, %v2614_v39  ;;  %1391 = vmatpush.bf16.msrb.mxu3 %v2348_v8  ;;  %v2208_v31 = vor.u32 %v2535_v27, %v2205_v28  ;;  %1376 = vmatpush.bf16.msrb.mxu1 %v2252_v26  ;;  %v2340_v45 = vor.u32 %v2570_v15, %v2339_v38  ;;  %v2566_v8 = vld [vmem:[%s3971_s3 + $0x1b4] sm:$0xf0]  ;;  %v2293_v26 = vld [vmem:[%s3971_s3 + $0x178] sm:$0xf0] }
  0xcc   :  { %v796_v53 = vmin.f32 %v3551_v24, 20.0  ;;  %1341 = vmatmul.bf16.vlgmr.msrb.gmra.mxu2 %v3555_v43  ;;  %1429 = vmatpush.bf16.msra.mxu0 %v2224_v41 }
  0xcd   :  { %v867_v59 = vmul.f32 %v2614_v39, %v851_v50  ;;  %v2244_v50 = vor.u32 %v2546_v63, %v2243_v30  ;;  %v2285_v63 = vld [vmem:[%s3971_s3 + $0x168] sm:$0xf0] }
  0xce   :  { %v2616_v61 = vpop.eup %2615  ;;  %v817_v1 = vmul.f32 1.442695, %v796_v53  ;;  %v2197_v53 = vld [vmem:[%s3971_s3 + $0xb8] sm:$0xf0] }
  0xcf   :  { %v899_v5 = vadd.f32 2.0, %v867_v59  ;;  %v840_v6 = vadd.f32 2.0, %v2616_v61  ;;  %v2618_v4 = vpop.eup %2617  ;;  %v883_v32 = vmul.f32 %v867_v59, %v3477_v47  ;;  %1392 = vmatpush.bf16.msrb.mxu3 %v2340_v45  ;;  %1377 = vmatpush.bf16.msrb.mxu1 %v2244_v50  ;;  %v2527_v50 = vld [vmem:[%s3971_s3 + $0x84] sm:$0xf] }
  0xd0   :  { %2619 = vpow2.f32 %v817_v1  ;;  %v655_v12 = vpop.f32.mrf.mxu2  ;;  %v3594_v58 = vpop.f32.mrf.mxu3  ;;  %1430 = vmatpush.bf16.msra.mxu0 %v2216_v44  ;;  %v927_v47 = vmul.f32 %v2618_v4, %v879_v29  ;;  %v689_v44 = vadd.f32 %v3553_v42, %v3572_v60  ;;  %v2557_v42 = vld [vmem:[%s3971_s3 + $0x174] sm:$0xf] }
  0xd1   :  { %2621 = vrcp.f32 %v899_v5  ;;  %v672_v56 = vpop.f32.mrf.mxu0  ;;  %v3611_v25 = vmul.f32 %v2616_v61, %v840_v6  ;;  %v656_v34 = vadd.f32 %v655_v12, %v637_v33  ;;  %v2200_v61 = vor.u32 %v2533_v52, %v2197_v53  ;;  %v2568_v5 = vld [vmem:[%s3971_s3 + $0x1c4] sm:$0xf0]  ;;  %v2235_v6 = vld [vmem:[%s3971_s3 + $0x100] sm:$0xf]  ;;  %v2529_v29 = vld [vmem:[%s3971_s3 + $0x94] sm:$0xf] }
  0xd2   :  { %v3598_v49 = vadd.f32 %v672_v56, %v654_v11  ;;  %v3674_v12 = vperm.slane %v3355_v20, 3  ;;  %v2332_v13 = vor.u32 %v2568_v5, %v2331_v3  ;;  %v2236_v51 = vor.u32 %v2544_v23, %v2235_v6  ;;  %v2189_v56 = vld [vmem:[%s3971_s3 + $0xa8] sm:$0xf0] }
  0xd3   :  { %v3600_v16 = vpop.f32.mrf.mxu1  ;;  %v888_v39 = vadd.f32 2.0, %v3611_v25  ;;  %v2192_v18 = vor.u32 %v2531_v14, %v2189_v56  ;;  %v708_v36 = vadd.f32 %v3594_v58, %v689_v44  ;;  %v2296_v28 = vor.u32 %v2557_v42, %v2293_v26  ;;  %v2181_v58 = vld [vmem:[%s3971_s3 + $0x98] sm:$0xf0]  ;;  %v2173_v52 = vld [vmem:[%s3971_s3 + $0x88] sm:$0xf0] }
  0xd4   :  { %v800_v17 = vmin.f32 %v3598_v49, 20.0  ;;  %1431 = vmatpush.bf16.msra.mxu0 %v2208_v31  ;;  %1393 = vmatpush.bf16.msrb.mxu3 %v2332_v13  ;;  %v2277_v14 = vld [vmem:[%s3971_s3 + $0x158] sm:$0xf0] }
  0xd5   :  { %1378 = vmatpush.bf16.msrb.mxu1 %v2236_v51  ;;  %v2553_v51 = vld [vmem:[%s3971_s3 + $0x154] sm:$0xf] }
  0xd6   :  { %v2620_v62 = vpop.eup %2619  ;;  %v825_v37 = vmul.f32 1.442695, %v800_v17  ;;  %v2324_v17 = vor.u32 %v2566_v8, %v2323_v22  ;;  %v2280_v44 = vor.u32 %v2553_v51, %v2277_v14 }
  0xd7   :  { %v2622_v21 = vpop.eup %2621  ;;  %v844_v40 = vadd.f32 2.0, %v2620_v62 }
  0xd8   :  { %2623 = vpow2.f32 %v825_v37  ;;  %v724_v46 = vpop.f32.mrf.mxu2  ;;  %v931_v48 = vmul.f32 %v2622_v21, %v883_v32  ;;  %v3648_v55 = vpop.f32.mrf.mxu3  ;;  %1432 = vmatpush.bf16.msra.mxu0 %v2200_v61  ;;  %v2184_v37 = vor.u32 %v2529_v29, %v2181_v58  ;;  %1394 = vmatpush.bf16.msrb.mxu3 %v2324_v17  ;;  %v2269_v29 = vld [vmem:[%s3971_s3 + $0x148] sm:$0xf0] }
  0xd9   :  { %v860_v54 = vmul.f32 %v2620_v62, %v844_v40  ;;  %v3650_v59 = vadd.f32 %v724_v46, %v706_v35  ;;  %v674_v41 = vpop.f32.mrf.mxu0  ;;  %2625 = vrcp.f32 %v888_v39  ;;  %v872_v62 = vmul.f32 %v3611_v25, %v3500_v7  ;;  %1447 = vmatpush.bf16.msra.mxu1 %v2296_v28  ;;  %v2315_v40 = vld [vmem:[%s3971_s3 + $0x1a0] sm:$0xf]  ;;  %v2564_v7 = vld [vmem:[%s3971_s3 + $0x1a4] sm:$0xf0]  ;;  %v2555_v25 = vld [vmem:[%s3971_s3 + $0x164] sm:$0xf] }
  0xda   :  { %v3652_v0 = vadd.f32 %v674_v41, %v656_v34  ;;  %v3656_v2 = vpack.c.bf16 %v931_v48, %v927_v47  ;;  %v692_v47 = vadd.f32 %v3600_v16, %v3572_v60  ;;  %v2316_v30 = vor.u32 %v2564_v7, %v2315_v40  ;;  %v2551_v28 = vld [vmem:[%s3971_s3 + $0x144] sm:$0xf]  ;;  %v2573_v40 = vld [vmem:[%s3971_s3 + $0x1f4] sm:$0xf] }
  0xdb   :  { %v3654_v1 = vpop.f32.mrf.mxu1  ;;  %v892_v9 = vadd.f32 2.0, %v860_v54  ;;  %v793_v10 = vmin.f32 %v3650_v59, 20.0  ;;  %v876_v38 = vmul.f32 %v860_v54, %v3551_v24  ;;  %v2288_v48 = vor.u32 %v2555_v25, %v2285_v63  ;;  %v2261_v25 = vld [vmem:[%s3971_s3 + $0x138] sm:$0xf0] }
  0xdc   :  { %v804_v11 = vmin.f32 %v3652_v0, 20.0  ;;  %1346 = vmatmul.bf16.gmra.mxu2 %v3656_v2  ;;  %1433 = vmatpush.bf16.msra.mxu0 %v2192_v18  ;;  %v2176_v54 = vor.u32 %v2527_v50, %v2173_v52  ;;  %v711_v23 = vadd.f32 %v3648_v55, %v692_v47 }
  0xdd   :  { %2627 = vrcp.f32 %v892_v9  ;;  %v811_v57 = vmul.f32 1.442695, %v793_v10  ;;  %1395 = vmatpush.bf16.msrb.mxu3 %v2316_v30  ;;  %1448 = vmatpush.bf16.msra.mxu1 %v2288_v48  ;;  %v2307_v9 = vld [vmem:[%s3971_s3 + $0x190] sm:$0xf]  ;;  %v2562_v10 = vld [vmem:[%s3971_s3 + $0x194] sm:$0xf0] }
  0xde   :  { %v2624_v19 = vpop.eup %2623  ;;  %v833_v20 = vmul.f32 1.442695, %v804_v11  ;;  %v2308_v13 = vor.u32 %v2562_v10, %v2307_v9 }
  0xdf   :  { %v848_v4 = vadd.f32 2.0, %v2624_v19  ;;  %2629 = vpow2.f32 %v811_v57  ;;  %v2626_v31 = vpop.eup %2625 }
  0xe0   :  { %2631 = vpow2.f32 %v833_v20  ;;  %v726_v27 = vpop.f32.mrf.mxu2  ;;  %v3705_v32 = vpop.f32.mrf.mxu3  ;;  %v920_v34 = vmul.f32 %v2626_v31, %v872_v62  ;;  %1434 = vmatpush.bf16.msra.mxu0 %v2184_v37  ;;  %v694_v62 = vadd.f32 %v3654_v1, %v3572_v60  ;;  %v2272_v37 = vor.u32 %v2551_v28, %v2269_v29  ;;  %v2357_v60 = vld [vmem:[%s3971_s3 + $0x1f8] sm:$0xf0]  ;;  %v2549_v1 = vld [vmem:[%s3971_s3 + $0x134] sm:$0xf]  ;;  %v2567_v28 = vld [vmem:[%s3971_s3 + $0x1c4] sm:$0xf] }
  0xe1   :  { %v3707_v33 = vadd.f32 %v726_v27, %v708_v36  ;;  %v743_v35 = vpop.f32.mrf.mxu0  ;;  %v3710_v15 = vmul.f32 %v2624_v19, %v848_v4  ;;  %1396 = vmatpush.bf16.msrb.mxu3 %v2308_v13  ;;  %1449 = vmatpush.bf16.msra.mxu1 %v2280_v44  ;;  %v2299_v36 = vld [vmem:[%s3971_s3 + $0x180] sm:$0xf]  ;;  %v2560_v4 = vld [vmem:[%s3971_s3 + $0x184] sm:$0xf0]  ;;  %v2264_v30 = vor.u32 %v2549_v1, %v2261_v25  ;;  %v2341_v44 = vld [vmem:[%s3971_s3 + $0x1d8] sm:$0xf0] }
  0xe2   :  { %v744_v21 = vadd.f32 %v743_v35, %v3674_v12  ;;  %v2300_v27 = vor.u32 %v2560_v4, %v2299_v36  ;;  %v713_v7 = vadd.f32 %v3705_v32, %v694_v62  ;;  %v2360_v32 = vor.u32 %v2573_v40, %v2357_v60  ;;  %v2545_v4 = vld [vmem:[%s3971_s3 + $0x114] sm:$0xf]  ;;  %v2333_v29 = vld [vmem:[%s3971_s3 + $0x1c8] sm:$0xf0] }
  0xe3   :  { %v762_v39 = vpop.f32.mrf.mxu1  ;;  %v2628_v24 = vpop.eup %2627  ;;  %v797_v45 = vmin.f32 %v3707_v33, 20.0  ;;  %v896_v3 = vadd.f32 2.0, %v3710_v15  ;;  %v880_v63 = vmul.f32 %v3710_v15, %v3598_v49  ;;  %v2349_v49 = vld [vmem:[%s3971_s3 + $0x1e8] sm:$0xf0] }
  0xe4   :  { %v924_v46 = vmul.f32 %v2628_v24, %v876_v38  ;;  %v763_v6 = vadd.f32 %v762_v39, %v744_v21  ;;  %1435 = vmatpush.bf16.msra.mxu0 %v2176_v54  ;;  %v2571_v54 = vld [vmem:[%s3971_s3 + $0x1e4] sm:$0xf] }
  0xe5   :  { %v2630_v16 = vpop.eup %2629  ;;  %v819_v53 = vmul.f32 1.442695, %v797_v45  ;;  %1397 = vmatpush.bf16.msrb.mxu3 %v2300_v27  ;;  %1450 = vmatpush.bf16.msra.mxu1 %v2272_v37  ;;  %v2543_v37 = vld [vmem:[%s3971_s3 + $0x104] sm:$0xf] }
  0xe6   :  { %v2632_v41 = vpop.eup %2631  ;;  %v3734_v61 = vpack.c.bf16 %v924_v46, %v920_v34  ;;  %v841_v5 = vadd.f32 2.0, %v2630_v16 }
  0xe7   :  { %v852_v11 = vadd.f32 2.0, %v2632_v41  ;;  %2633 = vpow2.f32 %v819_v53 }
  0xe8   :  { %v729_v56 = vpop.f32.mrf.mxu2  ;;  %1360 = vmatmul.bf16.vlgmr.msrb.gmra.mxu0 %v3734_v61  ;;  %v781_v19 = vpop.f32.mrf.mxu3  ;;  %2635 = vrcp.f32 %v896_v3  ;;  %v3753_v20 = vmul.f32 %v2630_v16, %v841_v5  ;;  %v2547_v3 = vld [vmem:[%s3971_s3 + $0x124] sm:$0xf]  ;;  %v2253_v5 = vld [vmem:[%s3971_s3 + $0x128] sm:$0xf0] }
  0xe9   :  { %v868_v57 = vmul.f32 %v2632_v41, %v852_v11  ;;  %v3751_v18 = vadd.f32 %v729_v56, %v711_v23  ;;  %v745_v55 = vpop.f32.mrf.mxu0  ;;  %v3755_v22 = vadd.f32 %v781_v19, %v763_v6  ;;  %1466 = vmatpush.bf16.msra.mxu3 %v2360_v32  ;;  %1451 = vmatpush.bf16.msra.mxu1 %v2264_v30  ;;  %v2569_v56 = vld [vmem:[%s3971_s3 + $0x1d4] sm:$0xf] }
  0xea   :  { %v746_v26 = vadd.f32 %v745_v55, %v3674_v12  ;;  %v889_v38 = vadd.f32 2.0, %v3753_v20  ;;  %v2352_v41 = vor.u32 %v2571_v54, %v2349_v49  ;;  %v2256_v14 = vor.u32 %v2547_v3, %v2253_v5  ;;  %v2563_v54 = vld [vmem:[%s3971_s3 + $0x1a4] sm:$0xf]  ;;  %v2317_v49 = vld [vmem:[%s3971_s3 + $0x1a8] sm:$0xf0] }
  0xeb   :  { %v764_v8 = vpop.f32.mrf.mxu1  ;;  %v900_v17 = vadd.f32 2.0, %v868_v57  ;;  %v801_v42 = vmin.f32 %v3751_v18, 20.0  ;;  %v794_v58 = vmin.f32 %v3755_v22, 20.0  ;;  %v884_v34 = vmul.f32 %v868_v57, %v3652_v0 }
  0xec   :  { %1417 = vmatmul.bf16.vlgmr.msra.gmra.mxu2 %v3555_v43  ;;  %v765_v43 = vadd.f32 %v764_v8, %v746_v26  ;;  %v2344_v36 = vor.u32 %v2569_v56, %v2341_v44  ;;  %v2320_v5 = vor.u32 %v2563_v54, %v2317_v49  ;;  %v2559_v56 = vld [vmem:[%s3971_s3 + $0x184] sm:$0xf]  ;;  %v2301_v44 = vld [vmem:[%s3971_s3 + $0x188] sm:$0xf0] }
  0xed   :  { %v2634_v31 = vpop.eup %2633  ;;  %2637 = vrcp.f32 %v900_v17  ;;  %v827_v35 = vmul.f32 1.442695, %v801_v42  ;;  %v813_v39 = vmul.f32 1.442695, %v794_v58  ;;  %1467 = vmatpush.bf16.msra.mxu3 %v2352_v41  ;;  %1452 = vmatpush.bf16.msra.mxu1 %v2256_v14  ;;  %v2245_v42 = vld [vmem:[%s3971_s3 + $0x118] sm:$0xf0]  ;;  %v873_v58 = vmul.f32 %v3753_v20, %v3650_v59 }
  0xee   :  { %v845_v21 = vadd.f32 2.0, %v2634_v31  ;;  %v2636_v24 = vpop.eup %2635  ;;  %v2248_v27 = vor.u32 %v2545_v4, %v2245_v42 }
  0xef   :  { %2639 = vpow2.f32 %v827_v35  ;;  %v928_v10 = vmul.f32 %v2636_v24, %v880_v63  ;;  %v2565_v63 = vld [vmem:[%s3971_s3 + $0x1b4] sm:$0xf] }
  0xf0   :  { %v861_v47 = vmul.f32 %v2634_v31, %v845_v21  ;;  %2641 = vpow2.f32 %v813_v39  ;;  %v731_v45 = vpop.f32.mrf.mxu2  ;;  %v783_v48 = vpop.f32.mrf.mxu3 }
  0xf1   :  { %v3792_v46 = vadd.f32 %v731_v45, %v713_v7  ;;  %v748_v50 = vpop.f32.mrf.mxu0  ;;  %2643 = vrcp.f32 %v889_v38  ;;  %v3794_v16 = vadd.f32 %v783_v48, %v765_v43  ;;  %v2237_v38 = vld [vmem:[%s3971_s3 + $0x108] sm:$0xf0]  ;;  %1468 = vmatpush.bf16.msra.mxu3 %v2344_v36  ;;  %v2336_v7 = vor.u32 %v2567_v28, %v2333_v29  ;;  %1453 = vmatpush.bf16.msra.mxu1 %v2248_v27 }
  0xf2   :  { %v893_v52 = vadd.f32 2.0, %v861_v47  ;;  %v749_v53 = vadd.f32 %v748_v50, %v3674_v12  ;;  %v877_v31 = vmul.f32 %v861_v47, %v3707_v33  ;;  %v2240_v1 = vor.u32 %v2543_v37, %v2237_v38 }
  0xf3   :  { %v2638_v0 = vpop.eup %2637  ;;  %v805_v15 = vmin.f32 %v3792_v46, 20.0  ;;  %v798_v6 = vmin.f32 %v3794_v16, 20.0  ;;  %v767_v9 = vpop.f32.mrf.mxu1 }
  0xf4   :  { %2645 = vrcp.f32 %v893_v52  ;;  %v932_v23 = vmul.f32 %v2638_v0, %v884_v34  ;;  %v768_v51 = vadd.f32 %v767_v9, %v749_v53  ;;  %v2561_v9 = vld [vmem:[%s3971_s3 + $0x194] sm:$0xf] }
  0xf5   :  { %v2640_v11 = vpop.eup %2639  ;;  %v835_v13 = vmul.f32 1.442695, %v805_v15  ;;  %v821_v55 = vmul.f32 1.442695, %v798_v6  ;;  %1469 = vmatpush.bf16.msra.mxu3 %v2336_v7  ;;  %1454 = vmatpush.bf16.msra.mxu1 %v2240_v1 }
  0xf6   :  { %v2642_v57 = vpop.eup %2641  ;;  %v849_v19 = vadd.f32 2.0, %v2640_v11  ;;  %v3817_v8 = vpack.c.bf16 %v932_v23, %v928_v10  ;;  %v2309_v10 = vld [vmem:[%s3971_s3 + $0x198] sm:$0xf0] }
  0xf7   :  { %v842_v17 = vadd.f32 2.0, %v2642_v57  ;;  %2647 = vpow2.f32 %v835_v13  ;;  %v2644_v26 = vpop.eup %2643 }
  0xf8   :  { %2649 = vpow2.f32 %v821_v55  ;;  %1365 = vmatmul.bf16.gmra.mxu0 %v3817_v8  ;;  %v786_v62 = vpop.f32.mrf.mxu3  ;;  %v865_v39 = vmul.f32 %v2640_v11, %v849_v19  ;;  %v921_v43 = vmul.f32 %v2644_v26, %v873_v58  ;;  %v2304_v26 = vor.u32 %v2559_v56, %v2301_v44  ;;  %v2589_v56 = vld [vmem:[%s3973_s5 + $0x70] sm:$0xff] }
  0xf9   :  { %v750_v35 = vpop.f32.mrf.mxu0  ;;  %v3841_v40 = vadd.f32 %v786_v62, %v768_v51  ;;  %v858_v20 = vmul.f32 %v2642_v57, %v842_v17  ;;  %v2312_v51 = vor.u32 %v2561_v9, %v2309_v10  ;;  %v2590_v10 = vld [vmem:[%s3973_s5 + $0x78] sm:$0xff] }
  0xfa   :  { %v2646_v21 = vpop.eup %2645  ;;  %v751_v60 = vadd.f32 %v750_v35, %v3674_v12  ;;  %v897_v45 = vadd.f32 2.0, %v865_v39  ;;  %v881_v55 = vmul.f32 %v865_v39, %v3751_v18  ;;  %1712 = vmatpush.bf16.msrb.mxu0 %v2590_v10 }
  0xfb   :  { %v925_v59 = vmul.f32 %v2646_v21, %v877_v31  ;;  %v802_v33 = vmin.f32 %v3841_v40, 20.0  ;;  %v890_v34 = vadd.f32 2.0, %v858_v20  ;;  %v769_v50 = vpop.f32.mrf.mxu1  ;;  %v874_v17 = vmul.f32 %v858_v20, %v3755_v22 }
  0xfc   :  { %1422 = vmatmul.bf16.gmra.mxu2 %v3656_v2  ;;  %v2325_v2 = vld [vmem:[%s3971_s3 + $0x1b8] sm:$0xf0]  ;;  %v770_v52 = vadd.f32 %v769_v50, %v751_v60 }
  0xfd   :  { %v2648_v25 = vpop.eup %2647  ;;  %v3846_v24 = vpack.c.bf16 %v925_v59, %v921_v43  ;;  %v829_v30 = vmul.f32 1.442695, %v802_v33  ;;  %v2328_v53 = vor.u32 %v2565_v63, %v2325_v2  ;;  %v2582_v33 = vld [vmem:[%s3973_s5 + $0x38] sm:$0xff] }
  0xfe   :  { %v2650_v47 = vpop.eup %2649  ;;  %v853_v32 = vadd.f32 2.0, %v2648_v25  ;;  %1693 = vmatpush.bf16.msrb.mxu2 %v2582_v33  ;;  %1713 = vmatpush.bf16.msrb.mxu0 %v2589_v56 }
  0xff   :  { %v846_v48 = vadd.f32 2.0, %v2650_v47  ;;  %1379 = vmatmul.bf16.vlgmr.msrb.gmra.mxu1 %v3846_v24  ;;  %2651 = vpow2.f32 %v829_v30  ;;  %1470 = vmatpush.bf16.msra.mxu3 %v2328_v53  ;;  %v2578_v30 = vld [vmem:[%s3973_s5 + $0x18] sm:$0xff] }
 0x100   :  { %v869_v12 = vmul.f32 %v2648_v25, %v853_v32  ;;  %v788_v15 = vpop.f32.mrf.mxu3  ;;  %2653 = vrcp.f32 %v897_v45  ;;  %v2580_v25 = vld [vmem:[%s3973_s5 + $0x28] sm:$0xff]  ;;  %2591 = vmatpush.bf16.msrb.mxu1 %v2590_v10 }
 0x101   :  { %v862_v0 = vmul.f32 %v2650_v47, %v846_v48  ;;  %v789_v3 = vadd.f32 %v788_v15, %v770_v52  ;;  %2655 = vrcp.f32 %v890_v34  ;;  %v3896_v47 = vld [vmem:[%s3972_s4] sm:$0x3]  ;;  %v2577_v48 = vld [vmem:[%s3973_s5 + $0x10] sm:$0xff]  ;;  %v2576_v52 = vld [vmem:[%s3973_s5 + $0x8] sm:$0xff] }
 0x102   :  { %v901_v41 = vadd.f32 2.0, %v869_v12  ;;  %v885_v36 = vmul.f32 %v869_v12, %v3792_v46  ;;  %v1009_v63 = vperm.slane %v3896_v47, 0 }
 0x103   :  { %v894_v6 = vadd.f32 2.0, %v862_v0  ;;  %v806_v23 = vmin.f32 %v789_v3, 20.0  ;;  %1471 = vmatpush.bf16.msra.mxu3 %v2320_v5  ;;  %v878_v42 = vmul.f32 %v862_v0, %v3794_v16 }
 0x104   :  { %2657 = vrcp.f32 %v901_v41  ;;  %v2575_v41 = vld [vmem:[%s3973_s5] sm:$0xff]  ;;  %2592 = vmatpush.bf16.msrb.mxu1 %v2589_v56 }
 0x105   :  { %2659 = vrcp.f32 %v894_v6  ;;  %v2652_v11 = vpop.eup %2651  ;;  %v837_v13 = vmul.f32 1.442695, %v806_v23 }
 0x106   :  { %v850_v14 = vadd.f32 2.0, %v2652_v11  ;;  %v2654_v57 = vpop.eup %2653 }
 0x107   :  { %2661 = vpow2.f32 %v837_v13  ;;  %v2656_v19 = vpop.eup %2655  ;;  %1472 = vmatpush.bf16.msra.mxu3 %v2312_v51  ;;  %v929_v29 = vmul.f32 %v2654_v57, %v881_v55 }
 0x108   :  { %1436 = vmatmul.bf16.vlgmr.msra.gmra.mxu0 %v3734_v61  ;;  %v866_v28 = vmul.f32 %v2652_v11, %v850_v14  ;;  %v922_v31 = vmul.f32 %v2656_v19, %v874_v17 }
 0x10a   :  { %v2658_v4 = vpop.eup %2657  ;;  %v898_v18 = vadd.f32 2.0, %v866_v28  ;;  %v882_v21 = vmul.f32 %v866_v28, %v3841_v40  ;;  %v2581_v40 = vld [vmem:[%s3973_s5 + $0x30] sm:$0xff] }
 0x10b   :  { %v2660_v27 = vpop.eup %2659  ;;  %v933_v58 = vmul.f32 %v2658_v4, %v885_v36  ;;  %1473 = vmatpush.bf16.msra.mxu3 %v2304_v26  ;;  %1694 = vmatpush.bf16.msrb.mxu2 %v2581_v40 }
 0x10c   :  { %v926_v62 = vmul.f32 %v2660_v27, %v878_v42  ;;  %2663 = vrcp.f32 %v898_v18  ;;  %v2588_v42 = vld [vmem:[%s3973_s5 + $0x68] sm:$0xff] }
 0x10d   :  { %v941_v35 = vpack.c.bf16 %v933_v58, %v929_v29  ;;  %v2662_v61 = vpop.eup %2661  ;;  %1714 = vmatpush.bf16.msrb.mxu0 %v2588_v42  ;;  %2593 = vmatpush.bf16.msrb.mxu1 %v2588_v42 }
 0x10e   :  { %v938_v37 = vpack.c.bf16 %v926_v62, %v922_v31  ;;  %v854_v38 = vadd.f32 2.0, %v2662_v61  ;;  %v2587_v31 = vld [vmem:[%s3973_s5 + $0x60] sm:$0xff] }
 0x10f   :  { %1384 = vmatmul.bf16.gmra.mxu1 %v941_v35  ;;  %1695 = vmatpush.bf16.msrb.mxu2 %v2580_v25 }
 0x110   :  { %1398 = vmatmul.bf16.vlgmr.msrb.gmra.mxu3 %v938_v37  ;;  %v870_v46 = vmul.f32 %v2662_v61, %v854_v38 }
 0x111   :  { %1715 = vmatpush.bf16.msrb.mxu0 %v2587_v31  ;;  %2594 = vmatpush.bf16.msrb.mxu1 %v2587_v31 }
 0x112   :  { %v902_v22 = vadd.f32 2.0, %v870_v46  ;;  %v2664_v16 = vpop.eup %2663  ;;  %v886_v39 = vmul.f32 %v870_v46, %v789_v3 }
 0x113   :  { %v930_v43 = vmul.f32 %v2664_v16, %v882_v21  ;;  %v2586_v21 = vld [vmem:[%s3973_s5 + $0x58] sm:$0xff] }
 0x114   :  { %2665 = vrcp.f32 %v902_v22 }
 0x115   :  { %1716 = vmatpush.bf16.msrb.mxu0 %v2586_v21  ;;  %2595 = vmatpush.bf16.msrb.mxu1 %v2586_v21 }
 0x118   :  { %1441 = vmatmul.bf16.gmra.mxu0 %v3817_v8 }
 0x11a   :  { %v2666_v7 = vpop.eup %2665 }
 0x11b   :  { %v934_v59 = vmul.f32 %v2666_v7, %v886_v39  ;;  %v3936_v39 = vperm.slane %v3896_v47, 1 }
 0x11d   :  { %v942_v20 = vpack.c.bf16 %v934_v59, %v930_v43 }
 0x11f   :  { %1455 = vmatmul.bf16.vlgmr.msra.gmra.mxu1 %v3846_v24  ;;  %v2579_v24 = vld [vmem:[%s3973_s5 + $0x20] sm:$0xff] }
 0x120   :  { %1403 = vmatmul.bf16.gmra.mxu3 %v942_v20  ;;  %1696 = vmatpush.bf16.msrb.mxu2 %v2579_v24 }
 0x124   :  { %1697 = vmatpush.bf16.msrb.mxu2 %v2578_v30  ;;  %v2584_v30 = vld [vmem:[%s3973_s5 + $0x48] sm:$0xff] }
 0x128   :  { %1698 = vmatpush.bf16.msrb.mxu2 %v2577_v48 }
 0x12c   :  { %1699 = vmatpush.bf16.msrb.mxu2 %v2576_v52 }
 0x12f   :  { %1460 = vmatmul.bf16.gmra.mxu1 %v941_v35 }
 0x130   :  { %1474 = vmatmul.bf16.vlgmr.msra.gmra.mxu3 %v938_v37  ;;  %1700 = vmatpush.bf16.msrb.mxu2 %v2575_v41 }
 0x140   :  { %1479 = vmatmul.bf16.gmra.mxu3 %v942_v20 }
 0x14f   :  { %v1342_v8 = vpop.f32.mrf.mxu2 }
 0x150   :  { %v1343_v50 = vadd.f32 %v1342_v8, %v1009_v63  ;;  %v2585_v8 = vld [vmem:[%s3973_s5 + $0x50] sm:$0xff] }
 0x151   :  { %1717 = vmatpush.bf16.msrb.mxu0 %v2585_v8  ;;  %2596 = vmatpush.bf16.msrb.mxu1 %v2585_v8 }
 0x155   :  { %1718 = vmatpush.bf16.msrb.mxu0 %v2584_v30  ;;  %2597 = vmatpush.bf16.msrb.mxu1 %v2584_v30 }
 0x157   :  { %v1344_v45 = vpop.f32.mrf.mxu2 }
 0x158   :  { %v1345_v3 = vadd.f32 %v1344_v45, %v1009_v63 }
 0x15f   :  { %v1347_v12 = vpop.f32.mrf.mxu2 }
 0x160   :  { %v1348_v44 = vadd.f32 %v1347_v12, %v1009_v63 }
 0x165   :  { %v1361_v60 = vpop.f32.mrf.mxu0 }
 0x166   :  { %v1362_v2 = vadd.f32 %v1361_v60, %v1343_v50 }
 0x167   :  { %v1349_v11 = vpop.f32.mrf.mxu2 }
 0x168   :  { %v1350_v62 = vadd.f32 %v1349_v11, %v1009_v63 }
 0x16d   :  { %v1363_v32 = vpop.f32.mrf.mxu0 }
 0x16e   :  { %v1364_v6 = vadd.f32 %v1363_v32, %v1345_v3 }
 0x16f   :  { %v1418_v29 = vpop.f32.mrf.mxu2 }
 0x170   :  { %v1419_v40 = vadd.f32 %v1418_v29, %v3936_v39 }
 0x175   :  { %v1366_v54 = vpop.f32.mrf.mxu0 }
 0x176   :  { %v1367_v36 = vadd.f32 %v1366_v54, %v1348_v44 }
 0x17c   :  { %v1380_v1 = vpop.f32.mrf.mxu1 }
 0x17d   :  { %v1381_v53 = vadd.f32 %v1380_v1, %v1362_v2  ;;  %v1368_v14 = vpop.f32.mrf.mxu0  ;;  %v1420_v1 = vpop.f32.mrf.mxu2 }
 0x17e   :  { %v1369_v18 = vadd.f32 %v1368_v14, %v1350_v62 }
 0x184   :  { %v1382_v34 = vpop.f32.mrf.mxu1 }
 0x185   :  { %v1383_v23 = vadd.f32 %v1382_v34, %v1364_v6  ;;  %v1437_v61 = vpop.f32.mrf.mxu0 }
 0x186   :  { %v1438_v24 = vadd.f32 %v1437_v61, %v1419_v40 }
 0x18c   :  { %v1385_v15 = vpop.f32.mrf.mxu1 }
 0x18d   :  { %v1386_v26 = vadd.f32 %v1385_v15, %v1367_v36  ;;  %v1439_v45 = vpop.f32.mrf.mxu0  ;;  %v1421_v15 = vadd.f32 %v1420_v1, %v3936_v39 }
 0x193   :  { %v1399_v49 = vpop.f32.mrf.mxu3 }
 0x194   :  { %v3908_v0 = vadd.f32 %v1399_v49, %v1381_v53  ;;  %v1387_v19 = vpop.f32.mrf.mxu1  ;;  %v2583_v49 = vld [vmem:[%s3973_s5 + $0x40] sm:$0xff] }
 0x195   :  { %v1388_v7 = vadd.f32 %v1387_v19, %v1369_v18  ;;  %1719 = vmatpush.bf16.msrb.mxu0 %v2583_v49  ;;  %2598 = vmatpush.bf16.msrb.mxu1 %v2583_v49  ;;  %v1442_v14 = vpop.f32.mrf.mxu0 }
 0x196   :  { %v1485_v5 = vmin.f32 %v3908_v0, 20.0 }
 0x198   :  { %v1493_v9 = vmul.f32 1.442695, %v1485_v5 }
 0x19a   :  { %2667 = vpow2.f32 %v1493_v9 }
 0x19b   :  { %v1401_v13 = vpop.f32.mrf.mxu3 }
 0x19c   :  { %v3917_v51 = vadd.f32 %v1401_v13, %v1383_v23  ;;  %v1456_v16 = vpop.f32.mrf.mxu1  ;;  %v1423_v23 = vpop.f32.mrf.mxu2 }
 0x19d   :  { %v1457_v63 = vadd.f32 %v1456_v16, %v1438_v24  ;;  %v1424_v36 = vadd.f32 %v1423_v23, %v3936_v39 }
 0x19e   :  { %v1487_v57 = vmin.f32 %v3917_v51, 20.0 }
 0x19f   :  { %v1443_v42 = vadd.f32 %v1442_v14, %v1424_v36 }
 0x1a0   :  { %v2668_v55 = vpop.eup %2667  ;;  %v1497_v4 = vmul.f32 1.442695, %v1487_v57 }
 0x1a1   :  { %v1509_v17 = vadd.f32 2.0, %v2668_v55 }
 0x1a2   :  { %2669 = vpow2.f32 %v1497_v4 }
 0x1a3   :  { %v1404_v27 = vpop.f32.mrf.mxu3  ;;  %v1517_v58 = vmul.f32 %v2668_v55, %v1509_v17 }
 0x1a4   :  { %v3926_v28 = vadd.f32 %v1404_v27, %v1386_v26  ;;  %v1458_v48 = vpop.f32.mrf.mxu1  ;;  %v1425_v31 = vpop.f32.mrf.mxu2 }
 0x1a5   :  { %v1533_v46 = vadd.f32 2.0, %v1517_v58  ;;  %v1525_v2 = vmul.f32 %v1517_v58, %v3908_v0  ;;  %v1440_v0 = vadd.f32 %v1439_v45, %v1421_v15 }
 0x1a6   :  { %v1489_v35 = vmin.f32 %v3926_v28, 20.0 }
 0x1a8   :  { %v2670_v37 = vpop.eup %2669  ;;  %v1501_v38 = vmul.f32 1.442695, %v1489_v35 }
 0x1a9   :  { %v1511_v22 = vadd.f32 2.0, %v2670_v37 }
 0x1aa   :  { %2671 = vpow2.f32 %v1501_v38  ;;  %v1444_v38 = vpop.f32.mrf.mxu0 }
 0x1ab   :  { %v1519_v43 = vmul.f32 %v2670_v37, %v1511_v22  ;;  %v1406_v59 = vpop.f32.mrf.mxu3  ;;  %2673 = vrcp.f32 %v1533_v46  ;;  %v1426_v22 = vadd.f32 %v1425_v31, %v3936_v39 }
 0x1ac   :  { %v3938_v20 = vadd.f32 %v1406_v59, %v1388_v7  ;;  %v1461_v55 = vpop.f32.mrf.mxu1 }
 0x1ad   :  { %v1535_v33 = vadd.f32 2.0, %v1519_v43  ;;  %v1527_v12 = vmul.f32 %v1519_v43, %v3917_v51  ;;  %v1459_v51 = vadd.f32 %v1458_v48, %v1440_v0  ;;  %v1462_v29 = vadd.f32 %v1461_v55, %v1443_v42 }
 0x1ae   :  { %v1491_v60 = vmin.f32 %v3938_v20, 20.0 }
 0x1af   :  { %2675 = vrcp.f32 %v1535_v33  ;;  %v1445_v33 = vadd.f32 %v1444_v38, %v1426_v22 }
 0x1b0   :  { %v2672_v25 = vpop.eup %2671  ;;  %v1505_v47 = vmul.f32 1.442695, %v1491_v60 }
 0x1b1   :  { %v1513_v32 = vadd.f32 2.0, %v2672_v25  ;;  %v2674_v34 = vpop.eup %2673 }
 0x1b2   :  { %2677 = vpow2.f32 %v1505_v47  ;;  %v1549_v41 = vmul.f32 %v2674_v34, %v1525_v2 }
 0x1b3   :  { %v1475_v50 = vpop.f32.mrf.mxu3  ;;  %v1521_v54 = vmul.f32 %v2672_v25, %v1513_v32 }
 0x1b4   :  { %v3950_v52 = vadd.f32 %v1475_v50, %v1457_v63  ;;  %v1463_v43 = vpop.f32.mrf.mxu1 }
 0x1b5   :  { %v2676_v53 = vpop.eup %2675  ;;  %v1537_v11 = vadd.f32 2.0, %v1521_v54  ;;  %v1529_v35 = vmul.f32 %v1521_v54, %v3926_v28  ;;  %v1464_v25 = vadd.f32 %v1463_v43, %v1445_v33 }
 0x1b6   :  { %v1551_v3 = vmul.f32 %v2676_v53, %v1527_v12  ;;  %v1486_v5 = vmin.f32 %v3950_v52, 20.0 }
 0x1b8   :  { %v2678_v6 = vpop.eup %2677  ;;  %v1557_v9 = vpack.c.bf16 %v1551_v3, %v1549_v41  ;;  %v1495_v10 = vmul.f32 1.442695, %v1486_v5 }
 0x1b9   :  { %v1515_v13 = vadd.f32 2.0, %v2678_v6 }
 0x1ba   :  { %2679 = vpow2.f32 %v1495_v10  ;;  %1701 = vmatmul.bf16.vlgmr.msrb.gmra.mxu2 %v1557_v9 }
 0x1bb   :  { %v1523_v56 = vmul.f32 %v2678_v6, %v1515_v13  ;;  %v1477_v44 = vpop.f32.mrf.mxu3  ;;  %2681 = vrcp.f32 %v1537_v11 }
 0x1bc   :  { %v1478_v57 = vadd.f32 %v1477_v44, %v1459_v51  ;;  %v2602_v51 = vld [vmem:[%s3974_s6] ss:$0 sm:$0xff]  ;;  %s1741_s6 = sshll.u32 %s3975_s7, 4  ;;  %s1742_s6 = int_to_ptr.hbm [resolvable:$true] %s1741_s6 }
 0x1bd   :  { %v1539_v19 = vadd.f32 2.0, %v1523_v56  ;;  %v1531_v61 = vmul.f32 %v1523_v56, %v3938_v20 }
 0x1be   :  { %v1488_v4 = vmin.f32 %v1478_v57, 20.0 }
 0x1bf   :  { %2683 = vrcp.f32 %v1539_v19 }
 0x1c0   :  { %v2680_v17 = vpop.eup %2679  ;;  %v1499_v26 = vmul.f32 1.442695, %v1488_v4 }
 0x1c1   :  { %v1510_v27 = vadd.f32 2.0, %v2680_v17  ;;  %v2682_v58 = vpop.eup %2681 }
 0x1c2   :  { %2685 = vpow2.f32 %v1499_v26  ;;  %v1553_v21 = vmul.f32 %v2682_v58, %v1529_v35 }
 0x1c3   :  { %v1480_v62 = vpop.f32.mrf.mxu3  ;;  %v1518_v46 = vmul.f32 %v2680_v17, %v1510_v27 }
 0x1c4   :  { %v1481_v37 = vadd.f32 %v1480_v62, %v1462_v29 }
 0x1c5   :  { %v2684_v18 = vpop.eup %2683  ;;  %v1534_v60 = vadd.f32 2.0, %v1518_v46  ;;  %v1526_v34 = vmul.f32 %v1518_v46, %v3950_v52 }
 0x1c6   :  { %v1490_v16 = vmin.f32 %v1481_v37, 20.0  ;;  %v1555_v7 = vmul.f32 %v2684_v18, %v1531_v61 }
 0x1c8   :  { %v2686_v59 = vpop.eup %2685  ;;  %v1503_v8 = vmul.f32 1.442695, %v1490_v16  ;;  %v1559_v40 = vpack.c.bf16 %v1555_v7, %v1553_v21 }
 0x1c9   :  { %v1512_v1 = vadd.f32 2.0, %v2686_v59 }
 0x1ca   :  { %2687 = vpow2.f32 %v1503_v8  ;;  %1706 = vmatmul.bf16.gmra.mxu2 %v1559_v40 }
 0x1cb   :  { %v1520_v28 = vmul.f32 %v2686_v59, %v1512_v1  ;;  %v1482_v20 = vpop.f32.mrf.mxu3  ;;  %2689 = vrcp.f32 %v1534_v60 }
 0x1cc   :  { %v1483_v24 = vadd.f32 %v1482_v20, %v1464_v25 }
 0x1cd   :  { %v1536_v47 = vadd.f32 2.0, %v1520_v28  ;;  %v1528_v48 = vmul.f32 %v1520_v28, %v1478_v57 }
 0x1ce   :  { %v1492_v45 = vmin.f32 %v1483_v24, 20.0 }
 0x1cf   :  { %2691 = vrcp.f32 %v1536_v47 }
 0x1d0   :  { %v2688_v39 = vpop.eup %2687  ;;  %v1507_v32 = vmul.f32 1.442695, %v1492_v45 }
 0x1d1   :  { %v1514_v30 = vadd.f32 2.0, %v2688_v39  ;;  %v2690_v63 = vpop.eup %2689 }
 0x1d2   :  { %2693 = vpow2.f32 %v1507_v32  ;;  %v1550_v12 = vmul.f32 %v2690_v63, %v1526_v34 }
 0x1d3   :  { %v1522_v2 = vmul.f32 %v2688_v39, %v1514_v30 }
 0x1d5   :  { %v2692_v50 = vpop.eup %2691  ;;  %v1538_v15 = vadd.f32 2.0, %v1522_v2  ;;  %v1530_v0 = vmul.f32 %v1522_v2, %v1481_v37 }
 0x1d6   :  { %v1552_v53 = vmul.f32 %v2692_v50, %v1528_v48 }
 0x1d7   :  { %2695 = vrcp.f32 %v1538_v15 }
 0x1d8   :  { %v2694_v54 = vpop.eup %2693  ;;  %v1558_v49 = vpack.c.bf16 %v1552_v53, %v1550_v12 }
 0x1d9   :  { %v1516_v41 = vadd.f32 2.0, %v2694_v54 }
 0x1da   :  { %1720 = vmatmul.bf16.vlgmr.msrb.gmra.mxu0 %v1558_v49 }
 0x1db   :  { %v1524_v3 = vmul.f32 %v2694_v54, %v1516_v41 }
 0x1dd   :  { %v1540_v5 = vadd.f32 2.0, %v1524_v3  ;;  %v2696_v6 = vpop.eup %2695  ;;  %v1532_v9 = vmul.f32 %v1524_v3, %v1483_v24 }
 0x1de   :  { %v1554_v23 = vmul.f32 %v2696_v6, %v1530_v0 }
 0x1df   :  { %2697 = vrcp.f32 %v1540_v5 }
 0x1e5   :  { %v2698_v10 = vpop.eup %2697 }
 0x1e6   :  { %v1556_v52 = vmul.f32 %v2698_v10, %v1532_v9 }
 0x1e8   :  { %v1560_v11 = vpack.c.bf16 %v1556_v52, %v1554_v23 }
 0x1ea   :  { %1725 = vmatmul.bf16.vlgmr.msrb.gmra.mxu1 %v1560_v11 }
 0x23d   :  { %v1702_v13 = vpop.f32.mrf.mxu2 }
 0x23e   :  { %v1703_v14 = vadd.f32 %v2602_v51, %v1702_v13 }
 0x245   :  { %v1704_v56 = vpop.f32.mrf.mxu2 }
 0x246   :  { %v1705_v19 = vadd.f32 %v2602_v51, %v1704_v56 }
 0x24d   :  { %v1707_v4 = vpop.f32.mrf.mxu2 }
 0x24e   :  { %v1708_v17 = vadd.f32 %v2602_v51, %v1707_v4 }
 0x255   :  { %v1709_v27 = vpop.f32.mrf.mxu2 }
 0x256   :  { %v1710_v29 = vadd.f32 %v2602_v51, %v1709_v27 }
 0x257   :  { %v1721_v44 = vpop.f32.mrf.mxu0 }
 0x258   :  { %v1722_v57 = vadd.f32 %v1721_v44, %v1703_v14 }
 0x25a   :  { %1731 = vst [vmem:[#allocation2] sm:$0xff] %v1722_v57 }
 0x25f   :  { %v1723_v55 = vpop.f32.mrf.mxu0 }
 0x260   :  { %v1724_v36 = vadd.f32 %v1723_v55, %v1705_v19 }
 0x262   :  { %1732 = vst [vmem:[#allocation2 + $0x8] sm:$0xff] %v1724_v36 }
 0x267   :  { %v1726_v42 = vpop.f32.mrf.mxu1 }
 0x268   :  { %v1727_v26 = vadd.f32 %v1726_v42, %v1708_v17 }
 0x26a   :  { %1733 = vst [vmem:[#allocation2 + $0x10] sm:$0xff] %v1727_v26 }
 0x26f   :  { %v1728_v58 = vpop.f32.mrf.mxu1 }
 0x270   :  { %v1729_v31 = vadd.f32 %v1728_v58, %v1710_v29 }
 0x272   :  { %1734 = vst [vmem:[#allocation2 + $0x18] sm:$0xff] %v1729_v31 }
 0x273   :  { %1747 = dma.vmem_to_hbm [thread:$0]  %s1740_s22, 512, %s1742_s6, [#allocation3], %s2726_s25, %s2726_s25, %s2727_s26  }
 0x274   :  { %2723 = dma.done.wait [#allocation3], 512  }
 0x275   :  { %2724 = vsyncadd [#allocation3], 4294966784 }
 0x276   :  { %1752 = vsyncpa [#allocation3], 1 }

</bundles_post_ra>
